<compile_context>
chip_gen: v6e
topology: v6e:2x2x1
jax: 0.10.0
libtpu: 0.0.40
codegen_flags: <defaults>
</compile_context>

<pallas_src>
import jax
import jax.numpy as jnp
from jax.experimental import pallas as pl
from jax.experimental.pallas import tpu as pltpu


TOK_BLK = 512      # tokens per grid step (multiple of 256 for v6e/v7x MXU)
VOCAB_ALIGN = 256  # pad the contraction (vocab) dim to the 256x256 MXU width


def _embedding_gather_kernel(ids_ref, hi_ref, mid_ref, lo_ref, out_ref):
    # ids_ref: (1, 1, TOK_BLK) int32   token ids for this block (lane-dense)
    # hi/mid/lo_ref: (VPAD, D)  bf16   exact 3-way split of the f32 table
    # out_ref: (TOK_BLK, D)     f32    gathered embeddings for this block
    vpad = hi_ref.shape[0]
    tok_blk = ids_ref.shape[-1]

    ids = ids_ref[0]                                               # (1, TOK_BLK)
    vocab_iota = jax.lax.broadcasted_iota(jnp.int32, (vpad, tok_blk), 0)
    # Transposed one-hot; entries are exactly 0.0 / 1.0 so bf16 is exact.
    one_hot_t = (vocab_iota == ids).astype(jnp.bfloat16)           # (VPAD, TOK_BLK)

    # Contract over the vocab dim (dim 0 of both operands); one single-pass
    # bf16 MXU matmul per table piece, accumulated in f32.
    dims = (((0,), (0,)), ((), ()))
    acc = jax.lax.dot_general(one_hot_t, hi_ref[...], dims,
                              preferred_element_type=jnp.float32)
    acc = acc + jax.lax.dot_general(one_hot_t, mid_ref[...], dims,
                                    preferred_element_type=jnp.float32)
    acc = acc + jax.lax.dot_general(one_hot_t, lo_ref[...], dims,
                                    preferred_element_type=jnp.float32)
    out_ref[...] = acc.astype(out_ref.dtype)


def discocat_embedding_lookup(ids_flat, table, *, tok_blk=TOK_BLK):
    """Gather rows of `table` (V, D) at `ids_flat` (N,) int32 -> (N, D).

    NOTE: ids are clamped to [0, V-1] (silent behavioral difference vs
    nn.Embedding, which raises on out-of-range indices).
    """
    n = ids_flat.shape[0]
    v, d = table.shape

    vpad = pl.cdiv(v, VOCAB_ALIGN) * VOCAB_ALIGN
    n_pad = pl.cdiv(n, tok_blk) * tok_blk
    n_blocks = n_pad // tok_blk

    ids = jnp.clip(ids_flat.astype(jnp.int32), 0, v - 1)
    if n_pad != n:
        ids = jnp.pad(ids, (0, n_pad - n))          # pad with id 0 ([PAD] row)
    ids3d = ids.reshape(n_blocks, 1, tok_blk)       # lane-dense id blocks

    # Exact 3-way bf16 split of the f32 table (hi + mid + lo == table to f32
    # precision); done once in the wrapper, reused for every token block.
    table_f32 = table.astype(jnp.float32)
    if vpad != v:
        table_f32 = jnp.pad(table_f32, ((0, vpad - v), (0, 0)))
    hi = table_f32.astype(jnp.bfloat16)
    r1 = table_f32 - hi.astype(jnp.float32)
    mid = r1.astype(jnp.bfloat16)
    lo = (r1 - mid.astype(jnp.float32)).astype(jnp.bfloat16)

    # VMEM footprint: 3 resident bf16 tables (x2 pipeline buffers), the
    # double-buffered output tile, and working space for the one-hot / acc.
    table_bytes = 3 * vpad * d * 2 * 2
    out_bytes = 2 * tok_blk * d * 4
    work_bytes = vpad * tok_blk * 2 * 2 + tok_blk * d * 4
    total_bytes = table_bytes + out_bytes + work_bytes
    if total_bytes > (40 << 20):
        # TODO(synk): DMA row-gather path for tables that don't fit v7x's
        # 64 MiB/TC VMEM (see module docstring).
        raise NotImplementedError(
            "Embedding table too large for the VMEM-resident one-hot-matmul "
            "path; use a scalar-prefetch DMA row gather instead.")
    vmem_limit = int(min(max(total_bytes + (8 << 20), 32 << 20), 64 << 20))

    out = pl.pallas_call(
        _embedding_gather_kernel,
        out_shape=jax.ShapeDtypeStruct((n_pad, d), table.dtype),
        grid_spec=pltpu.PrefetchScalarGridSpec(
            num_scalar_prefetch=0,
            grid=(n_blocks,),
            in_specs=[
                # ids for this token block, lane-dense (last dim = TOK_BLK).
                pl.BlockSpec((1, 1, tok_blk), lambda i: (i, 0, 0)),
                # full table pieces, constant index_map -> VMEM-resident.
                pl.BlockSpec((vpad, d), lambda i: (0, 0)),
                pl.BlockSpec((vpad, d), lambda i: (0, 0)),
                pl.BlockSpec((vpad, d), lambda i: (0, 0)),
            ],
            out_specs=pl.BlockSpec((tok_blk, d), lambda i: (i, 0)),
        ),
        compiler_params=pltpu.CompilerParams(
            dimension_semantics=("parallel",),
            vmem_limit_bytes=vmem_limit,
        ),
    )(ids3d, hi, mid, lo)
    return out[:n]


def make_discocat_table(key, vocab_size, mode="cat", pad_idx=0):
    """Deterministic synthetic stand-in for the pickled DisCoCat embeddings.

    The real module builds 256-dim complex embeddings per word; 'cat' mode
    concatenates real and imaginary parts (D = 512), 'abs' mode takes the
    modulus (D = 256).  The [PAD] row is zeroed (padding_idx behavior of
    nn.Embedding.from_pretrained).
    """
    kr, ki = jax.random.split(key)
    real = jax.random.uniform(kr, (vocab_size, 256), minval=-0.5, maxval=0.5)
    imag = jax.random.uniform(ki, (vocab_size, 256), minval=-0.5, maxval=0.5)
    if mode == "abs":
        table = jnp.sqrt(real * real + imag * imag)        # |z|
    elif mode == "cat":
        table = jnp.concatenate([real, imag], axis=-1)     # [Re(z) || Im(z)]
    else:
        raise ValueError(mode)
    table = table.at[pad_idx].set(0.0)
    return table.astype(jnp.float32)


class DiscocatEmbeddingPallas:
    """JAX/Pallas equivalent of DiscocatEmbedding.forward."""

    def __init__(self, vocab_size, mode="cat", pad_idx=0, key=None):
        if key is None:
            key = jax.random.PRNGKey(0)
        self.mode = mode
        self.vector_size = 256 if mode == "abs" else 512
        self.table = make_discocat_table(key, vocab_size, mode=mode,
                                         pad_idx=pad_idx)
        self.emb_dim = self.table.shape[1]

    def __call__(self, input_ids):
        # input_ids: (B, S) int32  ->  (B, S, D) float32
        ids_flat = input_ids.reshape(-1).astype(jnp.int32)
        out_flat = discocat_embedding_lookup(ids_flat, self.table)
        return out_flat.reshape(*input_ids.shape, self.emb_dim)


if __name__ == "__main__":
    key = jax.random.PRNGKey(0)
    k_tab, k_ids = jax.random.split(key)

    vocab_size = 32
    batch, seq = 2, 8
    pad_idx = 0

    module = DiscocatEmbeddingPallas(vocab_size, mode="cat",
                                     pad_idx=pad_idx, key=k_tab)

    # Token ids in [0, vocab); force a couple of [PAD] tokens to exercise the
    # zeroed padding row.
    ids = jax.random.randint(k_ids, (batch, seq), 0, vocab_size,
                             dtype=jnp.int32)
    ids = ids.at[0, 0].set(pad_idx).at[1, seq - 1].set(pad_idx)

    out = module(ids)
    out = jax.block_until_ready(out)

    # Reference: plain JAX embedding lookup (== nn.Embedding forward).
    ref = jnp.take(module.table, ids, axis=0)

    assert out.shape == (batch, seq, module.emb_dim), out.shape
    assert out.dtype == jnp.float32
    assert jnp.allclose(out, ref, rtol=1e-6, atol=1e-6), \
        "Pallas gather mismatch vs reference"
    assert jnp.all(out[0, 0] == 0.0) and jnp.all(out[1, -1] == 0.0)

    print("KERNEL_OK")
</pallas_src>

<mosaic_0001>
module attributes {stable_mosaic.version = 11 : i64} {
  func.func @_embedding_gather_kernel(%arg0: i32, %arg1: memref<1x1x512xi32, #tpu.memory_space<vmem>>, %arg2: memref<256x512xbf16, #tpu.memory_space<vmem>>, %arg3: memref<256x512xbf16, #tpu.memory_space<vmem>>, %arg4: memref<256x512xbf16, #tpu.memory_space<vmem>>, %arg5: memref<512x512xf32, #tpu.memory_space<vmem>>) attributes {dimension_semantics = [#tpu.dimension_semantics<parallel>], iteration_bounds = array<i64: 1>, scalar_prefetch = 0 : i64, scratch_operands = 0 : i64, tpu.core_type = #tpu.core_type<tc>, window_params = [{transform_indices = @transform_0, window_bounds = array<i64: 1, 1, 512>}, {pipeline_mode = #tpu.pipeline_mode<synchronous>, transform_indices = @transform_1, window_bounds = array<i64: 256, 512>}, {pipeline_mode = #tpu.pipeline_mode<synchronous>, transform_indices = @transform_2, window_bounds = array<i64: 256, 512>}, {pipeline_mode = #tpu.pipeline_mode<synchronous>, transform_indices = @transform_3, window_bounds = array<i64: 256, 512>}, {transform_indices = @transform_4, window_bounds = array<i64: 512, 512>}]} {
    %c0 = arith.constant 0 : index
    %c0_0 = arith.constant 0 : index
    %c0_1 = arith.constant 0 : index
    %0 = vector.load %arg1[%c0, %c0_0, %c0_1] : memref<1x1x512xi32, #tpu.memory_space<vmem>>, vector<1x1x512xi32>
    %1 = vector.shape_cast %0 : vector<1x1x512xi32> to vector<1x512xi32>
    %2 = tpu.iota {dimensions = array<i32: 0>} : vector<256x512xi32>
    %3 = vector.broadcast %1 : vector<1x512xi32> to vector<256x512xi32>
    %4 = arith.cmpi eq, %2, %3 : vector<256x512xi32>
    %5 = arith.extui %4 : vector<256x512xi1> to vector<256x512xi32>
    %6 = arith.sitofp %5 : vector<256x512xi32> to vector<256x512xf32>
    %7 = arith.truncf %6 : vector<256x512xf32> to vector<256x512xbf16>
    %c0_2 = arith.constant 0 : index
    %c0_3 = arith.constant 0 : index
    %8 = vector.load %arg2[%c0_2, %c0_3] : memref<256x512xbf16, #tpu.memory_space<vmem>>, vector<256x512xbf16>
    %cst = arith.constant dense<0.000000e+00> : vector<512x512xf32>
    %9 = tpu.matmul %7, %8, %cst {dimension_numbers = #tpu.dot_dimension_numbers<[0], [0], [1], [1], [0, 1, 1, 1], [], []>} : vector<256x512xbf16>, vector<256x512xbf16>, vector<512x512xf32> -> vector<512x512xf32>
    %c0_4 = arith.constant 0 : index
    %c0_5 = arith.constant 0 : index
    %10 = vector.load %arg3[%c0_4, %c0_5] : memref<256x512xbf16, #tpu.memory_space<vmem>>, vector<256x512xbf16>
    %cst_6 = arith.constant dense<0.000000e+00> : vector<512x512xf32>
    %11 = tpu.matmul %7, %10, %cst_6 {dimension_numbers = #tpu.dot_dimension_numbers<[0], [0], [1], [1], [0, 1, 1, 1], [], []>} : vector<256x512xbf16>, vector<256x512xbf16>, vector<512x512xf32> -> vector<512x512xf32>
    %12 = arith.addf %9, %11 : vector<512x512xf32>
    %c0_7 = arith.constant 0 : index
    %c0_8 = arith.constant 0 : index
    %13 = vector.load %arg4[%c0_7, %c0_8] : memref<256x512xbf16, #tpu.memory_space<vmem>>, vector<256x512xbf16>
    %cst_9 = arith.constant dense<0.000000e+00> : vector<512x512xf32>
    %14 = tpu.matmul %7, %13, %cst_9 {dimension_numbers = #tpu.dot_dimension_numbers<[0], [0], [1], [1], [0, 1, 1, 1], [], []>} : vector<256x512xbf16>, vector<256x512xbf16>, vector<512x512xf32> -> vector<512x512xf32>
    %15 = arith.addf %12, %14 : vector<512x512xf32>
    %c0_10 = arith.constant 0 : index
    %c0_11 = arith.constant 0 : index
    %16 = vector.load %arg5[%c0_10, %c0_11] : memref<512x512xf32, #tpu.memory_space<vmem>>, vector<512x512xf32>
    tpu.vector_store %arg5[%c0_10, %c0_11], %15 {strides = array<i32>} : memref<512x512xf32, #tpu.memory_space<vmem>>, vector<512x512xf32>,
    return
  }
  func.func @transform_0(%arg0: i32) -> (i32, i32, i32) {
    %c0_i32 = arith.constant 0 : i32
    %c0_i32_0 = arith.constant 0 : i32
    %c0_i32_1 = arith.constant 0 : i32
    return %arg0, %c0_i32, %c0_i32_0 : i32, i32, i32
  }
  func.func @transform_1(%arg0: i32) -> (i32, i32) {
    %c0_i32 = arith.constant 0 : i32
    %c0_i32_0 = arith.constant 0 : i32
    %c0_i32_1 = arith.constant 0 : i32
    return %c0_i32, %c0_i32_0 : i32, i32
  }
  func.func @transform_2(%arg0: i32) -> (i32, i32) {
    %c0_i32 = arith.constant 0 : i32
    %c0_i32_0 = arith.constant 0 : i32
    %c0_i32_1 = arith.constant 0 : i32
    return %c0_i32, %c0_i32_0 : i32, i32
  }
  func.func @transform_3(%arg0: i32) -> (i32, i32) {
    %c0_i32 = arith.constant 0 : i32
    %c0_i32_0 = arith.constant 0 : i32
    %c0_i32_1 = arith.constant 0 : i32
    return %c0_i32, %c0_i32_0 : i32, i32
  }
  func.func @transform_4(%arg0: i32) -> (i32, i32) {
    %c0_i32 = arith.constant 0 : i32
    %c0_i32_0 = arith.constant 0 : i32
    return %arg0, %c0_i32 : i32, i32
  }
}

</mosaic_0001>

<bundles_post_ra>
// kernel: tpu_custom_call.1
= control target key start
LH: loop header
LB: loop body
LE: loop exit
PB: predicated region body
PF: predicated region fallthrough
CT: control target
= control target key end

     0   :  { %9 = vsyncpa [#allocation3], 0  ;;  %s7864_s0 = inlined_call_operand.hbm [shape: s32[1,1,512], index: 0, kind: input, shape index: {}]   ;;  %s7865_s1 = inlined_call_operand.hbm [shape: bf16[256,512], index: 1, kind: input, shape index: {}]   ;;  %s7866_s2 = inlined_call_operand.hbm [shape: bf16[256,512], index: 2, kind: input, shape index: {}]   ;;  %s7867_s3 = inlined_call_operand.hbm [shape: bf16[256,512], index: 3, kind: input, shape index: {}]   ;;  %s7868_s4 = inlined_call_operand.hbm [shape: f32[512,512], index: 4, kind: output, shape index: {}]  }
   0x1   :  { %10 = vsyncpa [#allocation6], 0 }
   0x2   :  { %11 = vsyncpa [#allocation9], 0 }
   0x3   :  { %12 = vsyncpa [#allocation4], 0  ;;  %s5225_s15 = smov [#allocation5]  }
   0x4   :  { %s28_s16 = sshll.u32 %s5225_s15, 4  ;;  %s29_s16 = int_to_ptr.vmem [resolvable:$true] %s28_s16 }
   0x5   :  { %s5125_s17 = scalar_lea.vmem %s29_s16, 8192  ;;  %p5130_p1 = scmp.lt.s32.totalorder %s29_s16, %s29_s16 }
   0x6   :  { %p5126_p0 = scmp.ne.s32.totalorder %s29_s16, %s5125_s17  ;;  %p5131_p2 = scmp.lt.s32.totalorder %s5125_s17, %s5125_s17 }
   0x8   :  { %p5132_p3 = por %p5131_p2, %p5130_p1 }
   0xa   :  { %p5133_p4 = pnand %p5132_p3, %p5126_p0 }
   0xc   :  { %5136 = shalt.err (!%p5133_p4)
}
   0xd   :  { %s5226_s18 = smov 256   ;;  %s5227_s19 = smov 16  }
   0xe   :  { %34 = dma.hbm_to_vmem [thread:$0]  %s7865_s1, 8192, %s29_s16, [#allocation6], %s5226_s18, %s5226_s18, %s5227_s19  }
   0xf   :  { %s5228_s22 = smov [#allocation2]   ;;  %s5229_s24 = smov [#allocation7]  }
  0x10   :  { %s19_s23 = sshll.u32 %s5228_s22, 4  ;;  %s40_s25 = sshll.u32 %s5229_s24, 4  ;;  %s20_s23 = int_to_ptr.vmem [resolvable:$true] %s19_s23  ;;  %s41_s25 = int_to_ptr.vmem [resolvable:$true] %s40_s25 }
  0x11   :  { %s5145_s26 = scalar_lea.vmem %s20_s23, 64  ;;  %p5150_p6 = scmp.lt.s32.totalorder %s20_s23, %s20_s23 }
  0x12   :  { %p5146_p5 = scmp.ne.s32.totalorder %s20_s23, %s5145_s26  ;;  %p5151_p7 = scmp.lt.s32.totalorder %s5145_s26, %s5145_s26 }
  0x14   :  { %p5152_p8 = por %p5151_p7, %p5150_p6 }
  0x16   :  { %p5153_p9 = pnand %p5152_p8, %p5146_p5 }
  0x18   :  { %5156 = shalt.err (!%p5153_p9)
}
  0x19   :  { %22 = dma.hbm_to_vmem [thread:$0]  %s7864_s0, 64, %s20_s23, [#allocation3]  }
  0x1a   :  { %s5165_s29 = scalar_lea.vmem %s41_s25, 8192  ;;  %p5170_p11 = scmp.lt.s32.totalorder %s41_s25, %s41_s25 }
  0x1b   :  { %p5166_p10 = scmp.ne.s32.totalorder %s41_s25, %s5165_s29  ;;  %p5171_p12 = scmp.lt.s32.totalorder %s5165_s29, %s5165_s29 }
  0x1d   :  { %p5172_p13 = por %p5171_p12, %p5170_p11 }
  0x1f   :  { %p5173_p0 = pnand %p5172_p13, %p5166_p10 }
  0x21   :  { %5176 = shalt.err (!%p5173_p0)
}
  0x22   :  { %46 = dma.hbm_to_vmem [thread:$0]  %s7866_s2, 8192, %s41_s25, [#allocation6], %s5226_s18, %s5226_s18, %s5227_s19  }
  0x23   :  { %s5230_s5 = smov [#allocation8]  }
  0x24   :  { %s52_s6 = sshll.u32 %s5230_s5, 4  ;;  %s53_s6 = int_to_ptr.vmem [resolvable:$true] %s52_s6 }
  0x25   :  { %s5185_s7 = scalar_lea.vmem %s53_s6, 8192  ;;  %p5190_p2 = scmp.lt.s32.totalorder %s53_s6, %s53_s6 }
  0x26   :  { %p5186_p1 = scmp.ne.s32.totalorder %s53_s6, %s5185_s7  ;;  %p5191_p3 = scmp.lt.s32.totalorder %s5185_s7, %s5185_s7 }
  0x28   :  { %p5192_p4 = por %p5191_p3, %p5190_p2 }
  0x2a   :  { %p5193_p5 = pnand %p5192_p4, %p5186_p1 }
  0x2c   :  { %5196 = shalt.err (!%p5193_p5)
}
  0x2d   :  { %58 = dma.hbm_to_vmem [thread:$0]  %s7867_s3, 8192, %s53_s6, [#allocation9], %s5226_s18, %s5226_s18, %s5227_s19  }
  0x2e   :  { %5217 = dma.done.wait [#allocation3], 64  }
  0x2f   :  { %5218 = vsyncadd [#allocation3], 4294967232 }
  0x30   :  { %5219 = dma.done.wait [#allocation6], 16384  }
  0x31   :  { %5220 = vsyncadd [#allocation6], 4294950912 }
  0x32   :  { %5221 = dma.done.wait [#allocation9], 8192  }
  0x33   :  { %5222 = vsyncadd [#allocation9], 4294959104  ;;  %v72_v0 = vlaneseq  ;;  %v5317_v14 = vld [vmem:[#allocation2] sm:$0xf]  ;;  %v4828_v27 = vld [vmem:[#allocation7 + $0xe4] ss:$16 sps:$4 sm:$0xff]  }
  0x34   :  { %v4830_v28 = vld [vmem:[#allocation7 + $0xec] ss:$16 sps:$4 sm:$0xff]   ;;  %v4832_v29 = vld [vmem:[#allocation7 + $0xe0] ss:$16 sps:$4 sm:$0xff]   ;;  %v5231_v30 = vmov 0.0   ;;  %1145 = vmatprep.subr.bf16.mxu0 %v4828_v27  ;;  %s5232_s2 = smov [#allocation10]  }
  0x35   :  { %v5281_v1 = vshrl.u32 %v72_v0, 7  ;;  %v4833_v35 = vld [vmem:[#allocation7 + $0xe8] ss:$16 sps:$4 sm:$0xff]   ;;  %1498 = vmatprep.subr.bf16.mxu1 %v4830_v28  ;;  %v4834_v38 = vld [vmem:[#allocation7 + $0xc4] ss:$16 sps:$4 sm:$0xff]   ;;  %1146 = vmatpush1.bf16.msra.mxu0 %v4832_v29  ;;  %s4484_s3 = sshll.u32 %s5232_s2, 4  ;;  %s4485_s3 = int_to_ptr.vmem [resolvable:$true] %s4484_s3 }
  0x36   :  { %1499 = vmatpush1.bf16.msra.mxu1 %v4833_v35  ;;  %v4836_v41 = vld [vmem:[#allocation7 + $0xcc] ss:$16 sps:$4 sm:$0xff]   ;;  %v4838_v45 = vld [vmem:[#allocation7 + $0xc0] ss:$16 sps:$4 sm:$0xff]   ;;  %v4839_v46 = vld [vmem:[#allocation7 + $0xc8] ss:$16 sps:$4 sm:$0xff]   ;;  %1147 = vmatprep.subr.bf16.mxu0 %v4834_v38  ;;  %p5202_p7 = scmp.lt.s32.totalorder %s4485_s3, %s4485_s3 }
  0x37   :  { %v5284_v2 = vadd.s32 128, %v5281_v1  ;;  %v5287_v3 = vadd.s32 136, %v5281_v1  ;;  %v107_v4 = vsub.s32 0, %v5281_v1  ;;  %v5291_v5 = vadd.s32 8, %v5281_v1  ;;  %1500 = vmatprep.subr.bf16.mxu1 %v4836_v41  ;;  %v4840_v49 = vld [vmem:[#allocation7 + $0xa4] ss:$16 sps:$4 sm:$0xff]  }
  0x38   :  { %v5294_v6 = vadd.s32 144, %v5281_v1  ;;  %v5297_v7 = vadd.s32 152, %v5281_v1  ;;  %v5300_v8 = vadd.s32 16, %v5281_v1  ;;  %v5303_v9 = vadd.s32 24, %v5281_v1  ;;  %v4842_v52 = vld [vmem:[#allocation7 + $0xac] ss:$16 sps:$4 sm:$0xff]  }
  0x39   :  { %v5306_v10 = vadd.s32 160, %v5281_v1  ;;  %v5309_v11 = vadd.s32 168, %v5281_v1  ;;  %v5312_v12 = vadd.s32 32, %v5281_v1  ;;  %v5315_v13 = vadd.s32 40, %v5281_v1  ;;  %1148 = vmatpush1.bf16.msra.mxu0 %v4838_v45  ;;  %v4844_v56 = vld [vmem:[#allocation7 + $0xa0] ss:$16 sps:$4 sm:$0xff]  }
  0x3a   :  { %v5320_v15 = vadd.s32 176, %v5281_v1  ;;  %v5323_v16 = vadd.s32 184, %v5281_v1  ;;  %v5326_v17 = vadd.s32 48, %v5281_v1  ;;  %v5329_v18 = vadd.s32 56, %v5281_v1  ;;  %1501 = vmatpush1.bf16.msra.mxu1 %v4839_v46  ;;  %v4845_v57 = vld [vmem:[#allocation7 + $0xa8] ss:$16 sps:$4 sm:$0xff]   ;;  %1149 = vmatprep.subr.bf16.mxu0 %v4840_v49 }
  0x3b   :  { %v5332_v19 = vrot.slane %v5317_v14, %v107_v4  ;;  %v5335_v20 = vadd.s32 192, %v5281_v1  ;;  %v5338_v21 = vadd.s32 200, %v5281_v1  ;;  %v5341_v22 = vadd.s32 64, %v5281_v1  ;;  %v4846_v60 = vld [vmem:[#allocation7 + $0x84] ss:$16 sps:$4 sm:$0xff]   ;;  %1502 = vmatprep.subr.bf16.mxu1 %v4842_v52  ;;  %s5197_s9 = scalar_lea.vmem %s4485_s3, 32768 }
  0x3c   :  { %v5344_v23 = vadd.s32 72, %v5281_v1  ;;  %v5347_v24 = vadd.s32 208, %v5281_v1  ;;  %v5350_v25 = vadd.s32 216, %v5281_v1  ;;  %v5353_v26 = vadd.s32 80, %v5281_v1  ;;  %v4848_v63 = vld [vmem:[#allocation7 + $0x8c] ss:$16 sps:$4 sm:$0xff]   ;;  %p5198_p6 = scmp.ne.s32.totalorder %s4485_s3, %s5197_s9  ;;  %p5203_p8 = scmp.lt.s32.totalorder %s5197_s9, %s5197_s9 }
  0x3d   :  { %vm185_vm0 = vcmp.eq.s32.totalorder %v5284_v2, %v5332_v19  ;;  %vm189_vm1 = vcmp.eq.s32.totalorder %v5287_v3, %v5332_v19  ;;  %vm121_vm2 = vcmp.eq.s32.totalorder %v5281_v1, %v5332_v19  ;;  %vm125_vm3 = vcmp.eq.s32.totalorder %v5291_v5, %v5332_v19  ;;  %v4850_v4 = vld [vmem:[#allocation7 + $0x80] ss:$16 sps:$4 sm:$0xff]   ;;  %1150 = vmatpush1.bf16.msra.mxu0 %v4844_v56  ;;  %v4851_v29 = vld [vmem:[#allocation7 + $0x88] ss:$16 sps:$4 sm:$0xff]   ;;  %v4858_v49 = vld [vmem:[#allocation7 + $0x44] ss:$16 sps:$4 sm:$0xff]  }
  0x3e   :  { %v4562_v31 = vsel %vm185_vm0, 1.0, %v5231_v30  ;;  %v4566_v32 = vsel %vm189_vm1, 1.0, %v5231_v30  ;;  %v4498_v33 = vsel %vm121_vm2, 1.0, %v5231_v30  ;;  %v4502_v34 = vsel %vm125_vm3, 1.0, %v5231_v30  ;;  %1503 = vmatpush1.bf16.msra.mxu1 %v4845_v57  ;;  %1151 = vmatprep.subr.bf16.mxu0 %v4846_v60  ;;  %v4856_v38 = vld [vmem:[#allocation7 + $0x60] ss:$16 sps:$4 sm:$0xff]   ;;  %p5204_p9 = por %p5203_p8, %p5202_p7 }
  0x3f   :  { %v537_v36 = vpack.c.bf16 %v4566_v32, %v4562_v31  ;;  %v505_v37 = vpack.c.bf16 %v4502_v34, %v4498_v33  ;;  %vm193_vm4 = vcmp.eq.s32.totalorder %v5294_v6, %v5332_v19  ;;  %vm197_vm5 = vcmp.eq.s32.totalorder %v5297_v7, %v5332_v19  ;;  %v4852_v34 = vld [vmem:[#allocation7 + $0x64] ss:$16 sps:$4 sm:$0xff]   ;;  %1504 = vmatprep.subr.bf16.mxu1 %v4848_v63  ;;  %v4860_v52 = vld [vmem:[#allocation7 + $0x4c] ss:$16 sps:$4 sm:$0xff]  }
  0x40   :  { %v4570_v39 = vsel %vm193_vm4, 1.0, %v5231_v30  ;;  %v4574_v40 = vsel %vm197_vm5, 1.0, %v5231_v30  ;;  %vm129_vm6 = vcmp.eq.s32.totalorder %v5300_v8, %v5332_v19  ;;  %vm133_vm7 = vcmp.eq.s32.totalorder %v5303_v9, %v5332_v19  ;;  %p5205_p10 = pnand %p5204_p9, %p5198_p6 }
  0x41   :  { %761 = vxpose.xlu0.c.b16.start [1/8] %v537_v36, 128  ;;  %697 = vxpose.xlu1.c.b16.start [1/8] %v505_v37, 128  ;;  %v541_v42 = vpack.c.bf16 %v4574_v40, %v4570_v39  ;;  %v4506_v43 = vsel %vm129_vm6, 1.0, %v5231_v30  ;;  %v4510_v44 = vsel %vm133_vm7, 1.0, %v5231_v30  ;;  %vm201_vm8 = vcmp.eq.s32.totalorder %v5306_v10, %v5332_v19  ;;  %v4854_v37 = vld [vmem:[#allocation7 + $0x6c] ss:$16 sps:$4 sm:$0xff]  }
  0x42   :  { %v509_v47 = vpack.c.bf16 %v4510_v44, %v4506_v43  ;;  %vm205_vm9 = vcmp.eq.s32.totalorder %v5309_v11, %v5332_v19  ;;  %v4578_v48 = vsel %vm201_vm8, 1.0, %v5231_v30  ;;  %vm137_vm10 = vcmp.eq.s32.totalorder %v5312_v12, %v5332_v19  ;;  %v4857_v43 = vld [vmem:[#allocation7 + $0x68] ss:$16 sps:$4 sm:$0xff]   ;;  %1152 = vmatpush1.bf16.msra.mxu0 %v4850_v4  ;;  %1505 = vmatpush1.bf16.msra.mxu1 %v4851_v29 }
  0x43   :  { %v4582_v50 = vsel %vm205_vm9, 1.0, %v5231_v30  ;;  %vm141_vm11 = vcmp.eq.s32.totalorder %v5315_v13, %v5332_v19  ;;  %v4514_v51 = vsel %vm137_vm10, 1.0, %v5231_v30  ;;  %vm209_vm12 = vcmp.eq.s32.totalorder %v5320_v15, %v5332_v19  ;;  %1153 = vmatprep.subr.bf16.mxu0 %v4852_v34  ;;  %1506 = vmatprep.subr.bf16.mxu1 %v4854_v37  ;;  %v4869_v29 = vld [vmem:[#allocation7 + $0x28] ss:$16 sps:$4 sm:$0xff]   ;;  %v4870_v37 = vld [vmem:[#allocation7 + $0x4] ss:$16 sps:$4 sm:$0xff]  }
  0x44   :  { %v545_v53 = vpack.c.bf16 %v4582_v50, %v4578_v48  ;;  %v4518_v54 = vsel %vm141_vm11, 1.0, %v5231_v30  ;;  %vm213_vm13 = vcmp.eq.s32.totalorder %v5323_v16, %v5332_v19  ;;  %v4586_v55 = vsel %vm209_vm12, 1.0, %v5231_v30 }
  0x45   :  { %762 = vxpose.xlu0.c.b16.cont [2/8] %v541_v42, 128  ;;  %698 = vxpose.xlu1.c.b16.cont [2/8] %v509_v47, 128  ;;  %v513_v58 = vpack.c.bf16 %v4518_v54, %v4514_v51  ;;  %v4590_v59 = vsel %vm213_vm13, 1.0, %v5231_v30  ;;  %vm145_vm14 = vcmp.eq.s32.totalorder %v5326_v17, %v5332_v19  ;;  %vm149_vm15 = vcmp.eq.s32.totalorder %v5329_v18, %v5332_v19 }
  0x46   :  { %v4522_v61 = vsel %vm145_vm14, 1.0, %v5231_v30  ;;  %v4526_v62 = vsel %vm149_vm15, 1.0, %v5231_v30  ;;  %vm217_vm0 = vcmp.eq.s32.totalorder %v5335_v20, %v5332_v19  ;;  %vm221_vm1 = vcmp.eq.s32.totalorder %v5338_v21, %v5332_v19  ;;  %1154 = vmatpush1.bf16.msra.mxu0 %v4856_v38  ;;  %1507 = vmatpush1.bf16.msra.mxu1 %v4857_v43  ;;  %v4875_v43 = vld [vmem:[#allocation7 + $0x8] ss:$16 sps:$4 sm:$0xff]  }
  0x47   :  { %v4594_v0 = vsel %vm217_vm0, 1.0, %v5231_v30  ;;  %vm153_vm2 = vcmp.eq.s32.totalorder %v5341_v22, %v5332_v19  ;;  %v4598_v27 = vsel %vm221_vm1, 1.0, %v5231_v30  ;;  %vm157_vm3 = vcmp.eq.s32.totalorder %v5344_v23, %v5332_v19  ;;  %1155 = vmatprep.subr.bf16.mxu0 %v4858_v49  ;;  %1508 = vmatprep.subr.bf16.mxu1 %v4860_v52 }
  0x48   :  { %v4530_v28 = vsel %vm153_vm2, 1.0, %v5231_v30  ;;  %vm225_vm4 = vcmp.eq.s32.totalorder %v5347_v24, %v5332_v19  ;;  %v549_v31 = vpack.c.bf16 %v4590_v59, %v4586_v55  ;;  %v517_v32 = vpack.c.bf16 %v4526_v62, %v4522_v61  ;;  %v4864_v62 = vld [vmem:[#allocation7 + $0x24] ss:$16 sps:$4 sm:$0xff]  }
  0x49   :  { %763 = vxpose.xlu0.c.b16.cont [3/8] %v545_v53, 128  ;;  %699 = vxpose.xlu1.c.b16.cont [3/8] %v513_v58, 128  ;;  %v4534_v33 = vsel %vm157_vm3, 1.0, %v5231_v30  ;;  %vm229_vm5 = vcmp.eq.s32.totalorder %v5350_v25, %v5332_v19  ;;  %v553_v35 = vpack.c.bf16 %v4598_v27, %v4594_v0  ;;  %v5420_v36 = vadd.s32 88, %v5281_v1  ;;  %v4862_v53 = vld [vmem:[#allocation7 + $0x40] ss:$16 sps:$4 sm:$0xff]   ;;  %v4863_v58 = vld [vmem:[#allocation7 + $0x48] ss:$16 sps:$4 sm:$0xff]  }
  0x4a   :  { %vm161_vm6 = vcmp.eq.s32.totalorder %v5353_v26, %v5332_v19  ;;  %v521_v39 = vpack.c.bf16 %v4534_v33, %v4530_v28  ;;  %v4602_v40 = vsel %vm225_vm4, 1.0, %v5231_v30  ;;  %v5429_v41 = vadd.s32 224, %v5281_v1  ;;  %v4866_v0 = vld [vmem:[#allocation7 + $0x2c] ss:$16 sps:$4 sm:$0xff]   ;;  %v4868_v27 = vld [vmem:[#allocation7 + $0x20] ss:$16 sps:$4 sm:$0xff]   ;;  %1156 = vmatpush1.bf16.msra.mxu0 %v4862_v53  ;;  %1509 = vmatpush1.bf16.msra.mxu1 %v4863_v58 }
  0x4b   :  { %v5432_v42 = vadd.s32 232, %v5281_v1  ;;  %v4606_v44 = vsel %vm229_vm5, 1.0, %v5231_v30  ;;  %vm165_vm7 = vcmp.eq.s32.totalorder %v5420_v36, %v5332_v19  ;;  %v5438_v45 = vadd.s32 96, %v5281_v1  ;;  %1157 = vmatprep.subr.bf16.mxu0 %v4864_v62  ;;  %1510 = vmatprep.subr.bf16.mxu1 %v4866_v0  ;;  %v4881_v58 = vld [vmem:[#allocation7 + $0x1e8] ss:$16 sps:$4 sm:$0xff]  }
  0x4c   :  { %v5441_v46 = vadd.s32 104, %v5281_v1  ;;  %v4538_v47 = vsel %vm161_vm6, 1.0, %v5231_v30  ;;  %vm233_vm8 = vcmp.eq.s32.totalorder %v5429_v41, %v5332_v19  ;;  %v5452_v48 = vadd.s32 240, %v5281_v1 }
  0x4d   :  { %764 = vxpose.xlu0.c.b16.cont [4/8] %v549_v31, 128  ;;  %700 = vxpose.xlu1.c.b16.cont [4/8] %v517_v32, 128  ;;  %vm237_vm9 = vcmp.eq.s32.totalorder %v5432_v42, %v5332_v19  ;;  %v4542_v50 = vsel %vm165_vm7, 1.0, %v5231_v30  ;;  %vm169_vm10 = vcmp.eq.s32.totalorder %v5438_v45, %v5332_v19  ;;  %v5458_v51 = vadd.s32 248, %v5281_v1 }
  0x4e   :  { %vm173_vm11 = vcmp.eq.s32.totalorder %v5441_v46, %v5332_v19  ;;  %v557_v54 = vpack.c.bf16 %v4606_v44, %v4602_v40  ;;  %v4610_v55 = vsel %vm233_vm8, 1.0, %v5231_v30  ;;  %v4614_v56 = vsel %vm237_vm9, 1.0, %v5231_v30  ;;  %v4874_v40 = vld [vmem:[#allocation7] ss:$16 sps:$4 sm:$0xff]   ;;  %1158 = vmatpush1.bf16.msra.mxu0 %v4868_v27  ;;  %1511 = vmatpush1.bf16.msra.mxu1 %v4869_v29  ;;  %v4876_v44 = vld [vmem:[#allocation7 + $0x1e4] ss:$16 sps:$4 sm:$0xff]  }
  0x4f   :  { %v5465_v57 = vadd.s32 112, %v5281_v1  ;;  %v525_v59 = vpack.c.bf16 %v4542_v50, %v4538_v47  ;;  %v4546_v60 = vsel %vm169_vm10, 1.0, %v5231_v30  ;;  %vm241_vm12 = vcmp.eq.s32.totalorder %v5452_v48, %v5332_v19  ;;  %1159 = vmatprep.subr.bf16.mxu0 %v4870_v37  ;;  %v4884_v27 = vld [vmem:[#allocation7 + $0x1cc] ss:$16 sps:$4 sm:$0xff]  }
  0x50   :  { %v5474_v61 = vadd.s32 120, %v5281_v1  ;;  %v4550_v63 = vsel %vm173_vm11, 1.0, %v5231_v30  ;;  %vm245_vm13 = vcmp.eq.s32.totalorder %v5458_v51, %v5332_v19  ;;  %v111_v4 = vsub.s32 1, %v5281_v1 }
  0x51   :  { %765 = vxpose.xlu0.c.b16.cont [5/8] %v553_v35, 128  ;;  %701 = vxpose.xlu1.c.b16.cont [5/8] %v521_v39, 128  ;;  %vm177_vm14 = vcmp.eq.s32.totalorder %v5465_v57, %v5332_v19  ;;  %v561_v28 = vpack.c.bf16 %v4614_v56, %v4610_v55  ;;  %v529_v32 = vpack.c.bf16 %v4550_v63, %v4546_v60  ;;  %v4618_v33 = vsel %vm241_vm12, 1.0, %v5231_v30  ;;  %v4872_v39 = vld [vmem:[#allocation7 + $0xc] ss:$16 sps:$4 sm:$0xff]   ;;  %v4880_v55 = vld [vmem:[#allocation7 + $0x1e0] ss:$16 sps:$4 sm:$0xff]  }
  0x52   :  { %vm181_vm15 = vcmp.eq.s32.totalorder %v5474_v61, %v5332_v19  ;;  %v5488_v31 = vrot.slane %v5317_v14, %v111_v4  ;;  %v4622_v34 = vsel %vm245_vm13, 1.0, %v5231_v30  ;;  %v4554_v35 = vsel %vm177_vm14, 1.0, %v5231_v30  ;;  %1512 = vmatprep.subr.bf16.mxu1 %v4872_v39  ;;  %1160 = vmatpush1.bf16.msra.mxu0 %v4874_v40  ;;  %v4882_v4 = vld [vmem:[#allocation7 + $0x1c4] ss:$16 sps:$4 sm:$0xff]   ;;  %v4890_v40 = vld [vmem:[#allocation7 + $0x1ac] ss:$16 sps:$4 sm:$0xff]  }
  0x53   :  { %v4558_v38 = vsel %vm181_vm15, 1.0, %v5231_v30  ;;  %v565_v19 = vpack.c.bf16 %v4622_v34, %v4618_v33  ;;  %1513 = vmatpush1.bf16.msra.mxu1 %v4875_v43  ;;  %1161 = vmatprep.subr.bf16.mxu0 %v4876_v44  ;;  %v4893_v44 = vld [vmem:[#allocation7 + $0x1a8] ss:$16 sps:$4 sm:$0xff]  }
  0x54   :  { %vm186_vm0 = vcmp.eq.s32.totalorder %v5284_v2, %v5488_v31  ;;  %vm190_vm1 = vcmp.eq.s32.totalorder %v5287_v3, %v5488_v31  ;;  %vm122_vm2 = vcmp.eq.s32.totalorder %v5281_v1, %v5488_v31  ;;  %vm126_vm3 = vcmp.eq.s32.totalorder %v5291_v5, %v5488_v31 }
  0x55   :  { %766 = vxpose.xlu0.c.b16.cont [6/8] %v557_v54, 128  ;;  %702 = vxpose.xlu1.c.b16.cont [6/8] %v525_v59, 128  ;;  %v533_v47 = vpack.c.bf16 %v4558_v38, %v4554_v35  ;;  %v4563_v49 = vsel %vm186_vm0, 1.0, %v5231_v30  ;;  %v4567_v50 = vsel %vm190_vm1, 1.0, %v5231_v30  ;;  %v4499_v52 = vsel %vm122_vm2, 1.0, %v5231_v30  ;;  %v4878_v54 = vld [vmem:[#allocation7 + $0x1ec] ss:$16 sps:$4 sm:$0xff]  }
  0x56   :  { %v4503_v53 = vsel %vm126_vm3, 1.0, %v5231_v30  ;;  %vm194_vm4 = vcmp.eq.s32.totalorder %v5294_v6, %v5488_v31  ;;  %vm198_vm5 = vcmp.eq.s32.totalorder %v5297_v7, %v5488_v31  ;;  %vm130_vm6 = vcmp.eq.s32.totalorder %v5300_v8, %v5488_v31  ;;  %1514 = vmatprep.subr.bf16.mxu1 %v4878_v54  ;;  %1162 = vmatpush2.bf16.msra.mxu0 %v4880_v55  ;;  %v4888_v38 = vld [vmem:[#allocation7 + $0x1a4] ss:$16 sps:$4 sm:$0xff]   ;;  %v4896_v55 = vld [vmem:[#allocation7 + $0x18c] ss:$16 sps:$4 sm:$0xff]  }
  0x57   :  { %vm134_vm7 = vcmp.eq.s32.totalorder %v5303_v9, %v5488_v31  ;;  %v538_v56 = vpack.c.bf16 %v4567_v50, %v4563_v49  ;;  %v506_v59 = vpack.c.bf16 %v4503_v53, %v4499_v52  ;;  %v4571_v60 = vsel %vm194_vm4, 1.0, %v5231_v30  ;;  %1515 = vmatpush2.bf16.msra.mxu1 %v4881_v58  ;;  %1163 = vmatprep.subr.bf16.mxu0 %v4882_v4  ;;  %v4898_v58 = vld [vmem:[#allocation7 + $0x180] ss:$16 sps:$4 sm:$0xff]  }
  0x58   :  { %v4575_v62 = vsel %vm198_vm5, 1.0, %v5231_v30  ;;  %v4507_v63 = vsel %vm130_vm6, 1.0, %v5231_v30  ;;  %v4511_v0 = vsel %vm134_vm7, 1.0, %v5231_v30  ;;  %vm202_vm8 = vcmp.eq.s32.totalorder %v5306_v10, %v5488_v31  ;;  %1516 = vmatprep.subr.bf16.mxu1 %v4884_v27  ;;  %v4900_v27 = vld [vmem:[#allocation7 + $0x164] ss:$16 sps:$4 sm:$0xff]  }
  0x59   :  { %767 = vxpose.xlu0.c.b16.cont [7/8] %v561_v28, 128  ;;  %703 = vxpose.xlu1.c.b16.cont [7/8] %v529_v32, 128  ;;  %vm206_vm9 = vcmp.eq.s32.totalorder %v5309_v11, %v5488_v31  ;;  %vm138_vm10 = vcmp.eq.s32.totalorder %v5312_v12, %v5488_v31  ;;  %v4886_v28 = vld [vmem:[#allocation7 + $0x1c0] ss:$16 sps:$4 sm:$0xff]   ;;  %vm142_vm11 = vcmp.eq.s32.totalorder %v5315_v13, %v5488_v31  ;;  %v4887_v32 = vld [vmem:[#allocation7 + $0x1c8] ss:$16 sps:$4 sm:$0xff]   ;;  %v4579_v34 = vsel %vm202_vm8, 1.0, %v5231_v30 }
  0x5a   :  { %v542_v29 = vpack.c.bf16 %v4575_v62, %v4571_v60  ;;  %v510_v33 = vpack.c.bf16 %v4511_v0, %v4507_v63  ;;  %v4583_v35 = vsel %vm206_vm9, 1.0, %v5231_v30  ;;  %v4515_v37 = vsel %vm138_vm10, 1.0, %v5231_v30  ;;  %1164 = vmatpush2.bf16.msra.mxu0 %v4886_v28  ;;  %v4902_v28 = vld [vmem:[#allocation7 + $0x16c] ss:$16 sps:$4 sm:$0xff]  }
  0x5b   :  { %v4519_v39 = vsel %vm142_vm11, 1.0, %v5231_v30  ;;  %vm210_vm12 = vcmp.eq.s32.totalorder %v5320_v15, %v5488_v31  ;;  %vm214_vm13 = vcmp.eq.s32.totalorder %v5323_v16, %v5488_v31  ;;  %vm146_vm14 = vcmp.eq.s32.totalorder %v5326_v17, %v5488_v31  ;;  %1517 = vmatpush2.bf16.msra.mxu1 %v4887_v32  ;;  %1165 = vmatprep.subr.bf16.mxu0 %v4888_v38 }
  0x5c   :  { %vm150_vm15 = vcmp.eq.s32.totalorder %v5329_v18, %v5488_v31  ;;  %v546_v43 = vpack.c.bf16 %v4583_v35, %v4579_v34  ;;  %v514_v49 = vpack.c.bf16 %v4519_v39, %v4515_v37  ;;  %v4587_v50 = vsel %vm210_vm12, 1.0, %v5231_v30  ;;  %1518 = vmatprep.subr.bf16.mxu1 %v4890_v40 }
  0x5d   :  { %768 = vxpose.xlu0.c.b16.end [8/8] %v565_v19, 128  ;;  %704 = vxpose.xlu1.c.b16.end [8/8] %v533_v47, 128  ;;  %v4892_v19 = vld [vmem:[#allocation7 + $0x1a0] ss:$16 sps:$4 sm:$0xff]   ;;  %v4894_v47 = vld [vmem:[#allocation7 + $0x184] ss:$16 sps:$4 sm:$0xff]   ;;  %v4591_v52 = vsel %vm214_vm13, 1.0, %v5231_v30  ;;  %v4523_v53 = vsel %vm146_vm14, 1.0, %v5231_v30  ;;  %vm218_vm0 = vcmp.eq.s32.totalorder %v5335_v20, %v5488_v31  ;;  %vm222_vm1 = vcmp.eq.s32.totalorder %v5338_v21, %v5488_v31 }
  0x5e   :  { %v4527_v54 = vsel %vm150_vm15, 1.0, %v5231_v30  ;;  %vm154_vm2 = vcmp.eq.s32.totalorder %v5341_v22, %v5488_v31  ;;  %vm158_vm3 = vcmp.eq.s32.totalorder %v5344_v23, %v5488_v31  ;;  %1166 = vmatpush2.bf16.msra.mxu0 %v4892_v19  ;;  %v4595_v62 = vsel %vm218_vm0, 1.0, %v5231_v30  ;;  %v4906_v19 = vld [vmem:[#allocation7 + $0x144] ss:$16 sps:$4 sm:$0xff]  }
  0x5f   :  { %1519 = vmatpush2.bf16.msra.mxu1 %v4893_v44  ;;  %v518_v60 = vpack.c.bf16 %v4527_v54, %v4523_v53  ;;  %v4599_v63 = vsel %vm222_vm1, 1.0, %v5231_v30  ;;  %v4531_v0 = vsel %vm154_vm2, 1.0, %v5231_v30  ;;  %1167 = vmatprep.subr.bf16.mxu0 %v4894_v47  ;;  %v4535_v4 = vsel %vm158_vm3, 1.0, %v5231_v30  ;;  %v4910_v44 = vld [vmem:[#allocation7 + $0x140] ss:$16 sps:$4 sm:$0xff]  }
  0x60   :  { %1520 = vmatprep.subr.bf16.mxu1 %v4896_v55  ;;  %vm226_vm4 = vcmp.eq.s32.totalorder %v5347_v24, %v5488_v31  ;;  %vm230_vm5 = vcmp.eq.s32.totalorder %v5350_v25, %v5488_v31  ;;  %vm162_vm6 = vcmp.eq.s32.totalorder %v5353_v26, %v5488_v31  ;;  %vm166_vm7 = vcmp.eq.s32.totalorder %v5420_v36, %v5488_v31 }
  0x61   :  { %777 = vxpose.xlu0.c.b16.start [1/8] %v538_v56, 128  ;;  %713 = vxpose.xlu1.c.b16.start [1/8] %v506_v59, 128  ;;  %v550_v56 = vpack.c.bf16 %v4591_v52, %v4587_v50  ;;  %v4899_v59 = vld [vmem:[#allocation7 + $0x188] ss:$16 sps:$4 sm:$0xff]   ;;  %v554_v32 = vpack.c.bf16 %v4599_v63, %v4595_v62  ;;  %v115_v34 = vsub.s32 2, %v5281_v1  ;;  %v522_v35 = vpack.c.bf16 %v4535_v4, %v4531_v0 }
  0x62   :  { %1168 = vmatpush2.bf16.msra.mxu0 %v4898_v58  ;;  %v4603_v37 = vsel %vm226_vm4, 1.0, %v5231_v30  ;;  %v4607_v38 = vsel %vm230_vm5, 1.0, %v5231_v30  ;;  %v4539_v39 = vsel %vm162_vm6, 1.0, %v5231_v30  ;;  %v4543_v40 = vsel %vm166_vm7, 1.0, %v5231_v30  ;;  %v4914_v58 = vld [vmem:[#allocation7 + $0x12c] ss:$16 sps:$4 sm:$0xff]  }
  0x63   :  { %1521 = vmatpush2.bf16.msra.mxu1 %v4899_v59  ;;  %1169 = vmatprep.subr.bf16.mxu0 %v4900_v27  ;;  %vm234_vm8 = vcmp.eq.s32.totalorder %v5429_v41, %v5488_v31  ;;  %vm238_vm9 = vcmp.eq.s32.totalorder %v5432_v42, %v5488_v31  ;;  %vm170_vm10 = vcmp.eq.s32.totalorder %v5438_v45, %v5488_v31  ;;  %v4917_v62 = vld [vmem:[#allocation7 + $0x128] ss:$16 sps:$4 sm:$0xff]  }
  0x64   :  { %1522 = vmatprep.subr.bf16.mxu1 %v4902_v28  ;;  %vm174_vm11 = vcmp.eq.s32.totalorder %v5441_v46, %v5488_v31  ;;  %v558_v47 = vpack.c.bf16 %v4607_v38, %v4603_v37  ;;  %v526_v50 = vpack.c.bf16 %v4543_v40, %v4539_v39  ;;  %v4611_v52 = vsel %vm234_vm8, 1.0, %v5231_v30  ;;  %v4926_v37 = vld [vmem:[#allocation5 + $0xe4] ss:$16 sps:$4 sm:$0xff]   ;;  %v4929_v40 = vld [vmem:[#allocation5 + $0xec] ss:$16 sps:$4 sm:$0xff]  }
  0x65   :  { %778 = vxpose.xlu0.c.b16.cont [2/8] %v542_v29, 128  ;;  %714 = vxpose.xlu1.c.b16.cont [2/8] %v510_v33, 128  ;;  %v4904_v29 = vld [vmem:[#allocation7 + $0x160] ss:$16 sps:$4 sm:$0xff]   ;;  %v4905_v33 = vld [vmem:[#allocation7 + $0x168] ss:$16 sps:$4 sm:$0xff]   ;;  %v4615_v53 = vsel %vm238_vm9, 1.0, %v5231_v30  ;;  %v4547_v54 = vsel %vm170_vm10, 1.0, %v5231_v30  ;;  %vm242_vm12 = vcmp.eq.s32.totalorder %v5452_v48, %v5488_v31  ;;  %vm246_vm13 = vcmp.eq.s32.totalorder %v5458_v51, %v5488_v31 }
  0x66   :  { %1170 = vmatpush2.bf16.msra.mxu0 %v4904_v29  ;;  %v4551_v55 = vsel %vm174_vm11, 1.0, %v5231_v30  ;;  %v5593_v59 = vrot.slane %v5317_v14, %v115_v34  ;;  %vm178_vm14 = vcmp.eq.s32.totalorder %v5465_v57, %v5488_v31  ;;  %vm182_vm15 = vcmp.eq.s32.totalorder %v5474_v61, %v5488_v31  ;;  %v4918_v14 = vld [vmem:[#allocation7 + $0x104] ss:$16 sps:$4 sm:$0xff]   ;;  %v4922_v31 = vld [vmem:[#allocation7 + $0x100] ss:$16 sps:$4 sm:$0xff]  }
  0x67   :  { %1523 = vmatpush2.bf16.msra.mxu1 %v4905_v33  ;;  %1171 = vmatprep.subr.bf16.mxu0 %v4906_v19  ;;  %v562_v63 = vpack.c.bf16 %v4615_v53, %v4611_v52  ;;  %v530_v0 = vpack.c.bf16 %v4551_v55, %v4547_v54  ;;  %v4619_v4 = vsel %vm242_vm12, 1.0, %v5231_v30  ;;  %v4623_v27 = vsel %vm246_vm13, 1.0, %v5231_v30  ;;  %v4923_v33 = vld [vmem:[#allocation7 + $0x108] ss:$16 sps:$4 sm:$0xff]  }
  0x68   :  { %v4555_v28 = vsel %vm178_vm14, 1.0, %v5231_v30  ;;  %v4559_v29 = vsel %vm182_vm15, 1.0, %v5231_v30  ;;  %vm187_vm0 = vcmp.eq.s32.totalorder %v5284_v2, %v5593_v59  ;;  %vm191_vm1 = vcmp.eq.s32.totalorder %v5287_v3, %v5593_v59 }
  0x69   :  { %779 = vxpose.xlu0.c.b16.cont [3/8] %v546_v43, 128  ;;  %715 = vxpose.xlu1.c.b16.cont [3/8] %v514_v49, 128  ;;  %v4908_v43 = vld [vmem:[#allocation7 + $0x14c] ss:$16 sps:$4 sm:$0xff]   ;;  %v4911_v49 = vld [vmem:[#allocation7 + $0x148] ss:$16 sps:$4 sm:$0xff]   ;;  %vm123_vm2 = vcmp.eq.s32.totalorder %v5281_v1, %v5593_v59  ;;  %vm127_vm3 = vcmp.eq.s32.totalorder %v5291_v5, %v5593_v59  ;;  %v566_v34 = vpack.c.bf16 %v4623_v27, %v4619_v4  ;;  %v4564_v38 = vsel %vm187_vm0, 1.0, %v5231_v30 }
  0x6a   :  { %1524 = vmatprep.subr.bf16.mxu1 %v4908_v43  ;;  %1172 = vmatpush2.bf16.msra.mxu0 %v4910_v44  ;;  %v4568_v39 = vsel %vm191_vm1, 1.0, %v5231_v30  ;;  %v4500_v19 = vsel %vm123_vm2, 1.0, %v5231_v30  ;;  %v4504_v43 = vsel %vm127_vm3, 1.0, %v5231_v30  ;;  %vm195_vm4 = vcmp.eq.s32.totalorder %v5294_v6, %v5593_v59 }
  0x6b   :  { %1525 = vmatpush2.bf16.msra.mxu1 %v4911_v49  ;;  %vm199_vm5 = vcmp.eq.s32.totalorder %v5297_v7, %v5593_v59  ;;  %vm131_vm6 = vcmp.eq.s32.totalorder %v5300_v8, %v5593_v59  ;;  %vm135_vm7 = vcmp.eq.s32.totalorder %v5303_v9, %v5593_v59  ;;  %v539_v44 = vpack.c.bf16 %v4568_v39, %v4564_v38 }
  0x6c   :  { %1526 = vmatprep.subr.bf16.mxu1 %v4914_v58  ;;  %v4572_v49 = vsel %vm195_vm4, 1.0, %v5231_v30  ;;  %v4508_v52 = vsel %vm131_vm6, 1.0, %v5231_v30  ;;  %v4512_v53 = vsel %vm135_vm7, 1.0, %v5231_v30  ;;  %vm203_vm8 = vcmp.eq.s32.totalorder %v5306_v10, %v5593_v59 }
  0x6d   :  { %780 = vxpose.xlu0.c.b16.cont [4/8] %v550_v56, 128  ;;  %716 = vxpose.xlu1.c.b16.cont [4/8] %v518_v60, 128  ;;  %v4912_v56 = vld [vmem:[#allocation7 + $0x124] ss:$16 sps:$4 sm:$0xff]   ;;  %v4916_v60 = vld [vmem:[#allocation7 + $0x120] ss:$16 sps:$4 sm:$0xff]   ;;  %vm207_vm9 = vcmp.eq.s32.totalorder %v5309_v11, %v5593_v59  ;;  %vm139_vm10 = vcmp.eq.s32.totalorder %v5312_v12, %v5593_v59  ;;  %vm143_vm11 = vcmp.eq.s32.totalorder %v5315_v13, %v5593_v59 }
  0x6e   :  { %1173 = vmatprep.subr.bf16.mxu0 %v4912_v56  ;;  %v511_v55 = vpack.c.bf16 %v4512_v53, %v4508_v52  ;;  %v4580_v56 = vsel %vm203_vm8, 1.0, %v5231_v30  ;;  %v4584_v58 = vsel %vm207_vm9, 1.0, %v5231_v30  ;;  %vm211_vm12 = vcmp.eq.s32.totalorder %v5320_v15, %v5593_v59 }
  0x6f   :  { %1174 = vmatpush2.bf16.msra.mxu0 %v4916_v60  ;;  %1527 = vmatpush2.bf16.msra.mxu1 %v4917_v62  ;;  %v4516_v60 = vsel %vm139_vm10, 1.0, %v5231_v30  ;;  %v4520_v62 = vsel %vm143_vm11, 1.0, %v5231_v30  ;;  %vm215_vm13 = vcmp.eq.s32.totalorder %v5323_v16, %v5593_v59  ;;  %vm147_vm14 = vcmp.eq.s32.totalorder %v5326_v17, %v5593_v59 }
  0x70   :  { %1175 = vmatprep.subr.bf16.mxu0 %v4918_v14  ;;  %vm151_vm15 = vcmp.eq.s32.totalorder %v5329_v18, %v5593_v59  ;;  %v4588_v4 = vsel %vm211_vm12, 1.0, %v5231_v30  ;;  %v4592_v27 = vsel %vm215_vm13, 1.0, %v5231_v30  ;;  %v4524_v14 = vsel %vm147_vm14, 1.0, %v5231_v30 }
  0x71   :  { %781 = vxpose.xlu0.c.b16.cont [5/8] %v554_v32, 128  ;;  %717 = vxpose.xlu1.c.b16.cont [5/8] %v522_v35, 128  ;;  %v4920_v32 = vld [vmem:[#allocation7 + $0x10c] ss:$16 sps:$4 sm:$0xff]   ;;  %v534_v35 = vpack.c.bf16 %v4559_v29, %v4555_v28  ;;  %v4528_v28 = vsel %vm151_vm15, 1.0, %v5231_v30  ;;  %vm219_vm0 = vcmp.eq.s32.totalorder %v5335_v20, %v5593_v59  ;;  %vm223_vm1 = vcmp.eq.s32.totalorder %v5338_v21, %v5593_v59 }
  0x72   :  { %1528 = vmatprep.subr.bf16.mxu1 %v4920_v32  ;;  %vm155_vm2 = vcmp.eq.s32.totalorder %v5341_v22, %v5593_v59  ;;  %vm159_vm3 = vcmp.eq.s32.totalorder %v5344_v23, %v5593_v59  ;;  %v551_v29 = vpack.c.bf16 %v4592_v27, %v4588_v4  ;;  %v519_v32 = vpack.c.bf16 %v4528_v28, %v4524_v14 }
  0x73   :  { %1176 = vmatpush2.bf16.msra.mxu0 %v4922_v31  ;;  %1529 = vmatpush2.bf16.msra.mxu1 %v4923_v33  ;;  %v4596_v31 = vsel %vm219_vm0, 1.0, %v5231_v30  ;;  %v4600_v33 = vsel %vm223_vm1, 1.0, %v5231_v30  ;;  %vm227_vm4 = vcmp.eq.s32.totalorder %v5347_v24, %v5593_v59  ;;  %vm163_vm6 = vcmp.eq.s32.totalorder %v5353_v26, %v5593_v59 }
  0x74   :  { %2171 = vmatprep.subr.bf16.mxu0 %v4926_v37  ;;  %2524 = vmatprep.subr.bf16.mxu1 %v4929_v40  ;;  %vm167_vm7 = vcmp.eq.s32.totalorder %v5420_v36, %v5593_v59  ;;  %v555_v37 = vpack.c.bf16 %v4600_v33, %v4596_v31  ;;  %v4604_v39 = vsel %vm227_vm4, 1.0, %v5231_v30  ;;  %vm235_vm8 = vcmp.eq.s32.totalorder %v5429_v41, %v5593_v59  ;;  %v4932_v31 = vld [vmem:[#allocation5 + $0xc4] ss:$16 sps:$4 sm:$0xff]  }
  0x75   :  { %782 = vxpose.xlu0.c.b16.cont [6/8] %v558_v47, 128  ;;  %718 = vxpose.xlu1.c.b16.cont [6/8] %v526_v50, 128  ;;  %v507_v47 = vpack.c.bf16 %v4504_v43, %v4500_v19  ;;  %v4576_v50 = vsel %vm199_vm5, 1.0, %v5231_v30  ;;  %vm231_vm5 = vcmp.eq.s32.totalorder %v5350_v25, %v5593_v59  ;;  %v4540_v19 = vsel %vm163_vm6, 1.0, %v5231_v30 }
  0x76   :  { %v543_v54 = vpack.c.bf16 %v4576_v50, %v4572_v49  ;;  %v4608_v40 = vsel %vm231_vm5, 1.0, %v5231_v30  ;;  %v4544_v43 = vsel %vm167_vm7, 1.0, %v5231_v30  ;;  %vm239_vm9 = vcmp.eq.s32.totalorder %v5432_v42, %v5593_v59 }
  0x77   :  { %vm171_vm10 = vcmp.eq.s32.totalorder %v5438_v45, %v5593_v59  ;;  %vm175_vm11 = vcmp.eq.s32.totalorder %v5441_v46, %v5593_v59  ;;  %v527_v49 = vpack.c.bf16 %v4544_v43, %v4540_v19  ;;  %v4612_v50 = vsel %vm235_vm8, 1.0, %v5231_v30  ;;  %v4938_v43 = vld [vmem:[#allocation5 + $0xa4] ss:$16 sps:$4 sm:$0xff]  }
  0x78   :  { %v4616_v52 = vsel %vm239_vm9, 1.0, %v5231_v30  ;;  %v4548_v53 = vsel %vm171_vm10, 1.0, %v5231_v30  ;;  %vm243_vm12 = vcmp.eq.s32.totalorder %v5452_v48, %v5593_v59  ;;  %vm247_vm13 = vcmp.eq.s32.totalorder %v5458_v51, %v5593_v59 }
  0x79   :  { %783 = vxpose.xlu0.c.b16.cont [7/8] %v562_v63, 128  ;;  %719 = vxpose.xlu1.c.b16.cont [7/8] %v530_v0, 128  ;;  %v547_v63 = vpack.c.bf16 %v4584_v58, %v4580_v56  ;;  %v515_v0 = vpack.c.bf16 %v4520_v62, %v4516_v60  ;;  %vm179_vm14 = vcmp.eq.s32.totalorder %v5465_v57, %v5593_v59  ;;  %v4620_v62 = vsel %vm243_vm12, 1.0, %v5231_v30 }
  0x7a   :  { %vm183_vm15 = vcmp.eq.s32.totalorder %v5474_v61, %v5593_v59  ;;  %v563_v58 = vpack.c.bf16 %v4616_v52, %v4612_v50  ;;  %v4936_v52 = vld [vmem:[#allocation5 + $0xa0] ss:$16 sps:$4 sm:$0xff]  }
  0x7b   :  { %v4560_v4 = vsel %vm183_vm15, 1.0, %v5231_v30 }
  0x7d   :  { %784 = vxpose.xlu0.c.b16.end [8/8] %v566_v34, 128  ;;  %720 = vxpose.xlu1.c.b16.end [8/8] %v534_v35, 128  ;;  %v4532_v34 = vsel %vm155_vm2, 1.0, %v5231_v30  ;;  %v4536_v35 = vsel %vm159_vm3, 1.0, %v5231_v30 }
  0x7e   :  { %v523_v38 = vpack.c.bf16 %v4536_v35, %v4532_v34 }
  0x81   :  { %793 = vxpose.xlu0.c.b16.start [1/8] %v539_v44, 128  ;;  %729 = vxpose.xlu1.c.b16.start [1/8] %v507_v47, 128  ;;  %v119_v44 = vsub.s32 3, %v5281_v1  ;;  %v559_v47 = vpack.c.bf16 %v4608_v40, %v4604_v39  ;;  %v4930_v39 = vld [vmem:[#allocation5 + $0xc0] ss:$16 sps:$4 sm:$0xff]   ;;  %v4933_v40 = vld [vmem:[#allocation5 + $0xc8] ss:$16 sps:$4 sm:$0xff]  }
  0x85   :  { %794 = vxpose.xlu0.c.b16.cont [2/8] %v543_v54, 128  ;;  %730 = vxpose.xlu1.c.b16.cont [2/8] %v511_v55, 128  ;;  %v4552_v54 = vsel %vm175_vm11, 1.0, %v5231_v30  ;;  %v5116_v55 = vld [vmem:[#allocation2] sm:$0xf] }
  0x86   :  { %v5696_v56 = vrot.slane %v5116_v55, %v119_v44  ;;  %v531_v60 = vpack.c.bf16 %v4552_v54, %v4548_v53  ;;  %v4941_v44 = vld [vmem:[#allocation5 + $0xac] ss:$16 sps:$4 sm:$0xff]   ;;  %v4939_v53 = vld [vmem:[#allocation5 + $0xa8] ss:$16 sps:$4 sm:$0xff]   ;;  %v4944_v54 = vld [vmem:[#allocation5 + $0x84] ss:$16 sps:$4 sm:$0xff]  }
  0x87   :  { %v4947_v55 = vld [vmem:[#allocation5 + $0x8c] ss:$16 sps:$4 sm:$0xff]  }
  0x88   :  { %vm188_vm0 = vcmp.eq.s32.totalorder %v5284_v2, %v5696_v56  ;;  %vm192_vm1 = vcmp.eq.s32.totalorder %v5287_v3, %v5696_v56  ;;  %vm124_vm2 = vcmp.eq.s32.totalorder %v5281_v1, %v5696_v56  ;;  %vm128_vm3 = vcmp.eq.s32.totalorder %v5291_v5, %v5696_v56  ;;  %v4924_v1 = vld [vmem:[#allocation5 + $0xe0] ss:$16 sps:$4 sm:$0xff]   ;;  %v4927_v5 = vld [vmem:[#allocation5 + $0xe8] ss:$16 sps:$4 sm:$0xff]  }
  0x89   :  { %795 = vxpose.xlu0.c.b16.cont [3/8] %v547_v63, 128  ;;  %731 = vxpose.xlu1.c.b16.cont [3/8] %v515_v0, 128  ;;  %v4624_v63 = vsel %vm247_vm13, 1.0, %v5231_v30  ;;  %v4556_v0 = vsel %vm179_vm14, 1.0, %v5231_v30  ;;  %v4565_v14 = vsel %vm188_vm0, 1.0, %v5231_v30  ;;  %v4569_v28 = vsel %vm192_vm1, 1.0, %v5231_v30 }
  0x8a   :  { %v567_v59 = vpack.c.bf16 %v4624_v63, %v4620_v62  ;;  %v535_v27 = vpack.c.bf16 %v4560_v4, %v4556_v0  ;;  %v4505_v2 = vsel %vm128_vm3, 1.0, %v5231_v30  ;;  %v540_v3 = vpack.c.bf16 %v4569_v28, %v4565_v14  ;;  %v4945_v62 = vld [vmem:[#allocation5 + $0x88] ss:$16 sps:$4 sm:$0xff]   ;;  %v4950_v63 = vld [vmem:[#allocation5 + $0x64] ss:$16 sps:$4 sm:$0xff]  }
  0x8b   :  { %vm196_vm4 = vcmp.eq.s32.totalorder %v5294_v6, %v5696_v56  ;;  %vm200_vm5 = vcmp.eq.s32.totalorder %v5297_v7, %v5696_v56  ;;  %vm132_vm6 = vcmp.eq.s32.totalorder %v5300_v8, %v5696_v56  ;;  %vm136_vm7 = vcmp.eq.s32.totalorder %v5303_v9, %v5696_v56  ;;  %v4935_v8 = vld [vmem:[#allocation5 + $0xcc] ss:$16 sps:$4 sm:$0xff]   ;;  %v4951_v14 = vld [vmem:[#allocation5 + $0x68] ss:$16 sps:$4 sm:$0xff]   ;;  %v4956_v28 = vld [vmem:[#allocation5 + $0x44] ss:$16 sps:$4 sm:$0xff]  }
  0x8c   :  { %v4573_v33 = vsel %vm196_vm4, 1.0, %v5231_v30  ;;  %v4577_v34 = vsel %vm200_vm5, 1.0, %v5231_v30  ;;  %v4509_v6 = vsel %vm132_vm6, 1.0, %v5231_v30  ;;  %v4513_v35 = vsel %vm136_vm7, 1.0, %v5231_v30  ;;  %v4953_v0 = vld [vmem:[#allocation5 + $0x6c] ss:$16 sps:$4 sm:$0xff]  }
  0x8d   :  { %796 = vxpose.xlu0.c.b16.cont [4/8] %v551_v29, 128  ;;  %732 = vxpose.xlu1.c.b16.cont [4/8] %v519_v32, 128  ;;  %v4501_v29 = vsel %vm124_vm2, 1.0, %v5231_v30  ;;  %v544_v9 = vpack.c.bf16 %v4577_v34, %v4573_v33  ;;  %vm204_vm8 = vcmp.eq.s32.totalorder %v5306_v10, %v5696_v56  ;;  %vm208_vm9 = vcmp.eq.s32.totalorder %v5309_v11, %v5696_v56 }
  0x8e   :  { %v508_v32 = vpack.c.bf16 %v4505_v2, %v4501_v29  ;;  %vm140_vm10 = vcmp.eq.s32.totalorder %v5312_v12, %v5696_v56  ;;  %vm144_vm11 = vcmp.eq.s32.totalorder %v5315_v13, %v5696_v56  ;;  %v4581_v11 = vsel %vm204_vm8, 1.0, %v5231_v30  ;;  %v4959_v29 = vld [vmem:[#allocation5 + $0x4c] ss:$16 sps:$4 sm:$0xff]  }
  0x8f   :  { %v4585_v12 = vsel %vm208_vm9, 1.0, %v5231_v30  ;;  %v4521_v13 = vsel %vm144_vm11, 1.0, %v5231_v30  ;;  %vm212_vm12 = vcmp.eq.s32.totalorder %v5320_v15, %v5696_v56  ;;  %vm216_vm13 = vcmp.eq.s32.totalorder %v5323_v16, %v5696_v56 }
  0x90   :  { %v548_v10 = vpack.c.bf16 %v4585_v12, %v4581_v11  ;;  %vm148_vm14 = vcmp.eq.s32.totalorder %v5326_v17, %v5696_v56  ;;  %vm152_vm15 = vcmp.eq.s32.totalorder %v5329_v18, %v5696_v56  ;;  %v4589_v15 = vsel %vm212_vm12, 1.0, %v5231_v30  ;;  %v4948_v18 = vld [vmem:[#allocation5 + $0x60] ss:$16 sps:$4 sm:$0xff]  }
  0x91   :  { %797 = vxpose.xlu0.c.b16.cont [5/8] %v555_v37, 128  ;;  %733 = vxpose.xlu1.c.b16.cont [5/8] %v523_v38, 128  ;;  %v512_v38 = vpack.c.bf16 %v4513_v35, %v4509_v6  ;;  %v4593_v16 = vsel %vm216_vm13, 1.0, %v5231_v30  ;;  %vm220_vm0 = vcmp.eq.s32.totalorder %v5335_v20, %v5696_v56  ;;  %vm224_vm1 = vcmp.eq.s32.totalorder %v5338_v21, %v5696_v56  ;;  %v4962_v20 = vld [vmem:[#allocation5 + $0x24] ss:$16 sps:$4 sm:$0xff]   ;;  %v4960_v6 = vld [vmem:[#allocation5 + $0x20] ss:$16 sps:$4 sm:$0xff]  }
  0x92   :  { %v552_v2 = vpack.c.bf16 %v4593_v16, %v4589_v15  ;;  %vm156_vm2 = vcmp.eq.s32.totalorder %v5341_v22, %v5696_v56  ;;  %vm160_vm3 = vcmp.eq.s32.totalorder %v5344_v23, %v5696_v56  ;;  %v4597_v21 = vsel %vm220_vm0, 1.0, %v5231_v30  ;;  %v4963_v35 = vld [vmem:[#allocation5 + $0x28] ss:$16 sps:$4 sm:$0xff]   ;;  %v4986_v16 = vld [vmem:[#allocation5 + $0x1a4] ss:$16 sps:$4 sm:$0xff]  }
  0x93   :  { %v4533_v33 = vsel %vm156_vm2, 1.0, %v5231_v30  ;;  %v4537_v22 = vsel %vm160_vm3, 1.0, %v5231_v30  ;;  %vm228_vm4 = vcmp.eq.s32.totalorder %v5347_v24, %v5696_v56  ;;  %vm232_vm5 = vcmp.eq.s32.totalorder %v5350_v25, %v5696_v56  ;;  %v4981_v15 = vld [vmem:[#allocation5 + $0x1c8] ss:$16 sps:$4 sm:$0xff]  }
  0x94   :  { %vm164_vm6 = vcmp.eq.s32.totalorder %v5353_v26, %v5696_v56  ;;  %vm168_vm7 = vcmp.eq.s32.totalorder %v5420_v36, %v5696_v56  ;;  %v4605_v25 = vsel %vm228_vm4, 1.0, %v5231_v30  ;;  %vm236_vm8 = vcmp.eq.s32.totalorder %v5429_v41, %v5696_v56  ;;  %v4966_v26 = vld [vmem:[#allocation5] ss:$16 sps:$4 sm:$0xff]   ;;  %v4969_v36 = vld [vmem:[#allocation5 + $0x8] ss:$16 sps:$4 sm:$0xff]  }
  0x95   :  { %798 = vxpose.xlu0.c.b16.cont [6/8] %v559_v47, 128  ;;  %734 = vxpose.xlu1.c.b16.cont [6/8] %v527_v49, 128  ;;  %v4517_v49 = vsel %vm140_vm10, 1.0, %v5231_v30  ;;  %vm240_vm9 = vcmp.eq.s32.totalorder %v5432_v42, %v5696_v56  ;;  %vm172_vm10 = vcmp.eq.s32.totalorder %v5438_v45, %v5696_v56  ;;  %vm176_vm11 = vcmp.eq.s32.totalorder %v5441_v46, %v5696_v56 }
  0x96   :  { %v4613_v42 = vsel %vm236_vm8, 1.0, %v5231_v30  ;;  %v4617_v11 = vsel %vm240_vm9, 1.0, %v5231_v30  ;;  %v4549_v12 = vsel %vm172_vm10, 1.0, %v5231_v30  ;;  %v4553_v45 = vsel %vm176_vm11, 1.0, %v5231_v30 }
  0x97   :  { %vm244_vm12 = vcmp.eq.s32.totalorder %v5452_v48, %v5696_v56  ;;  %vm248_vm13 = vcmp.eq.s32.totalorder %v5458_v51, %v5696_v56  ;;  %v564_v48 = vpack.c.bf16 %v4617_v11, %v4613_v42  ;;  %v5008_v42 = vld [vmem:[#allocation5 + $0x120] ss:$16 sps:$4 sm:$0xff]   ;;  %v5011_v11 = vld [vmem:[#allocation5 + $0x128] ss:$16 sps:$4 sm:$0xff]  }
  0x98   :  { %v4621_v51 = vsel %vm244_vm12, 1.0, %v5231_v30 }
  0x99   :  { %799 = vxpose.xlu0.c.b16.cont [7/8] %v563_v58, 128  ;;  %735 = vxpose.xlu1.c.b16.cont [7/8] %v531_v60, 128  ;;  %v516_v58 = vpack.c.bf16 %v4521_v13, %v4517_v49  ;;  %v4942_v60 = vld [vmem:[#allocation5 + $0x80] ss:$16 sps:$4 sm:$0xff]   ;;  %v4974_v13 = vld [vmem:[#allocation5 + $0x1e4] ss:$16 sps:$4 sm:$0xff]  }
  0x9d   :  { %800 = vxpose.xlu0.c.b16.end [8/8] %v567_v59, 128  ;;  %736 = vxpose.xlu1.c.b16.end [8/8] %v535_v27, 128  ;;  %v4525_v59 = vsel %vm148_vm14, 1.0, %v5231_v30  ;;  %v4529_v27 = vsel %vm152_vm15, 1.0, %v5231_v30  ;;  %vm180_vm14 = vcmp.eq.s32.totalorder %v5465_v57, %v5696_v56  ;;  %vm184_vm15 = vcmp.eq.s32.totalorder %v5474_v61, %v5696_v56  ;;  %v4972_v56 = vld [vmem:[#allocation5 + $0x1e0] ss:$16 sps:$4 sm:$0xff]  }
  0x9e   :  { %v4557_v57 = vsel %vm180_vm14, 1.0, %v5231_v30  ;;  %v4561_v61 = vsel %vm184_vm15, 1.0, %v5231_v30 }
  0xa1   :  { %809 = vxpose.xlu0.c.b16.start [1/8] %v540_v3, 128  ;;  %745 = vxpose.xlu1.c.b16.start [1/8] %v508_v32, 128  ;;  %v520_v3 = vpack.c.bf16 %v4529_v27, %v4525_v59  ;;  %v4954_v32 = vld [vmem:[#allocation5 + $0x40] ss:$16 sps:$4 sm:$0xff]   ;;  %v4989_v59 = vld [vmem:[#allocation5 + $0x1ac] ss:$16 sps:$4 sm:$0xff]  }
  0xa2   :  { %v4984_v27 = vld [vmem:[#allocation5 + $0x1a0] ss:$16 sps:$4 sm:$0xff]  }
  0xa3   :  { %v5732_v7 = vpop.trf.xlu0  ;;  %v5734_v37 = vpop.trf.xlu1 }
  0xa4   :  { %7913 = vst [vmem:[#allocation15_spill] sm:$0xff] %v5732_v7  ;;  %7914 = vst [vmem:[#allocation16_spill] sm:$0xff] %v5734_v37  ;;  %1177 = vmatprep.mubr.bf16.mxu0 %v5732_v7  ;;  %1530 = vmatprep.mubr.bf16.mxu1 %v5732_v7 }
  0xa5   :  { %1178 = vmatmul.mubr.bf16.vlgmr.msra.gmra.mxu0 %v5734_v37  ;;  %1531 = vmatmul.mubr.bf16.vlgmr.msra.gmra.mxu1 %v5734_v37 }
  0xa6   :  { %2172 = vmatpush1.bf16.msra.mxu0 %v4924_v1  ;;  %2525 = vmatpush1.bf16.msra.mxu1 %v4927_v5  ;;  %v4957_v1 = vld [vmem:[#allocation5 + $0x48] ss:$16 sps:$4 sm:$0xff]   ;;  %v4965_v5 = vld [vmem:[#allocation5 + $0x2c] ss:$16 sps:$4 sm:$0xff]  }
  0xa7   :  { %v5742_v19 = vpop.trf.xlu0  ;;  %2173 = vmatprep.subr.bf16.mxu0 %v4932_v31  ;;  %2526 = vmatprep.subr.bf16.mxu1 %v4935_v8  ;;  %v5752_v47 = vpop.trf.xlu1  ;;  %v4601_v31 = vsel %vm224_vm1, 1.0, %v5231_v30  ;;  %v524_v8 = vpack.c.bf16 %v4537_v22, %v4533_v33  ;;  %v5001_v33 = vld [vmem:[#allocation5 + $0x16c] ss:$16 sps:$4 sm:$0xff]  }
  0xa8   :  { %7915 = vst [vmem:[#allocation17_spill] sm:$0xff] %v5742_v19  ;;  %1187 = vmatprep.mubr.bf16.mxu0 %v5742_v19  ;;  %1540 = vmatprep.mubr.bf16.mxu1 %v5742_v19  ;;  %v556_v24 = vpack.c.bf16 %v4601_v31, %v4597_v21  ;;  %v4998_v21 = vld [vmem:[#allocation5 + $0x164] ss:$16 sps:$4 sm:$0xff]   ;;  %v4999_v31 = vld [vmem:[#allocation5 + $0x168] ss:$16 sps:$4 sm:$0xff]  }
  0xa9   :  { %810 = vxpose.xlu0.c.b16.cont [2/8] %v544_v9, 128  ;;  %746 = vxpose.xlu1.c.b16.cont [2/8] %v512_v38, 128  ;;  %v4609_v9 = vsel %vm232_vm5, 1.0, %v5231_v30  ;;  %v4968_v38 = vld [vmem:[#allocation5 + $0x4] ss:$16 sps:$4 sm:$0xff]  }
  0xaa   :  { %2174 = vmatpush1.bf16.msra.mxu0 %v4930_v39  ;;  %2527 = vmatpush1.bf16.msra.mxu1 %v4933_v40  ;;  %v4971_v39 = vld [vmem:[#allocation5 + $0xc] ss:$16 sps:$4 sm:$0xff]   ;;  %v4541_v40 = vsel %vm164_vm6, 1.0, %v5231_v30  ;;  %v560_v41 = vpack.c.bf16 %v4609_v9, %v4605_v25  ;;  %v5004_v9 = vld [vmem:[#allocation5 + $0x144] ss:$16 sps:$4 sm:$0xff]  }
  0xab   :  { %v5761_v50 = vpop.trf.xlu0  ;;  %2175 = vmatprep.subr.bf16.mxu0 %v4938_v43  ;;  %2528 = vmatprep.subr.bf16.mxu1 %v4941_v44  ;;  %v5777_v4 = vpop.trf.xlu1  ;;  %v4545_v43 = vsel %vm168_vm7, 1.0, %v5231_v30 }
  0xac   :  { %v528_v44 = vpack.c.bf16 %v4545_v43, %v4541_v40  ;;  %v5007_v40 = vld [vmem:[#allocation5 + $0x14c] ss:$16 sps:$4 sm:$0xff]  }
  0xad   :  { %1188 = vmatmul.mubr.bf16.gmra.mxu0 %v5752_v47  ;;  %1541 = vmatmul.mubr.bf16.gmra.mxu1 %v5752_v47 }
  0xae   :  { %1197 = vmatprep.mubr.bf16.mxu0 %v5761_v50  ;;  %1550 = vmatprep.mubr.bf16.mxu1 %v5761_v50 }
  0xaf   :  { %2176 = vmatpush1.bf16.msra.mxu0 %v4936_v52  ;;  %2529 = vmatpush1.bf16.msra.mxu1 %v4939_v53  ;;  %v5781_v17 = vpop.trf.xlu0  ;;  %v5803_v23 = vpop.trf.xlu1  ;;  %v4977_v52 = vld [vmem:[#allocation5 + $0x1ec] ss:$16 sps:$4 sm:$0xff]   ;;  %v532_v53 = vpack.c.bf16 %v4553_v45, %v4549_v12 }
  0xb0   :  { %2177 = vmatprep.subr.bf16.mxu0 %v4944_v54  ;;  %2530 = vmatprep.subr.bf16.mxu1 %v4947_v55  ;;  %v4625_v54 = vsel %vm248_vm13, 1.0, %v5231_v30  ;;  %v4975_v55 = vld [vmem:[#allocation5 + $0x1e8] ss:$16 sps:$4 sm:$0xff]   ;;  %v5013_v12 = vld [vmem:[#allocation5 + $0x12c] ss:$16 sps:$4 sm:$0xff]  }
  0xb1   :  { %811 = vxpose.xlu0.c.b16.cont [3/8] %v548_v10, 128  ;;  %747 = vxpose.xlu1.c.b16.cont [3/8] %v516_v58, 128  ;;  %v4980_v10 = vld [vmem:[#allocation5 + $0x1c4] ss:$16 sps:$4 sm:$0xff]   ;;  %v4983_v58 = vld [vmem:[#allocation5 + $0x1cc] ss:$16 sps:$4 sm:$0xff]  }
  0xb3   :  { %2178 = vmatpush1.bf16.msra.mxu0 %v4942_v60  ;;  %2531 = vmatpush1.bf16.msra.mxu1 %v4945_v62  ;;  %v5809_v34 = vpop.trf.xlu0  ;;  %v5841_v46 = vpop.trf.xlu1  ;;  %v568_v60 = vpack.c.bf16 %v4625_v54, %v4621_v51  ;;  %v536_v62 = vpack.c.bf16 %v4561_v61, %v4557_v57  ;;  %v5014_v51 = vld [vmem:[#allocation5 + $0x100] ss:$16 sps:$4 sm:$0xff]   ;;  %v5017_v54 = vld [vmem:[#allocation5 + $0x108] ss:$16 sps:$4 sm:$0xff]   ;;  %v5019_v57 = vld [vmem:[#allocation5 + $0x10c] ss:$16 sps:$4 sm:$0xff]  }
  0xb4   :  { %2179 = vmatprep.subr.bf16.mxu0 %v4950_v63  ;;  %2532 = vmatprep.subr.bf16.mxu1 %v4953_v0  ;;  %v4978_v0 = vld [vmem:[#allocation5 + $0x1c0] ss:$16 sps:$4 sm:$0xff]  }
  0xb5   :  { %1198 = vmatmul.mubr.bf16.gmra.mxu0 %v5777_v4  ;;  %1551 = vmatmul.mubr.bf16.gmra.mxu1 %v5777_v4 }
  0xb6   :  { %1207 = vmatprep.mubr.bf16.mxu0 %v5781_v17  ;;  %1560 = vmatprep.mubr.bf16.mxu1 %v5781_v17 }
  0xb7   :  { %2180 = vmatpush1.bf16.msra.mxu0 %v4948_v18  ;;  %2533 = vmatpush1.bf16.msra.mxu1 %v4951_v14  ;;  %v5847_v49 = vpop.trf.xlu0  ;;  %v5857_v63 = vpop.trf.xlu1  ;;  %v4987_v18 = vld [vmem:[#allocation5 + $0x1a8] ss:$16 sps:$4 sm:$0xff]   ;;  %v4992_v14 = vld [vmem:[#allocation5 + $0x184] ss:$16 sps:$4 sm:$0xff]  }
  0xb8   :  { %2181 = vmatprep.subr.bf16.mxu0 %v4956_v28  ;;  %2534 = vmatprep.subr.bf16.mxu1 %v4959_v29  ;;  %v4995_v28 = vld [vmem:[#allocation5 + $0x18c] ss:$16 sps:$4 sm:$0xff]  }
  0xb9   :  { %812 = vxpose.xlu0.c.b16.cont [4/8] %v552_v2, 128  ;;  %748 = vxpose.xlu1.c.b16.cont [4/8] %v520_v3, 128  ;;  %v4990_v3 = vld [vmem:[#allocation5 + $0x180] ss:$16 sps:$4 sm:$0xff]  }
  0xbb   :  { %2182 = vmatpush1.bf16.msra.mxu0 %v4954_v32  ;;  %2535 = vmatpush1.bf16.msra.mxu1 %v4957_v1  ;;  %v5859_v30 = vpop.trf.xlu0  ;;  %v5865_v29 = vpop.trf.xlu1  ;;  %v4993_v32 = vld [vmem:[#allocation5 + $0x188] ss:$16 sps:$4 sm:$0xff]  }
  0xbc   :  { %2183 = vmatprep.subr.bf16.mxu0 %v4962_v20  ;;  %2536 = vmatprep.subr.bf16.mxu1 %v4965_v5  ;;  %v4996_v5 = vld [vmem:[#allocation5 + $0x160] ss:$16 sps:$4 sm:$0xff]  }
  0xbd   :  { %1208 = vmatmul.mubr.bf16.gmra.mxu0 %v5803_v23  ;;  %1561 = vmatmul.mubr.bf16.gmra.mxu1 %v5803_v23 }
  0xbe   :  { %1217 = vmatprep.mubr.bf16.mxu0 %v5809_v34  ;;  %1570 = vmatprep.mubr.bf16.mxu1 %v5809_v34 }
  0xbf   :  { %2184 = vmatpush1.bf16.msra.mxu0 %v4960_v6  ;;  %2537 = vmatpush1.bf16.msra.mxu1 %v4963_v35  ;;  %v5867_v2 = vpop.trf.xlu0  ;;  %v5873_v1 = vpop.trf.xlu1 }
  0xc0   :  { %813 = vxpose.xlu0.c.b16.cont [5/8] %v556_v24, 128  ;;  %749 = vxpose.xlu1.c.b16.cont [5/8] %v524_v8, 128 }
  0xc1   :  { %2185 = vmatprep.subr.bf16.mxu0 %v4968_v38  ;;  %2538 = vmatprep.subr.bf16.mxu1 %v4971_v39  ;;  %v5002_v38 = vld [vmem:[#allocation5 + $0x140] ss:$16 sps:$4 sm:$0xff]   ;;  %v5005_v39 = vld [vmem:[#allocation5 + $0x148] ss:$16 sps:$4 sm:$0xff]  }
  0xc3   :  { %2186 = vmatpush1.bf16.msra.mxu0 %v4966_v26  ;;  %2539 = vmatpush1.bf16.msra.mxu1 %v4969_v36  ;;  %v5875_v20 = vpop.trf.xlu0  ;;  %v5881_v22 = vpop.trf.xlu1 }
  0xc4   :  { %814 = vxpose.xlu0.c.b16.cont [6/8] %v560_v41, 128  ;;  %750 = vxpose.xlu1.c.b16.cont [6/8] %v528_v44, 128  ;;  %v5010_v44 = vld [vmem:[#allocation5 + $0x124] ss:$16 sps:$4 sm:$0xff]  }
  0xc5   :  { %1218 = vmatmul.mubr.bf16.gmra.mxu0 %v5841_v46  ;;  %1571 = vmatmul.mubr.bf16.gmra.mxu1 %v5841_v46 }
  0xc6   :  { %1227 = vmatprep.mubr.bf16.mxu0 %v5847_v49  ;;  %1580 = vmatprep.mubr.bf16.mxu1 %v5847_v49 }
  0xc7   :  { %2187 = vmatprep.subr.bf16.mxu0 %v4974_v13  ;;  %2540 = vmatprep.subr.bf16.mxu1 %v4977_v52  ;;  %v5883_v6 = vpop.trf.xlu0  ;;  %v5889_v35 = vpop.trf.xlu1 }
  0xc8   :  { %815 = vxpose.xlu0.c.b16.cont [7/8] %v564_v48, 128  ;;  %751 = vxpose.xlu1.c.b16.cont [7/8] %v532_v53, 128  ;;  %v5016_v53 = vld [vmem:[#allocation5 + $0x104] ss:$16 sps:$4 sm:$0xff]  }
  0xc9   :  { %2188 = vmatpush2.bf16.msra.mxu0 %v4972_v56  ;;  %2541 = vmatpush2.bf16.msra.mxu1 %v4975_v55 }
  0xca   :  { %2189 = vmatprep.subr.bf16.mxu0 %v4980_v10  ;;  %2542 = vmatprep.subr.bf16.mxu1 %v4983_v58  ;;  %v5022_v58 = vld [vmem:[#allocation8 + $0xe4] ss:$16 sps:$4 sm:$0xff]  }
  0xcb   :  { %v5891_v24 = vpop.trf.xlu0  ;;  %v5897_v8 = vpop.trf.xlu1 }
  0xcc   :  { %816 = vxpose.xlu0.c.b16.end [8/8] %v568_v60, 128  ;;  %752 = vxpose.xlu1.c.b16.end [8/8] %v536_v62, 128  ;;  %v5025_v60 = vld [vmem:[#allocation8 + $0xec] ss:$16 sps:$4 sm:$0xff]  }
  0xcd   :  { %1228 = vmatmul.mubr.bf16.gmra.mxu0 %v5857_v63  ;;  %1581 = vmatmul.mubr.bf16.gmra.mxu1 %v5857_v63 }
  0xce   :  { %1237 = vmatprep.mubr.bf16.mxu0 %v5859_v30  ;;  %1590 = vmatprep.mubr.bf16.mxu1 %v5859_v30 }
  0xcf   :  { %2190 = vmatpush2.bf16.msra.mxu0 %v4978_v0  ;;  %2543 = vmatpush2.bf16.msra.mxu1 %v4981_v15  ;;  %v5899_v25 = vpop.trf.xlu0  ;;  %v5905_v43 = vpop.trf.xlu1 }
  0xd0   :  { %2191 = vmatprep.subr.bf16.mxu0 %v4986_v16  ;;  %2544 = vmatprep.subr.bf16.mxu1 %v4989_v59 }
  0xd3   :  { %2192 = vmatpush2.bf16.msra.mxu0 %v4984_v27  ;;  %2545 = vmatpush2.bf16.msra.mxu1 %v4987_v18  ;;  %v5907_v26 = vpop.trf.xlu0  ;;  %v5913_v36 = vpop.trf.xlu1 }
  0xd4   :  { %2193 = vmatprep.subr.bf16.mxu0 %v4992_v14  ;;  %2546 = vmatprep.subr.bf16.mxu1 %v4995_v28 }
  0xd5   :  { %1238 = vmatmul.mubr.bf16.gmra.mxu0 %v5865_v29  ;;  %1591 = vmatmul.mubr.bf16.gmra.mxu1 %v5865_v29 }
  0xd6   :  { %1247 = vmatprep.mubr.bf16.mxu0 %v5867_v2  ;;  %1600 = vmatprep.mubr.bf16.mxu1 %v5867_v2 }
  0xd7   :  { %2194 = vmatpush2.bf16.msra.mxu0 %v4990_v3  ;;  %2547 = vmatpush2.bf16.msra.mxu1 %v4993_v32  ;;  %v5915_v41 = vpop.trf.xlu0  ;;  %v5921_v45 = vpop.trf.xlu1 }
  0xd8   :  { %2195 = vmatprep.subr.bf16.mxu0 %v4998_v21  ;;  %2548 = vmatprep.subr.bf16.mxu1 %v5001_v33 }
  0xdb   :  { %2196 = vmatpush2.bf16.msra.mxu0 %v4996_v5  ;;  %2549 = vmatpush2.bf16.msra.mxu1 %v4999_v31  ;;  %v5923_v13 = vpop.trf.xlu0  ;;  %v5929_v52 = vpop.trf.xlu1 }
  0xdc   :  { %2197 = vmatprep.subr.bf16.mxu0 %v5004_v9  ;;  %2550 = vmatprep.subr.bf16.mxu1 %v5007_v40 }
  0xdd   :  { %1248 = vmatmul.mubr.bf16.gmra.mxu0 %v5873_v1  ;;  %1601 = vmatmul.mubr.bf16.gmra.mxu1 %v5873_v1 }
  0xde   :  { %1257 = vmatprep.mubr.bf16.mxu0 %v5875_v20  ;;  %1610 = vmatprep.mubr.bf16.mxu1 %v5875_v20 }
  0xdf   :  { %2198 = vmatpush2.bf16.msra.mxu0 %v5002_v38  ;;  %2551 = vmatpush2.bf16.msra.mxu1 %v5005_v39  ;;  %v5931_v48 = vpop.trf.xlu0  ;;  %v5937_v61 = vpop.trf.xlu1 }
  0xe0   :  { %2199 = vmatprep.subr.bf16.mxu0 %v5010_v44  ;;  %2552 = vmatprep.subr.bf16.mxu1 %v5013_v12 }
  0xe3   :  { %2200 = vmatpush2.bf16.msra.mxu0 %v5008_v42  ;;  %2553 = vmatpush2.bf16.msra.mxu1 %v5011_v11  ;;  %v5939_v56 = vpop.trf.xlu0  ;;  %v5945_v55 = vpop.trf.xlu1 }
  0xe4   :  { %2201 = vmatprep.subr.bf16.mxu0 %v5016_v53  ;;  %2554 = vmatprep.subr.bf16.mxu1 %v5019_v57 }
  0xe5   :  { %1258 = vmatmul.mubr.bf16.gmra.mxu0 %v5881_v22  ;;  %1611 = vmatmul.mubr.bf16.gmra.mxu1 %v5881_v22 }
  0xe6   :  { %1267 = vmatprep.mubr.bf16.mxu0 %v5883_v6  ;;  %1620 = vmatprep.mubr.bf16.mxu1 %v5883_v6 }
  0xe7   :  { %2202 = vmatpush2.bf16.msra.mxu0 %v5014_v51  ;;  %2555 = vmatpush2.bf16.msra.mxu1 %v5017_v54  ;;  %v5947_v10 = vpop.trf.xlu0  ;;  %v5953_v62 = vpop.trf.xlu1 }
  0xe8   :  { %3261 = vmatprep.subr.bf16.mxu0 %v5022_v58  ;;  %3614 = vmatprep.subr.bf16.mxu1 %v5025_v60 }
  0xeb   :  { %v5955_v0 = vpop.trf.xlu0  ;;  %v5961_v15 = vpop.trf.xlu1 }
  0xed   :  { %1268 = vmatmul.mubr.bf16.gmra.mxu0 %v5889_v35  ;;  %1621 = vmatmul.mubr.bf16.gmra.mxu1 %v5889_v35 }
  0xee   :  { %1277 = vmatprep.mubr.bf16.mxu0 %v5891_v24  ;;  %1630 = vmatprep.mubr.bf16.mxu1 %v5891_v24 }
  0xef   :  { %v5963_v16 = vpop.trf.xlu0  ;;  %v5969_v59 = vpop.trf.xlu1 }
  0xf3   :  { %v5971_v27 = vpop.trf.xlu0  ;;  %v5977_v18 = vpop.trf.xlu1 }
  0xf5   :  { %1278 = vmatmul.mubr.bf16.gmra.mxu0 %v5897_v8  ;;  %1631 = vmatmul.mubr.bf16.gmra.mxu1 %v5897_v8 }
  0xf6   :  { %1287 = vmatprep.mubr.bf16.mxu0 %v5899_v25  ;;  %1640 = vmatprep.mubr.bf16.mxu1 %v5899_v25 }
  0xf7   :  { %v5979_v14 = vpop.trf.xlu0  ;;  %v5985_v28 = vpop.trf.xlu1 }
  0xfb   :  { %v5987_v3 = vpop.trf.xlu0  ;;  %v5993_v32 = vpop.trf.xlu1 }
  0xfd   :  { %1288 = vmatmul.mubr.bf16.gmra.mxu0 %v5905_v43  ;;  %1641 = vmatmul.mubr.bf16.gmra.mxu1 %v5905_v43 }
  0xfe   :  { %1297 = vmatprep.mubr.bf16.mxu0 %v5907_v26  ;;  %1650 = vmatprep.mubr.bf16.mxu1 %v5907_v26 }
  0xff   :  { %v5995_v5 = vpop.trf.xlu0  ;;  %v6001_v21 = vpop.trf.xlu1 }
 0x105   :  { %1298 = vmatmul.mubr.bf16.gmra.mxu0 %v5913_v36  ;;  %1651 = vmatmul.mubr.bf16.gmra.mxu1 %v5913_v36 }
 0x106   :  { %1307 = vmatprep.mubr.bf16.mxu0 %v5915_v41  ;;  %1660 = vmatprep.mubr.bf16.mxu1 %v5915_v41 }
 0x10d   :  { %1308 = vmatmul.mubr.bf16.gmra.mxu0 %v5921_v45  ;;  %1661 = vmatmul.mubr.bf16.gmra.mxu1 %v5921_v45 }
 0x10e   :  { %1317 = vmatprep.mubr.bf16.mxu0 %v5923_v13  ;;  %1670 = vmatprep.mubr.bf16.mxu1 %v5923_v13 }
 0x112   :  { %v6003_v31 = vpop.trf.xlu0  ;;  %v6009_v33 = vpop.trf.xlu1 }
 0x115   :  { %1318 = vmatmul.mubr.bf16.gmra.mxu0 %v5929_v52  ;;  %1671 = vmatmul.mubr.bf16.gmra.mxu1 %v5929_v52 }
 0x116   :  { %1327 = vmatprep.mubr.bf16.mxu0 %v5931_v48  ;;  %1680 = vmatprep.mubr.bf16.mxu1 %v5931_v48  ;;  %v6011_v9 = vpop.trf.xlu0  ;;  %v6029_v12 = vpop.trf.xlu1 }
 0x117   :  { %7922 = vst [vmem:[#allocation24_spill] sm:$0xff] %v6029_v12 }
 0x11a   :  { %v6031_v53 = vpop.trf.xlu0 }
 0x11b   :  { %7923 = vst [vmem:[#allocation25_spill] sm:$0xff] %v6031_v53 }
 0x11d   :  { %1328 = vmatmul.mubr.bf16.gmra.mxu0 %v5937_v61  ;;  %1681 = vmatmul.mubr.bf16.gmra.mxu1 %v5937_v61 }
 0x11e   :  { %1337 = vmatprep.mubr.bf16.mxu0 %v5939_v56  ;;  %1690 = vmatprep.mubr.bf16.mxu1 %v5939_v56 }
 0x125   :  { %1338 = vmatmul.mubr.bf16.gmra.mxu0 %v5945_v55  ;;  %1691 = vmatmul.mubr.bf16.gmra.mxu1 %v5945_v55 }
 0x126   :  { %1347 = vmatprep.mubr.bf16.mxu0 %v5947_v10  ;;  %1700 = vmatprep.mubr.bf16.mxu1 %v5947_v10 }
 0x12d   :  { %1348 = vmatmul.mubr.bf16.gmra.mxu0 %v5953_v62  ;;  %1701 = vmatmul.mubr.bf16.gmra.mxu1 %v5953_v62 }
 0x12e   :  { %1357 = vmatprep.mubr.bf16.mxu0 %v5955_v0  ;;  %1710 = vmatprep.mubr.bf16.mxu1 %v5955_v0 }
 0x135   :  { %1358 = vmatmul.mubr.bf16.gmra.mxu0 %v5961_v15  ;;  %1711 = vmatmul.mubr.bf16.gmra.mxu1 %v5961_v15 }
 0x136   :  { %1367 = vmatprep.mubr.bf16.mxu0 %v5963_v16  ;;  %1720 = vmatprep.mubr.bf16.mxu1 %v5963_v16 }
 0x13d   :  { %1368 = vmatmul.mubr.bf16.gmra.mxu0 %v5969_v59  ;;  %1721 = vmatmul.mubr.bf16.gmra.mxu1 %v5969_v59 }
 0x13e   :  { %1377 = vmatprep.mubr.bf16.mxu0 %v5971_v27  ;;  %1730 = vmatprep.mubr.bf16.mxu1 %v5971_v27 }
 0x145   :  { %1378 = vmatmul.mubr.bf16.gmra.mxu0 %v5977_v18  ;;  %1731 = vmatmul.mubr.bf16.gmra.mxu1 %v5977_v18 }
 0x146   :  { %1387 = vmatprep.mubr.bf16.mxu0 %v5979_v14  ;;  %1740 = vmatprep.mubr.bf16.mxu1 %v5979_v14 }
 0x14d   :  { %1388 = vmatmul.mubr.bf16.gmra.mxu0 %v5985_v28  ;;  %1741 = vmatmul.mubr.bf16.gmra.mxu1 %v5985_v28 }
 0x14e   :  { %1397 = vmatprep.mubr.bf16.mxu0 %v5987_v3  ;;  %1750 = vmatprep.mubr.bf16.mxu1 %v5987_v3 }
 0x155   :  { %1398 = vmatmul.mubr.bf16.gmra.mxu0 %v5993_v32  ;;  %1751 = vmatmul.mubr.bf16.gmra.mxu1 %v5993_v32 }
 0x156   :  { %1407 = vmatprep.mubr.bf16.mxu0 %v5995_v5  ;;  %1760 = vmatprep.mubr.bf16.mxu1 %v5995_v5 }
 0x15d   :  { %1408 = vmatmul.mubr.bf16.gmra.mxu0 %v6001_v21  ;;  %1761 = vmatmul.mubr.bf16.gmra.mxu1 %v6001_v21 }
 0x15e   :  { %1417 = vmatprep.mubr.bf16.mxu0 %v6003_v31  ;;  %1770 = vmatprep.mubr.bf16.mxu1 %v6003_v31 }
 0x165   :  { %v6013_v38 = vpop.f32.mrf.mxu0  ;;  %1418 = vmatmul.mubr.bf16.gmra.mxu0 %v6009_v33  ;;  %v6016_v39 = vpop.f32.mrf.mxu1  ;;  %1771 = vmatmul.mubr.bf16.gmra.mxu1 %v6009_v33 }
 0x166   :  { %7916 = vst [vmem:[#allocation18_spill] sm:$0xff] %v6013_v38  ;;  %7917 = vst [vmem:[#allocation19_spill] sm:$0xff] %v6016_v39  ;;  %1427 = vmatprep.mubr.bf16.mxu0 %v6011_v9  ;;  %1780 = vmatprep.mubr.bf16.mxu1 %v6011_v9 }
 0x167   :  { %v6021_v40 = vpop.f32.mrf.mxu0  ;;  %v6023_v44 = vpop.f32.mrf.mxu1 }
 0x168   :  { %7918 = vst [vmem:[#allocation20_spill] sm:$0xff] %v6021_v40  ;;  %7919 = vst [vmem:[#allocation21_spill] sm:$0xff] %v6023_v44 }
 0x169   :  { %v6025_v42 = vpop.f32.mrf.mxu0  ;;  %v6027_v11 = vpop.f32.mrf.mxu1 }
 0x16a   :  { %7920 = vst [vmem:[#allocation22_spill] sm:$0xff] %v6025_v42  ;;  %7921 = vst [vmem:[#allocation23_spill] sm:$0xff] %v6027_v11 }
 0x16b   :  { %v6033_v51 = vpop.f32.mrf.mxu0  ;;  %v6035_v54 = vpop.f32.mrf.mxu1 }
 0x16c   :  { %7924 = vst [vmem:[#allocation26_spill] sm:$0xff] %v6033_v51  ;;  %7925 = vst [vmem:[#allocation27_spill] sm:$0xff] %v6035_v54  ;;  %v6053_v54 = vpop.trf.xlu1 }
 0x16d   :  { %v6037_v57 = vpop.f32.mrf.mxu0  ;;  %1428 = vmatmul.mubr.bf16.gmra.mxu0 %v6029_v12  ;;  %v6040_v58 = vpop.f32.mrf.mxu1  ;;  %1781 = vmatmul.mubr.bf16.gmra.mxu1 %v6029_v12  ;;  %7932 = vst [vmem:[#allocation34_spill] sm:$0xff] %v6053_v54 }
 0x16e   :  { %7926 = vst [vmem:[#allocation28_spill] sm:$0xff] %v6037_v57  ;;  %7927 = vst [vmem:[#allocation29_spill] sm:$0xff] %v6040_v58  ;;  %1437 = vmatprep.mubr.bf16.mxu0 %v6031_v53  ;;  %1790 = vmatprep.mubr.bf16.mxu1 %v6031_v53  ;;  %v6055_v57 = vpop.trf.xlu0 }
 0x16f   :  { %v6045_v60 = vpop.f32.mrf.mxu0  ;;  %v6047_v11 = vpop.f32.mrf.mxu1  ;;  %7933 = vst [vmem:[#allocation35_spill] sm:$0xff] %v6055_v57 }
 0x170   :  { %7928 = vst [vmem:[#allocation30_spill] sm:$0xff] %v6045_v60  ;;  %7929 = vst [vmem:[#allocation31_spill] sm:$0xff] %v6047_v11 }
 0x171   :  { %v6049_v42 = vpop.f32.mrf.mxu0  ;;  %v6051_v51 = vpop.f32.mrf.mxu1 }
 0x172   :  { %7930 = vst [vmem:[#allocation32_spill] sm:$0xff] %v6049_v42  ;;  %7931 = vst [vmem:[#allocation33_spill] sm:$0xff] %v6051_v51 }
 0x173   :  { %v6057_v44 = vpop.f32.mrf.mxu0  ;;  %v6059_v58 = vpop.f32.mrf.mxu1 }
 0x174   :  { %7934 = vst [vmem:[#allocation36_spill] sm:$0xff] %v6057_v44  ;;  %7935 = vst [vmem:[#allocation37_spill] sm:$0xff] %v6059_v58  ;;  %v6077_v58 = vpop.trf.xlu1 }
 0x175   :  { %v6061_v40 = vpop.f32.mrf.mxu0  ;;  %1438 = vmatmul.mubr.bf16.gmra.mxu0 %v6053_v54  ;;  %v6064_v39 = vpop.f32.mrf.mxu1  ;;  %1791 = vmatmul.mubr.bf16.gmra.mxu1 %v6053_v54  ;;  %7942 = vst [vmem:[#allocation44_spill] sm:$0xff] %v6077_v58 }
 0x176   :  { %7936 = vst [vmem:[#allocation38_spill] sm:$0xff] %v6061_v40  ;;  %7937 = vst [vmem:[#allocation39_spill] sm:$0xff] %v6064_v39  ;;  %1447 = vmatprep.mubr.bf16.mxu0 %v6055_v57  ;;  %1800 = vmatprep.mubr.bf16.mxu1 %v6055_v57  ;;  %v6079_v40 = vpop.trf.xlu0 }
 0x177   :  { %v6069_v51 = vpop.f32.mrf.mxu0  ;;  %v6071_v42 = vpop.f32.mrf.mxu1  ;;  %7943 = vst [vmem:[#allocation45_spill] sm:$0xff] %v6079_v40 }
 0x178   :  { %7938 = vst [vmem:[#allocation40_spill] sm:$0xff] %v6069_v51  ;;  %7939 = vst [vmem:[#allocation41_spill] sm:$0xff] %v6071_v42 }
 0x179   :  { %v6073_v11 = vpop.f32.mrf.mxu0  ;;  %v6075_v44 = vpop.f32.mrf.mxu1 }
 0x17a   :  { %7940 = vst [vmem:[#allocation42_spill] sm:$0xff] %v6073_v11  ;;  %7941 = vst [vmem:[#allocation43_spill] sm:$0xff] %v6075_v44 }
 0x17b   :  { %v6081_v60 = vpop.f32.mrf.mxu0  ;;  %v6083_v39 = vpop.f32.mrf.mxu1 }
 0x17c   :  { %7944 = vst [vmem:[#allocation46_spill] sm:$0xff] %v6081_v60  ;;  %7945 = vst [vmem:[#allocation47_spill] sm:$0xff] %v6083_v39  ;;  %v6101_v39 = vpop.trf.xlu1 }
 0x17d   :  { %v6085_v38 = vpop.f32.mrf.mxu0  ;;  %1448 = vmatmul.mubr.bf16.gmra.mxu0 %v6077_v58  ;;  %v6088_v57 = vpop.f32.mrf.mxu1  ;;  %1801 = vmatmul.mubr.bf16.gmra.mxu1 %v6077_v58  ;;  %7952 = vst [vmem:[#allocation54_spill] sm:$0xff] %v6101_v39 }
 0x17e   :  { %7946 = vst [vmem:[#allocation48_spill] sm:$0xff] %v6085_v38  ;;  %7947 = vst [vmem:[#allocation49_spill] sm:$0xff] %v6088_v57  ;;  %1457 = vmatprep.mubr.bf16.mxu0 %v6079_v40  ;;  %1810 = vmatprep.mubr.bf16.mxu1 %v6079_v40  ;;  %v6103_v38 = vpop.trf.xlu0 }
 0x17f   :  { %v6093_v44 = vpop.f32.mrf.mxu0  ;;  %v6095_v11 = vpop.f32.mrf.mxu1  ;;  %7953 = vst [vmem:[#allocation55_spill] sm:$0xff] %v6103_v38 }
 0x180   :  { %7948 = vst [vmem:[#allocation50_spill] sm:$0xff] %v6093_v44  ;;  %7949 = vst [vmem:[#allocation51_spill] sm:$0xff] %v6095_v11 }
 0x181   :  { %v6097_v42 = vpop.f32.mrf.mxu0  ;;  %v6099_v60 = vpop.f32.mrf.mxu1 }
 0x182   :  { %7950 = vst [vmem:[#allocation52_spill] sm:$0xff] %v6097_v42  ;;  %7951 = vst [vmem:[#allocation53_spill] sm:$0xff] %v6099_v60 }
 0x183   :  { %v6105_v51 = vpop.f32.mrf.mxu0  ;;  %v6107_v57 = vpop.f32.mrf.mxu1 }
 0x184   :  { %7954 = vst [vmem:[#allocation56_spill] sm:$0xff] %v6105_v51  ;;  %7955 = vst [vmem:[#allocation57_spill] sm:$0xff] %v6107_v57  ;;  %v6125_v57 = vpop.trf.xlu1 }
 0x185   :  { %v6109_v58 = vpop.f32.mrf.mxu0  ;;  %1458 = vmatmul.mubr.bf16.gmra.mxu0 %v6101_v39  ;;  %v6112_v40 = vpop.f32.mrf.mxu1  ;;  %1811 = vmatmul.mubr.bf16.gmra.mxu1 %v6101_v39  ;;  %7962 = vst [vmem:[#allocation64_spill] sm:$0xff] %v6125_v57 }
 0x186   :  { %7956 = vst [vmem:[#allocation58_spill] sm:$0xff] %v6109_v58  ;;  %7957 = vst [vmem:[#allocation59_spill] sm:$0xff] %v6112_v40  ;;  %1467 = vmatprep.mubr.bf16.mxu0 %v6103_v38  ;;  %1820 = vmatprep.mubr.bf16.mxu1 %v6103_v38  ;;  %v6127_v58 = vpop.trf.xlu0 }
 0x187   :  { %v6117_v60 = vpop.f32.mrf.mxu0  ;;  %v6119_v42 = vpop.f32.mrf.mxu1  ;;  %7963 = vst [vmem:[#allocation65_spill] sm:$0xff] %v6127_v58 }
 0x188   :  { %7958 = vst [vmem:[#allocation60_spill] sm:$0xff] %v6117_v60  ;;  %7959 = vst [vmem:[#allocation61_spill] sm:$0xff] %v6119_v42 }
 0x189   :  { %v6121_v11 = vpop.f32.mrf.mxu0  ;;  %v6123_v51 = vpop.f32.mrf.mxu1 }
 0x18a   :  { %7960 = vst [vmem:[#allocation62_spill] sm:$0xff] %v6121_v11  ;;  %7961 = vst [vmem:[#allocation63_spill] sm:$0xff] %v6123_v51 }
 0x18b   :  { %v6129_v44 = vpop.f32.mrf.mxu0  ;;  %v6131_v40 = vpop.f32.mrf.mxu1 }
 0x18c   :  { %7964 = vst [vmem:[#allocation66_spill] sm:$0xff] %v6129_v44  ;;  %7965 = vst [vmem:[#allocation67_spill] sm:$0xff] %v6131_v40  ;;  %v6149_v40 = vpop.trf.xlu1 }
 0x18d   :  { %v6133_v39 = vpop.f32.mrf.mxu0  ;;  %1468 = vmatmul.mubr.bf16.gmra.mxu0 %v6125_v57  ;;  %v6136_v38 = vpop.f32.mrf.mxu1  ;;  %1821 = vmatmul.mubr.bf16.gmra.mxu1 %v6125_v57  ;;  %7972 = vst [vmem:[#allocation74_spill] sm:$0xff] %v6149_v40 }
 0x18e   :  { %7966 = vst [vmem:[#allocation68_spill] sm:$0xff] %v6133_v39  ;;  %7967 = vst [vmem:[#allocation69_spill] sm:$0xff] %v6136_v38  ;;  %1477 = vmatprep.mubr.bf16.mxu0 %v6127_v58  ;;  %1830 = vmatprep.mubr.bf16.mxu1 %v6127_v58  ;;  %v6151_v39 = vpop.trf.xlu0 }
 0x18f   :  { %v6141_v51 = vpop.f32.mrf.mxu0  ;;  %v6143_v11 = vpop.f32.mrf.mxu1  ;;  %7973 = vst [vmem:[#allocation75_spill] sm:$0xff] %v6151_v39 }
 0x190   :  { %7968 = vst [vmem:[#allocation70_spill] sm:$0xff] %v6141_v51  ;;  %7969 = vst [vmem:[#allocation71_spill] sm:$0xff] %v6143_v11 }
 0x191   :  { %v6145_v42 = vpop.f32.mrf.mxu0  ;;  %v6147_v44 = vpop.f32.mrf.mxu1 }
 0x192   :  { %7970 = vst [vmem:[#allocation72_spill] sm:$0xff] %v6145_v42  ;;  %7971 = vst [vmem:[#allocation73_spill] sm:$0xff] %v6147_v44 }
 0x193   :  { %v6153_v60 = vpop.f32.mrf.mxu0  ;;  %v6155_v38 = vpop.f32.mrf.mxu1 }
 0x194   :  { %7974 = vst [vmem:[#allocation76_spill] sm:$0xff] %v6153_v60  ;;  %7975 = vst [vmem:[#allocation77_spill] sm:$0xff] %v6155_v38  ;;  %v6173_v38 = vpop.trf.xlu1 }
 0x195   :  { %v6157_v57 = vpop.f32.mrf.mxu0  ;;  %1478 = vmatmul.mubr.bf16.gmra.mxu0 %v6149_v40  ;;  %v6160_v58 = vpop.f32.mrf.mxu1  ;;  %1831 = vmatmul.mubr.bf16.gmra.mxu1 %v6149_v40  ;;  %7982 = vst [vmem:[#allocation84_spill] sm:$0xff] %v6173_v38 }
 0x196   :  { %7976 = vst [vmem:[#allocation78_spill] sm:$0xff] %v6157_v57  ;;  %7977 = vst [vmem:[#allocation79_spill] sm:$0xff] %v6160_v58  ;;  %1487 = vmatprep.mubr.bf16.mxu0 %v6151_v39  ;;  %1840 = vmatprep.mubr.bf16.mxu1 %v6151_v39 }
 0x197   :  { %v6165_v44 = vpop.f32.mrf.mxu0  ;;  %v6167_v42 = vpop.f32.mrf.mxu1 }
 0x198   :  { %7978 = vst [vmem:[#allocation80_spill] sm:$0xff] %v6165_v44  ;;  %7979 = vst [vmem:[#allocation81_spill] sm:$0xff] %v6167_v42 }
 0x199   :  { %v6169_v11 = vpop.f32.mrf.mxu0  ;;  %v6171_v60 = vpop.f32.mrf.mxu1 }
 0x19a   :  { %7980 = vst [vmem:[#allocation82_spill] sm:$0xff] %v6169_v11  ;;  %7981 = vst [vmem:[#allocation83_spill] sm:$0xff] %v6171_v60 }
 0x19b   :  { %v6175_v57 = vpop.f32.mrf.mxu0  ;;  %v6177_v51 = vpop.f32.mrf.mxu1 }
 0x19c   :  { %7983 = vst [vmem:[#allocation85_spill] sm:$0xff] %v6175_v57  ;;  %7984 = vst [vmem:[#allocation86_spill] sm:$0xff] %v6177_v51  ;;  %v5020_v51 = vld [vmem:[#allocation8 + $0xe0] ss:$16 sps:$4 sm:$0xff]  }
 0x19d   :  { %v6179_v58 = vpop.f32.mrf.mxu0  ;;  %1488 = vmatmul.mubr.bf16.gmra.mxu0 %v6173_v38  ;;  %v6182_v40 = vpop.f32.mrf.mxu1  ;;  %1841 = vmatmul.mubr.bf16.gmra.mxu1 %v6173_v38  ;;  %v5031_v38 = vld [vmem:[#allocation8 + $0xcc] ss:$16 sps:$4 sm:$0xff]  }
 0x19e   :  { %7985 = vst [vmem:[#allocation87_spill] sm:$0xff] %v6179_v58  ;;  %7986 = vst [vmem:[#allocation88_spill] sm:$0xff] %v6182_v40  ;;  %2203 = vmatprep.mubr.bf16.mxu0 %v5732_v7  ;;  %2556 = vmatprep.mubr.bf16.mxu1 %v5732_v7  ;;  %v5023_v58 = vld [vmem:[#allocation8 + $0xe8] ss:$16 sps:$4 sm:$0xff]   ;;  %v5028_v40 = vld [vmem:[#allocation8 + $0xc4] ss:$16 sps:$4 sm:$0xff]  }
 0x19f   :  { %v6187_v11 = vpop.f32.mrf.mxu0  ;;  %v6189_v60 = vpop.f32.mrf.mxu1 }
 0x1a0   :  { %7987 = vst [vmem:[#allocation89_spill] sm:$0xff] %v6187_v11  ;;  %7988 = vst [vmem:[#allocation90_spill] sm:$0xff] %v6189_v60  ;;  %v5034_v60 = vld [vmem:[#allocation8 + $0xa4] ss:$16 sps:$4 sm:$0xff]  }
 0x1a1   :  { %v6191_v42 = vpop.f32.mrf.mxu0  ;;  %v6193_v57 = vpop.f32.mrf.mxu1 }
 0x1a2   :  { %7989 = vst [vmem:[#allocation91_spill] sm:$0xff] %v6191_v42  ;;  %7990 = vst [vmem:[#allocation92_spill] sm:$0xff] %v6193_v57  ;;  %v5026_v42 = vld [vmem:[#allocation8 + $0xc0] ss:$16 sps:$4 sm:$0xff]   ;;  %v5029_v57 = vld [vmem:[#allocation8 + $0xc8] ss:$16 sps:$4 sm:$0xff]  }
 0x1a3   :  { %v6195_v44 = vpop.f32.mrf.mxu0  ;;  %v6197_v39 = vpop.f32.mrf.mxu1 }
 0x1a4   :  { %7991 = vst [vmem:[#allocation93_spill] sm:$0xff] %v6195_v44  ;;  %7992 = vst [vmem:[#allocation94_spill] sm:$0xff] %v6197_v39 }
 0x1a5   :  { %v6199_v54 = vpop.f32.mrf.mxu0  ;;  %v6201_v53 = vpop.f32.mrf.mxu1  ;;  %2204 = vmatmul.mubr.bf16.vlgmr.msra.gmra.mxu0 %v5734_v37  ;;  %2557 = vmatmul.mubr.bf16.vlgmr.msra.gmra.mxu1 %v5734_v37  ;;  %v5032_v37 = vld [vmem:[#allocation8 + $0xa0] ss:$16 sps:$4 sm:$0xff]  }
 0x1a6   :  { %7993 = vst [vmem:[#allocation95_spill] sm:$0xff] %v6199_v54  ;;  %7994 = vst [vmem:[#allocation96_spill] sm:$0xff] %v6201_v53  ;;  %3262 = vmatpush1.bf16.msra.mxu0 %v5020_v51  ;;  %3615 = vmatpush1.bf16.msra.mxu1 %v5023_v58  ;;  %v5037_v54 = vld [vmem:[#allocation8 + $0xac] ss:$16 sps:$4 sm:$0xff]  }
 0x1a7   :  { %2213 = vmatprep.mubr.bf16.mxu0 %v5742_v19  ;;  %2566 = vmatprep.mubr.bf16.mxu1 %v5742_v19  ;;  %v6207_v44 = vpop.f32.mrf.mxu0  ;;  %v6209_v39 = vpop.f32.mrf.mxu1  ;;  %v5035_v19 = vld [vmem:[#allocation8 + $0xa8] ss:$16 sps:$4 sm:$0xff]  }
 0x1a8   :  { %7995 = vst [vmem:[#allocation97_spill] sm:$0xff] %v6207_v44  ;;  %7996 = vst [vmem:[#allocation98_spill] sm:$0xff] %v6209_v39  ;;  %3263 = vmatprep.subr.bf16.mxu0 %v5028_v40  ;;  %3616 = vmatprep.subr.bf16.mxu1 %v5031_v38  ;;  %v5040_v44 = vld [vmem:[#allocation8 + $0x84] ss:$16 sps:$4 sm:$0xff]   ;;  %v5043_v39 = vld [vmem:[#allocation8 + $0x8c] ss:$16 sps:$4 sm:$0xff]  }
 0x1a9   :  { %v6211_v53 = vpop.f32.mrf.mxu0  ;;  %v6213_v11 = vpop.f32.mrf.mxu1 }
 0x1aa   :  { %7997 = vst [vmem:[#allocation99_spill] sm:$0xff] %v6211_v53  ;;  %7998 = vst [vmem:[#allocation100_spill] sm:$0xff] %v6213_v11  ;;  %3264 = vmatpush1.bf16.msra.mxu0 %v5026_v42  ;;  %3617 = vmatpush1.bf16.msra.mxu1 %v5029_v57  ;;  %v5041_v57 = vld [vmem:[#allocation8 + $0x88] ss:$16 sps:$4 sm:$0xff]  }
 0x1ab   :  { %v6215_v51 = vpop.f32.mrf.mxu0  ;;  %v6217_v58 = vpop.f32.mrf.mxu1  ;;  %3265 = vmatprep.subr.bf16.mxu0 %v5034_v60  ;;  %3618 = vmatprep.subr.bf16.mxu1 %v5037_v54  ;;  %v5038_v54 = vld [vmem:[#allocation8 + $0x80] ss:$16 sps:$4 sm:$0xff]   ;;  %v5046_v60 = vld [vmem:[#allocation8 + $0x64] ss:$16 sps:$4 sm:$0xff]  }
 0x1ac   :  { %7999 = vst [vmem:[#allocation101_spill] sm:$0xff] %v6215_v51  ;;  %8000 = vst [vmem:[#allocation102_spill] sm:$0xff] %v6217_v58 }
 0x1ad   :  { %v6219_v7 = vpop.f32.mrf.mxu0  ;;  %v6221_v40 = vpop.f32.mrf.mxu1  ;;  %2214 = vmatmul.mubr.bf16.gmra.mxu0 %v5752_v47  ;;  %2567 = vmatmul.mubr.bf16.gmra.mxu1 %v5752_v47 }
 0x1ae   :  { %8001 = vst [vmem:[#allocation103_spill] sm:$0xff] %v6219_v7  ;;  %8002 = vst [vmem:[#allocation104_spill] sm:$0xff] %v6221_v40  ;;  %2223 = vmatprep.mubr.bf16.mxu0 %v5761_v50  ;;  %2576 = vmatprep.mubr.bf16.mxu1 %v5761_v50  ;;  %v5049_v40 = vld [vmem:[#allocation8 + $0x6c] ss:$16 sps:$4 sm:$0xff]  }
 0x1af   :  { %v6227_v38 = vpop.f32.mrf.mxu0  ;;  %v6229_v42 = vpop.f32.mrf.mxu1  ;;  %3266 = vmatpush1.bf16.msra.mxu0 %v5032_v37  ;;  %3619 = vmatpush1.bf16.msra.mxu1 %v5035_v19  ;;  %v5052_v37 = vld [vmem:[#allocation8 + $0x44] ss:$16 sps:$4 sm:$0xff]   ;;  %v5055_v19 = vld [vmem:[#allocation8 + $0x4c] ss:$16 sps:$4 sm:$0xff]  }
 0x1b0   :  { %8003 = vst [vmem:[#allocation105_spill] sm:$0xff] %v6227_v38  ;;  %8004 = vst [vmem:[#allocation106_spill] sm:$0xff] %v6229_v42  ;;  %3267 = vmatprep.subr.bf16.mxu0 %v5040_v44  ;;  %3620 = vmatprep.subr.bf16.mxu1 %v5043_v39  ;;  %v5044_v38 = vld [vmem:[#allocation8 + $0x60] ss:$16 sps:$4 sm:$0xff]   ;;  %v5047_v42 = vld [vmem:[#allocation8 + $0x68] ss:$16 sps:$4 sm:$0xff]  }
 0x1b1   :  { %v6231_v7 = vpop.f32.mrf.mxu0  ;;  %v6233_v58 = vpop.f32.mrf.mxu1 }
 0x1b2   :  { %8005 = vst [vmem:[#allocation107_spill] sm:$0xff] %v6231_v7  ;;  %8006 = vst [vmem:[#allocation108_spill] sm:$0xff] %v6233_v58 }
 0x1b3   :  { %v6235_v51 = vpop.f32.mrf.mxu0  ;;  %v6237_v11 = vpop.f32.mrf.mxu1  ;;  %3268 = vmatpush1.bf16.msra.mxu0 %v5038_v54  ;;  %3621 = vmatpush1.bf16.msra.mxu1 %v5041_v57 }
 0x1b4   :  { %8007 = vst [vmem:[#allocation109_spill] sm:$0xff] %v6235_v51  ;;  %8008 = vst [vmem:[#allocation110_spill] sm:$0xff] %v6237_v11  ;;  %3269 = vmatprep.subr.bf16.mxu0 %v5046_v60  ;;  %3622 = vmatprep.subr.bf16.mxu1 %v5049_v40  ;;  %v5050_v40 = vld [vmem:[#allocation8 + $0x40] ss:$16 sps:$4 sm:$0xff]   ;;  %v5053_v60 = vld [vmem:[#allocation8 + $0x48] ss:$16 sps:$4 sm:$0xff]  }
 0x1b5   :  { %v6239_v44 = vpop.f32.mrf.mxu0  ;;  %v6241_v39 = vpop.f32.mrf.mxu1  ;;  %2224 = vmatmul.mubr.bf16.gmra.mxu0 %v5777_v4  ;;  %2577 = vmatmul.mubr.bf16.gmra.mxu1 %v5777_v4 }
 0x1b6   :  { %8009 = vst [vmem:[#allocation111_spill] sm:$0xff] %v6239_v44  ;;  %8010 = vst [vmem:[#allocation112_spill] sm:$0xff] %v6241_v39  ;;  %2233 = vmatprep.mubr.bf16.mxu0 %v5781_v17  ;;  %2586 = vmatprep.mubr.bf16.mxu1 %v5781_v17  ;;  %v5058_v44 = vld [vmem:[#allocation8 + $0x24] ss:$16 sps:$4 sm:$0xff]   ;;  %v5061_v39 = vld [vmem:[#allocation8 + $0x2c] ss:$16 sps:$4 sm:$0xff]  }
 0x1b7   :  { %v6247_v54 = vpop.f32.mrf.mxu0  ;;  %v6249_v57 = vpop.f32.mrf.mxu1  ;;  %3270 = vmatpush1.bf16.msra.mxu0 %v5044_v38  ;;  %3623 = vmatpush1.bf16.msra.mxu1 %v5047_v42  ;;  %v5064_v38 = vld [vmem:[#allocation8 + $0x4] ss:$16 sps:$4 sm:$0xff]   ;;  %v5067_v42 = vld [vmem:[#allocation8 + $0xc] ss:$16 sps:$4 sm:$0xff]  }
 0x1b8   :  { %8011 = vst [vmem:[#allocation113_spill] sm:$0xff] %v6247_v54  ;;  %8012 = vst [vmem:[#allocation114_spill] sm:$0xff] %v6249_v57  ;;  %3271 = vmatprep.subr.bf16.mxu0 %v5052_v37  ;;  %3624 = vmatprep.subr.bf16.mxu1 %v5055_v19  ;;  %v5056_v54 = vld [vmem:[#allocation8 + $0x20] ss:$16 sps:$4 sm:$0xff]   ;;  %v5059_v57 = vld [vmem:[#allocation8 + $0x28] ss:$16 sps:$4 sm:$0xff]  }
 0x1b9   :  { %v6251_v11 = vpop.f32.mrf.mxu0  ;;  %v6253_v51 = vpop.f32.mrf.mxu1 }
 0x1ba   :  { %8013 = vst [vmem:[#allocation115_spill] sm:$0xff] %v6251_v11  ;;  %8014 = vst [vmem:[#allocation116_spill] sm:$0xff] %v6253_v51 }
 0x1bb   :  { %v6255_v58 = vpop.f32.mrf.mxu0  ;;  %v6257_v7 = vpop.f32.mrf.mxu1  ;;  %3272 = vmatpush1.bf16.msra.mxu0 %v5050_v40  ;;  %3625 = vmatpush1.bf16.msra.mxu1 %v5053_v60 }
 0x1bc   :  { %8015 = vst [vmem:[#allocation117_spill] sm:$0xff] %v6255_v58  ;;  %8016 = vst [vmem:[#allocation118_spill] sm:$0xff] %v6257_v7  ;;  %3273 = vmatprep.subr.bf16.mxu0 %v5058_v44  ;;  %3626 = vmatprep.subr.bf16.mxu1 %v5061_v39  ;;  %v5062_v44 = vld [vmem:[#allocation8] ss:$16 sps:$4 sm:$0xff]   ;;  %v5065_v39 = vld [vmem:[#allocation8 + $0x8] ss:$16 sps:$4 sm:$0xff]  }
 0x1bd   :  { %v6259_v37 = vpop.f32.mrf.mxu0  ;;  %v6261_v19 = vpop.f32.mrf.mxu1  ;;  %2234 = vmatmul.mubr.bf16.gmra.mxu0 %v5803_v23  ;;  %2587 = vmatmul.mubr.bf16.gmra.mxu1 %v5803_v23 }
 0x1be   :  { %8017 = vst [vmem:[#allocation119_spill] sm:$0xff] %v6259_v37  ;;  %8018 = vst [vmem:[#allocation120_spill] sm:$0xff] %v6261_v19  ;;  %2243 = vmatprep.mubr.bf16.mxu0 %v5809_v34  ;;  %2596 = vmatprep.mubr.bf16.mxu1 %v5809_v34  ;;  %v5070_v37 = vld [vmem:[#allocation8 + $0x1e4] ss:$16 sps:$4 sm:$0xff]   ;;  %v5073_v19 = vld [vmem:[#allocation8 + $0x1ec] ss:$16 sps:$4 sm:$0xff]  }
 0x1bf   :  { %v6267_v40 = vpop.f32.mrf.mxu0  ;;  %v6269_v60 = vpop.f32.mrf.mxu1  ;;  %3274 = vmatpush1.bf16.msra.mxu0 %v5056_v54  ;;  %3627 = vmatpush1.bf16.msra.mxu1 %v5059_v57  ;;  %v5076_v54 = vld [vmem:[#allocation8 + $0x1c4] ss:$16 sps:$4 sm:$0xff]   ;;  %v5079_v57 = vld [vmem:[#allocation8 + $0x1cc] ss:$16 sps:$4 sm:$0xff]  }
 0x1c0   :  { %8019 = vst [vmem:[#allocation121_spill] sm:$0xff] %v6267_v40  ;;  %8020 = vst [vmem:[#allocation122_spill] sm:$0xff] %v6269_v60  ;;  %3275 = vmatprep.subr.bf16.mxu0 %v5064_v38  ;;  %3628 = vmatprep.subr.bf16.mxu1 %v5067_v42  ;;  %v5068_v40 = vld [vmem:[#allocation8 + $0x1e0] ss:$16 sps:$4 sm:$0xff]   ;;  %v5071_v60 = vld [vmem:[#allocation8 + $0x1e8] ss:$16 sps:$4 sm:$0xff]  }
 0x1c1   :  { %v6271_v7 = vpop.f32.mrf.mxu0  ;;  %v6273_v58 = vpop.f32.mrf.mxu1 }
 0x1c2   :  { %8021 = vst [vmem:[#allocation123_spill] sm:$0xff] %v6271_v7  ;;  %8022 = vst [vmem:[#allocation124_spill] sm:$0xff] %v6273_v58 }
 0x1c3   :  { %v6275_v51 = vpop.f32.mrf.mxu0  ;;  %v6277_v11 = vpop.f32.mrf.mxu1  ;;  %3276 = vmatpush1.bf16.msra.mxu0 %v5062_v44  ;;  %3629 = vmatpush1.bf16.msra.mxu1 %v5065_v39 }
 0x1c4   :  { %8023 = vst [vmem:[#allocation125_spill] sm:$0xff] %v6275_v51  ;;  %8024 = vst [vmem:[#allocation126_spill] sm:$0xff] %v6277_v11  ;;  %3277 = vmatprep.subr.bf16.mxu0 %v5070_v37  ;;  %3630 = vmatprep.subr.bf16.mxu1 %v5073_v19  ;;  %v5074_v37 = vld [vmem:[#allocation8 + $0x1c0] ss:$16 sps:$4 sm:$0xff]   ;;  %v5077_v19 = vld [vmem:[#allocation8 + $0x1c8] ss:$16 sps:$4 sm:$0xff]  }
 0x1c5   :  { %v6279_v38 = vpop.f32.mrf.mxu0  ;;  %v6281_v42 = vpop.f32.mrf.mxu1  ;;  %2244 = vmatmul.mubr.bf16.gmra.mxu0 %v5841_v46  ;;  %2597 = vmatmul.mubr.bf16.gmra.mxu1 %v5841_v46 }
 0x1c6   :  { %8025 = vst [vmem:[#allocation127_spill] sm:$0xff] %v6279_v38  ;;  %8026 = vst [vmem:[#allocation128_spill] sm:$0xff] %v6281_v42  ;;  %2253 = vmatprep.mubr.bf16.mxu0 %v5847_v49  ;;  %2606 = vmatprep.mubr.bf16.mxu1 %v5847_v49  ;;  %v5082_v38 = vld [vmem:[#allocation8 + $0x1a4] ss:$16 sps:$4 sm:$0xff]   ;;  %v5085_v42 = vld [vmem:[#allocation8 + $0x1ac] ss:$16 sps:$4 sm:$0xff]  }
 0x1c7   :  { %v6287_v44 = vpop.f32.mrf.mxu0  ;;  %v6289_v39 = vpop.f32.mrf.mxu1  ;;  %3278 = vmatpush2.bf16.msra.mxu0 %v5068_v40  ;;  %3631 = vmatpush2.bf16.msra.mxu1 %v5071_v60 }
 0x1c8   :  { %8027 = vst [vmem:[#allocation129_spill] sm:$0xff] %v6287_v44  ;;  %8028 = vst [vmem:[#allocation130_spill] sm:$0xff] %v6289_v39  ;;  %3279 = vmatprep.subr.bf16.mxu0 %v5076_v54  ;;  %3632 = vmatprep.subr.bf16.mxu1 %v5079_v57  ;;  %v5080_v44 = vld [vmem:[#allocation8 + $0x1a0] ss:$16 sps:$4 sm:$0xff]   ;;  %v5083_v39 = vld [vmem:[#allocation8 + $0x1a8] ss:$16 sps:$4 sm:$0xff]  }
 0x1c9   :  { %v6291_v11 = vpop.f32.mrf.mxu0  ;;  %v6293_v51 = vpop.f32.mrf.mxu1 }
 0x1ca   :  { %8029 = vst [vmem:[#allocation131_spill] sm:$0xff] %v6291_v11  ;;  %8030 = vst [vmem:[#allocation132_spill] sm:$0xff] %v6293_v51 }
 0x1cb   :  { %v6295_v58 = vpop.f32.mrf.mxu0  ;;  %v6297_v7 = vpop.f32.mrf.mxu1  ;;  %3280 = vmatpush2.bf16.msra.mxu0 %v5074_v37  ;;  %3633 = vmatpush2.bf16.msra.mxu1 %v5077_v19 }
 0x1cc   :  { %8031 = vst [vmem:[#allocation133_spill] sm:$0xff] %v6295_v58  ;;  %8032 = vst [vmem:[#allocation134_spill] sm:$0xff] %v6297_v7  ;;  %3281 = vmatprep.subr.bf16.mxu0 %v5082_v38  ;;  %3634 = vmatprep.subr.bf16.mxu1 %v5085_v42  ;;  %v5089_v7 = vld [vmem:[#allocation8 + $0x188] ss:$16 sps:$4 sm:$0xff]   ;;  %v5091_v58 = vld [vmem:[#allocation8 + $0x18c] ss:$16 sps:$4 sm:$0xff]  }
 0x1cd   :  { %v6299_v40 = vpop.f32.mrf.mxu0  ;;  %v6301_v60 = vpop.f32.mrf.mxu1  ;;  %2254 = vmatmul.mubr.bf16.gmra.mxu0 %v5857_v63  ;;  %2607 = vmatmul.mubr.bf16.gmra.mxu1 %v5857_v63 }
 0x1ce   :  { %8033 = vst [vmem:[#allocation135_spill] sm:$0xff] %v6299_v40  ;;  %8034 = vst [vmem:[#allocation136_spill] sm:$0xff] %v6301_v60  ;;  %2263 = vmatprep.mubr.bf16.mxu0 %v5859_v30  ;;  %2616 = vmatprep.mubr.bf16.mxu1 %v5859_v30  ;;  %v5088_v60 = vld [vmem:[#allocation8 + $0x184] ss:$16 sps:$4 sm:$0xff]   ;;  %v5086_v40 = vld [vmem:[#allocation8 + $0x180] ss:$16 sps:$4 sm:$0xff]  }
 0x1cf   :  { %v6307_v54 = vpop.f32.mrf.mxu0  ;;  %v6309_v57 = vpop.f32.mrf.mxu1  ;;  %3282 = vmatpush2.bf16.msra.mxu0 %v5080_v44  ;;  %3635 = vmatpush2.bf16.msra.mxu1 %v5083_v39 }
 0x1d0   :  { %8035 = vst [vmem:[#allocation137_spill] sm:$0xff] %v6307_v54  ;;  %8036 = vst [vmem:[#allocation138_spill] sm:$0xff] %v6309_v57  ;;  %3283 = vmatprep.subr.bf16.mxu0 %v5088_v60  ;;  %3636 = vmatprep.subr.bf16.mxu1 %v5091_v58 }
 0x1d1   :  { %v6311_v38 = vpop.f32.mrf.mxu0  ;;  %v6313_v42 = vpop.f32.mrf.mxu1 }
 0x1d2   :  { %8037 = vst [vmem:[#allocation139_spill] sm:$0xff] %v6311_v38  ;;  %8038 = vst [vmem:[#allocation140_spill] sm:$0xff] %v6313_v42 }
 0x1d3   :  { %v6315_v37 = vpop.f32.mrf.mxu0  ;;  %v6317_v19 = vpop.f32.mrf.mxu1  ;;  %3284 = vmatpush2.bf16.msra.mxu0 %v5086_v40  ;;  %3637 = vmatpush2.bf16.msra.mxu1 %v5089_v7 }
 0x1d4   :  { %8039 = vst [vmem:[#allocation141_spill] sm:$0xff] %v6315_v37  ;;  %8040 = vst [vmem:[#allocation142_spill] sm:$0xff] %v6317_v19 }
 0x1d5   :  { %v6319_v51 = vpop.f32.mrf.mxu0  ;;  %v6321_v11 = vpop.f32.mrf.mxu1  ;;  %2264 = vmatmul.mubr.bf16.gmra.mxu0 %v5865_v29  ;;  %2617 = vmatmul.mubr.bf16.gmra.mxu1 %v5865_v29 }
 0x1d6   :  { %8041 = vst [vmem:[#allocation143_spill] sm:$0xff] %v6319_v51  ;;  %8042 = vst [vmem:[#allocation144_spill] sm:$0xff] %v6321_v11  ;;  %2273 = vmatprep.mubr.bf16.mxu0 %v5867_v2  ;;  %2626 = vmatprep.mubr.bf16.mxu1 %v5867_v2 }
 0x1d7   :  { %v6327_v44 = vpop.f32.mrf.mxu0  ;;  %v6329_v39 = vpop.f32.mrf.mxu1 }
 0x1d8   :  { %8043 = vst [vmem:[#allocation145_spill] sm:$0xff] %v6327_v44  ;;  %8044 = vst [vmem:[#allocation146_spill] sm:$0xff] %v6329_v39 }
 0x1d9   :  { %v6331_v19 = vpop.f32.mrf.mxu0  ;;  %v6333_v51 = vpop.f32.mrf.mxu1 }
 0x1da   :  { %8045 = vst [vmem:[#allocation147_spill] sm:$0xff] %v6331_v19  ;;  %8046 = vst [vmem:[#allocation148_spill] sm:$0xff] %v6333_v51  ;;  %v5095_v51 = vld [vmem:[#allocation8 + $0x168] ss:$16 sps:$4 sm:$0xff]   ;;  %v5097_v19 = vld [vmem:[#allocation8 + $0x16c] ss:$16 sps:$4 sm:$0xff]  }
 0x1db   :  { %v6335_v11 = vpop.f32.mrf.mxu0  ;;  %v6337_v37 = vpop.f32.mrf.mxu1  ;;  %3638 = vmatprep.subr.bf16.mxu1 %v5097_v19 }
 0x1dc   :  { %8047 = vst [vmem:[#allocation149_spill] sm:$0xff] %v6335_v11  ;;  %8048 = vst [vmem:[#allocation150_spill] sm:$0xff] %v6337_v37  ;;  %v5092_v11 = vld [vmem:[#allocation8 + $0x160] ss:$16 sps:$4 sm:$0xff]   ;;  %3639 = vmatpush2.bf16.msra.mxu1 %v5095_v51 }
 0x1dd   :  { %v6339_v42 = vpop.f32.mrf.mxu0  ;;  %v6341_v38 = vpop.f32.mrf.mxu1  ;;  %2274 = vmatmul.mubr.bf16.gmra.mxu0 %v5873_v1  ;;  %2627 = vmatmul.mubr.bf16.gmra.mxu1 %v5873_v1 }
 0x1de   :  { %8049 = vst [vmem:[#allocation151_spill] sm:$0xff] %v6339_v42  ;;  %8050 = vst [vmem:[#allocation152_spill] sm:$0xff] %v6341_v38  ;;  %2283 = vmatprep.mubr.bf16.mxu0 %v5875_v20  ;;  %2636 = vmatprep.mubr.bf16.mxu1 %v5875_v20  ;;  %v5094_v38 = vld [vmem:[#allocation8 + $0x164] ss:$16 sps:$4 sm:$0xff]  }
 0x1df   :  { %v6347_v7 = vpop.f32.mrf.mxu0  ;;  %v6349_v58 = vpop.f32.mrf.mxu1  ;;  %3285 = vmatprep.subr.bf16.mxu0 %v5094_v38 }
 0x1e0   :  { %8051 = vst [vmem:[#allocation153_spill] sm:$0xff] %v6347_v7  ;;  %8052 = vst [vmem:[#allocation154_spill] sm:$0xff] %v6349_v58  ;;  %3286 = vmatpush2.bf16.msra.mxu0 %v5092_v11 }
 0x1e1   :  { %v6351_v40 = vpop.f32.mrf.mxu0  ;;  %v6353_v60 = vpop.f32.mrf.mxu1 }
 0x1e2   :  { %8053 = vst [vmem:[#allocation155_spill] sm:$0xff] %v6351_v40  ;;  %8054 = vst [vmem:[#allocation156_spill] sm:$0xff] %v6353_v60 }
 0x1e3   :  { %v6355_v37 = vpop.f32.mrf.mxu0  ;;  %v6357_v42 = vpop.f32.mrf.mxu1 }
 0x1e4   :  { %8055 = vst [vmem:[#allocation157_spill] sm:$0xff] %v6355_v37  ;;  %8056 = vst [vmem:[#allocation158_spill] sm:$0xff] %v6357_v42 }
 0x1e5   :  { %v6359_v39 = vpop.f32.mrf.mxu0  ;;  %v6361_v44 = vpop.f32.mrf.mxu1  ;;  %2284 = vmatmul.mubr.bf16.gmra.mxu0 %v5881_v22  ;;  %2637 = vmatmul.mubr.bf16.gmra.mxu1 %v5881_v22 }
 0x1e6   :  { %8057 = vst [vmem:[#allocation159_spill] sm:$0xff] %v6359_v39  ;;  %8058 = vst [vmem:[#allocation160_spill] sm:$0xff] %v6361_v44  ;;  %2293 = vmatprep.mubr.bf16.mxu0 %v5883_v6  ;;  %2646 = vmatprep.mubr.bf16.mxu1 %v5883_v6 }
 0x1e7   :  { %v6367_v60 = vpop.f32.mrf.mxu0  ;;  %v6369_v37 = vpop.f32.mrf.mxu1 }
 0x1e8   :  { %8059 = vst [vmem:[#allocation161_spill] sm:$0xff] %v6367_v60  ;;  %8060 = vst [vmem:[#allocation162_spill] sm:$0xff] %v6369_v37 }
 0x1e9   :  { %v6371_v42 = vpop.f32.mrf.mxu0  ;;  %v6373_v39 = vpop.f32.mrf.mxu1 }
 0x1ea   :  { %8061 = vst [vmem:[#allocation163_spill] sm:$0xff] %v6371_v42  ;;  %8062 = vst [vmem:[#allocation164_spill] sm:$0xff] %v6373_v39  ;;  %v5101_v39 = vld [vmem:[#allocation8 + $0x148] ss:$16 sps:$4 sm:$0xff]  }
 0x1eb   :  { %v6375_v44 = vpop.f32.mrf.mxu0  ;;  %v6377_v40 = vpop.f32.mrf.mxu1 }
 0x1ec   :  { %8063 = vst [vmem:[#allocation165_spill] sm:$0xff] %v6375_v44  ;;  %8064 = vst [vmem:[#allocation166_spill] sm:$0xff] %v6377_v40  ;;  %v5100_v44 = vld [vmem:[#allocation8 + $0x144] ss:$16 sps:$4 sm:$0xff]  }
 0x1ed   :  { %v6379_v58 = vpop.f32.mrf.mxu0  ;;  %v6381_v7 = vpop.f32.mrf.mxu1  ;;  %2294 = vmatmul.mubr.bf16.gmra.mxu0 %v5889_v35  ;;  %2647 = vmatmul.mubr.bf16.gmra.mxu1 %v5889_v35 }
 0x1ee   :  { %8065 = vst [vmem:[#allocation167_spill] sm:$0xff] %v6379_v58  ;;  %8066 = vst [vmem:[#allocation168_spill] sm:$0xff] %v6381_v7  ;;  %2303 = vmatprep.mubr.bf16.mxu0 %v5891_v24  ;;  %2656 = vmatprep.mubr.bf16.mxu1 %v5891_v24  ;;  %v5098_v7 = vld [vmem:[#allocation8 + $0x140] ss:$16 sps:$4 sm:$0xff]  }
 0x1ef   :  { %v6387_v11 = vpop.f32.mrf.mxu0  ;;  %v6389_v51 = vpop.f32.mrf.mxu1  ;;  %3287 = vmatprep.subr.bf16.mxu0 %v5100_v44 }
 0x1f0   :  { %8067 = vst [vmem:[#allocation169_spill] sm:$0xff] %v6387_v11  ;;  %8068 = vst [vmem:[#allocation170_spill] sm:$0xff] %v6389_v51  ;;  %v5103_v51 = vld [vmem:[#allocation8 + $0x14c] ss:$16 sps:$4 sm:$0xff]   ;;  %3288 = vmatpush2.bf16.msra.mxu0 %v5098_v7 }
 0x1f1   :  { %v6391_v38 = vpop.f32.mrf.mxu0  ;;  %v6393_v19 = vpop.f32.mrf.mxu1  ;;  %3640 = vmatprep.subr.bf16.mxu1 %v5103_v51 }
 0x1f2   :  { %8069 = vst [vmem:[#allocation171_spill] sm:$0xff] %v6391_v38  ;;  %8070 = vst [vmem:[#allocation172_spill] sm:$0xff] %v6393_v19  ;;  %3641 = vmatpush2.bf16.msra.mxu1 %v5101_v39 }
 0x1f3   :  { %v6395_v40 = vpop.f32.mrf.mxu0  ;;  %v6397_v58 = vpop.f32.mrf.mxu1 }
 0x1f4   :  { %8071 = vst [vmem:[#allocation173_spill] sm:$0xff] %v6395_v40  ;;  %8072 = vst [vmem:[#allocation174_spill] sm:$0xff] %v6397_v58 }
 0x1f5   :  { %v6399_v42 = vpop.f32.mrf.mxu0  ;;  %v6401_v37 = vpop.f32.mrf.mxu1  ;;  %2304 = vmatmul.mubr.bf16.gmra.mxu0 %v5897_v8  ;;  %2657 = vmatmul.mubr.bf16.gmra.mxu1 %v5897_v8 }
 0x1f6   :  { %8073 = vst [vmem:[#allocation175_spill] sm:$0xff] %v6399_v42  ;;  %8074 = vst [vmem:[#allocation176_spill] sm:$0xff] %v6401_v37  ;;  %2313 = vmatprep.mubr.bf16.mxu0 %v5899_v25  ;;  %2666 = vmatprep.mubr.bf16.mxu1 %v5899_v25 }
 0x1f7   :  { %v6407_v19 = vpop.f32.mrf.mxu0  ;;  %v6409_v40 = vpop.f32.mrf.mxu1 }
 0x1f8   :  { %8075 = vst [vmem:[#allocation177_spill] sm:$0xff] %v6407_v19  ;;  %8076 = vst [vmem:[#allocation178_spill] sm:$0xff] %v6409_v40 }
 0x1f9   :  { %v6411_v42 = vpop.f32.mrf.mxu0  ;;  %v6413_v37 = vpop.f32.mrf.mxu1 }
 0x1fa   :  { %8077 = vst [vmem:[#allocation179_spill] sm:$0xff] %v6411_v42  ;;  %8078 = vst [vmem:[#allocation180_spill] sm:$0xff] %v6413_v37  ;;  %v5107_v37 = vld [vmem:[#allocation8 + $0x128] ss:$16 sps:$4 sm:$0xff]  }
 0x1fb   :  { %v6415_v58 = vpop.f32.mrf.mxu0  ;;  %v6417_v38 = vpop.f32.mrf.mxu1 }
 0x1fc   :  { %8079 = vst [vmem:[#allocation181_spill] sm:$0xff] %v6415_v58  ;;  %8080 = vst [vmem:[#allocation182_spill] sm:$0xff] %v6417_v38  ;;  %v5106_v58 = vld [vmem:[#allocation8 + $0x124] ss:$16 sps:$4 sm:$0xff]  }
 0x1fd   :  { %v6419_v11 = vpop.f32.mrf.mxu0  ;;  %v6421_v60 = vpop.f32.mrf.mxu1  ;;  %2314 = vmatmul.mubr.bf16.gmra.mxu0 %v5905_v43  ;;  %2667 = vmatmul.mubr.bf16.gmra.mxu1 %v5905_v43 }
 0x1fe   :  { %8081 = vst [vmem:[#allocation183_spill] sm:$0xff] %v6419_v11  ;;  %8082 = vst [vmem:[#allocation184_spill] sm:$0xff] %v6421_v60  ;;  %2323 = vmatprep.mubr.bf16.mxu0 %v5907_v26  ;;  %2676 = vmatprep.mubr.bf16.mxu1 %v5907_v26  ;;  %v5104_v60 = vld [vmem:[#allocation8 + $0x120] ss:$16 sps:$4 sm:$0xff]  }
 0x1ff   :  { %v6427_v44 = vpop.f32.mrf.mxu0  ;;  %v6429_v39 = vpop.f32.mrf.mxu1  ;;  %3289 = vmatprep.subr.bf16.mxu0 %v5106_v58 }
 0x200   :  { %8083 = vst [vmem:[#allocation185_spill] sm:$0xff] %v6427_v44  ;;  %8084 = vst [vmem:[#allocation186_spill] sm:$0xff] %v6429_v39  ;;  %v5109_v39 = vld [vmem:[#allocation8 + $0x12c] ss:$16 sps:$4 sm:$0xff]   ;;  %3290 = vmatpush2.bf16.msra.mxu0 %v5104_v60 }
 0x201   :  { %v6431_v7 = vpop.f32.mrf.mxu0  ;;  %v6433_v51 = vpop.f32.mrf.mxu1  ;;  %3642 = vmatprep.subr.bf16.mxu1 %v5109_v39 }
 0x202   :  { %8085 = vst [vmem:[#allocation187_spill] sm:$0xff] %v6431_v7  ;;  %8086 = vst [vmem:[#allocation188_spill] sm:$0xff] %v6433_v51  ;;  %3643 = vmatpush2.bf16.msra.mxu1 %v5107_v37 }
 0x203   :  { %v6435_v38 = vpop.f32.mrf.mxu0  ;;  %v6437_v11 = vpop.f32.mrf.mxu1 }
 0x204   :  { %8087 = vst [vmem:[#allocation189_spill] sm:$0xff] %v6435_v38  ;;  %8088 = vst [vmem:[#allocation190_spill] sm:$0xff] %v6437_v11 }
 0x205   :  { %v6439_v42 = vpop.f32.mrf.mxu0  ;;  %v6441_v40 = vpop.f32.mrf.mxu1  ;;  %2324 = vmatmul.mubr.bf16.gmra.mxu0 %v5913_v36  ;;  %2677 = vmatmul.mubr.bf16.gmra.mxu1 %v5913_v36 }
 0x206   :  { %8089 = vst [vmem:[#allocation191_spill] sm:$0xff] %v6439_v42  ;;  %8090 = vst [vmem:[#allocation192_spill] sm:$0xff] %v6441_v40  ;;  %2333 = vmatprep.mubr.bf16.mxu0 %v5915_v41  ;;  %2686 = vmatprep.mubr.bf16.mxu1 %v5915_v41 }
 0x207   :  { %v6447_v51 = vpop.f32.mrf.mxu0  ;;  %v6449_v38 = vpop.f32.mrf.mxu1 }
 0x208   :  { %8091 = vst [vmem:[#allocation193_spill] sm:$0xff] %v6447_v51  ;;  %8092 = vst [vmem:[#allocation194_spill] sm:$0xff] %v6449_v38 }
 0x209   :  { %v6451_v42 = vpop.f32.mrf.mxu0  ;;  %v6453_v40 = vpop.f32.mrf.mxu1 }
 0x20a   :  { %8093 = vst [vmem:[#allocation195_spill] sm:$0xff] %v6451_v42  ;;  %8094 = vst [vmem:[#allocation196_spill] sm:$0xff] %v6453_v40  ;;  %v5113_v40 = vld [vmem:[#allocation8 + $0x108] ss:$16 sps:$4 sm:$0xff]  }
 0x20b   :  { %v6455_v11 = vpop.f32.mrf.mxu0  ;;  %v6457_v7 = vpop.f32.mrf.mxu1 }
 0x20c   :  { %8095 = vst [vmem:[#allocation197_spill] sm:$0xff] %v6455_v11  ;;  %8096 = vst [vmem:[#allocation198_spill] sm:$0xff] %v6457_v7  ;;  %v5112_v11 = vld [vmem:[#allocation8 + $0x104] ss:$16 sps:$4 sm:$0xff]  }
 0x20d   :  { %v6459_v44 = vpop.f32.mrf.mxu0  ;;  %v6461_v19 = vpop.f32.mrf.mxu1  ;;  %2334 = vmatmul.mubr.bf16.gmra.mxu0 %v5921_v45  ;;  %2687 = vmatmul.mubr.bf16.gmra.mxu1 %v5921_v45 }
 0x20e   :  { %8097 = vst [vmem:[#allocation199_spill] sm:$0xff] %v6459_v44  ;;  %8098 = vst [vmem:[#allocation200_spill] sm:$0xff] %v6461_v19  ;;  %2343 = vmatprep.mubr.bf16.mxu0 %v5923_v13  ;;  %2696 = vmatprep.mubr.bf16.mxu1 %v5923_v13  ;;  %v5110_v19 = vld [vmem:[#allocation8 + $0x100] ss:$16 sps:$4 sm:$0xff]  }
 0x20f   :  { %v6467_v37 = vpop.f32.mrf.mxu0  ;;  %v6469_v58 = vpop.f32.mrf.mxu1  ;;  %3291 = vmatprep.subr.bf16.mxu0 %v5112_v11 }
 0x210   :  { %8099 = vst [vmem:[#allocation201_spill] sm:$0xff] %v6467_v37  ;;  %8100 = vst [vmem:[#allocation202_spill] sm:$0xff] %v6469_v58  ;;  %v5115_v58 = vld [vmem:[#allocation8 + $0x10c] ss:$16 sps:$4 sm:$0xff]   ;;  %3292 = vmatpush2.bf16.msra.mxu0 %v5110_v19 }
 0x211   :  { %v6471_v60 = vpop.f32.mrf.mxu0  ;;  %v6473_v39 = vpop.f32.mrf.mxu1  ;;  %3644 = vmatprep.subr.bf16.mxu1 %v5115_v58 }
 0x212   :  { %8101 = vst [vmem:[#allocation203_spill] sm:$0xff] %v6471_v60  ;;  %8102 = vst [vmem:[#allocation204_spill] sm:$0xff] %v6473_v39  ;;  %3645 = vmatpush2.bf16.msra.mxu1 %v5113_v40 }
 0x213   :  { %v6475_v7 = vpop.f32.mrf.mxu0  ;;  %v6477_v44 = vpop.f32.mrf.mxu1 }
 0x214   :  { %8103 = vst [vmem:[#allocation205_spill] sm:$0xff] %v6475_v7  ;;  %8104 = vst [vmem:[#allocation206_spill] sm:$0xff] %v6477_v44 }
 0x215   :  { %v6479_v42 = vpop.f32.mrf.mxu0  ;;  %v6481_v38 = vpop.f32.mrf.mxu1  ;;  %2344 = vmatmul.mubr.bf16.gmra.mxu0 %v5929_v52  ;;  %2697 = vmatmul.mubr.bf16.gmra.mxu1 %v5929_v52 }
 0x216   :  { %8105 = vst [vmem:[#allocation207_spill] sm:$0xff] %v6479_v42  ;;  %8106 = vst [vmem:[#allocation208_spill] sm:$0xff] %v6481_v38  ;;  %2353 = vmatprep.mubr.bf16.mxu0 %v5931_v48  ;;  %2706 = vmatprep.mubr.bf16.mxu1 %v5931_v48 }
 0x217   :  { %v6487_v39 = vpop.f32.mrf.mxu0  ;;  %v6489_v7 = vpop.f32.mrf.mxu1 }
 0x218   :  { %8107 = vst [vmem:[#allocation209_spill] sm:$0xff] %v6487_v39  ;;  %8108 = vst [vmem:[#allocation210_spill] sm:$0xff] %v6489_v7  ;;  %v8189_v7 = vld [vmem:[#allocation25_spill] sm:$0xff] }
 0x219   :  { %v6491_v42 = vpop.f32.mrf.mxu0  ;;  %v6493_v38 = vpop.f32.mrf.mxu1 }
 0x21a   :  { %8109 = vst [vmem:[#allocation211_spill] sm:$0xff] %v6491_v42  ;;  %8110 = vst [vmem:[#allocation212_spill] sm:$0xff] %v6493_v38 }
 0x21b   :  { %v6495_v44 = vpop.f32.mrf.mxu0  ;;  %v6497_v60 = vpop.f32.mrf.mxu1 }
 0x21c   :  { %8111 = vst [vmem:[#allocation213_spill] sm:$0xff] %v6495_v44  ;;  %8112 = vst [vmem:[#allocation214_spill] sm:$0xff] %v6497_v60 }
 0x21d   :  { %v6499_v37 = vpop.f32.mrf.mxu0  ;;  %v6501_v51 = vpop.f32.mrf.mxu1  ;;  %2354 = vmatmul.mubr.bf16.gmra.mxu0 %v5937_v61  ;;  %2707 = vmatmul.mubr.bf16.gmra.mxu1 %v5937_v61 }
 0x21e   :  { %8113 = vst [vmem:[#allocation215_spill] sm:$0xff] %v6499_v37  ;;  %8114 = vst [vmem:[#allocation216_spill] sm:$0xff] %v6501_v51  ;;  %2363 = vmatprep.mubr.bf16.mxu0 %v5939_v56  ;;  %2716 = vmatprep.mubr.bf16.mxu1 %v5939_v56 }
 0x21f   :  { %v6507_v40 = vpop.f32.mrf.mxu0  ;;  %v6509_v11 = vpop.f32.mrf.mxu1 }
 0x220   :  { %8115 = vst [vmem:[#allocation217_spill] sm:$0xff] %v6507_v40  ;;  %8116 = vst [vmem:[#allocation218_spill] sm:$0xff] %v6509_v11 }
 0x221   :  { %v6511_v19 = vpop.f32.mrf.mxu0  ;;  %v6513_v58 = vpop.f32.mrf.mxu1 }
 0x222   :  { %8117 = vst [vmem:[#allocation219_spill] sm:$0xff] %v6511_v19  ;;  %8118 = vst [vmem:[#allocation220_spill] sm:$0xff] %v6513_v58 }
 0x223   :  { %v6515_v60 = vpop.f32.mrf.mxu0  ;;  %v6517_v37 = vpop.f32.mrf.mxu1 }
 0x224   :  { %8119 = vst [vmem:[#allocation221_spill] sm:$0xff] %v6515_v60  ;;  %8120 = vst [vmem:[#allocation222_spill] sm:$0xff] %v6517_v37 }
 0x225   :  { %v6519_v51 = vpop.f32.mrf.mxu0  ;;  %v6521_v44 = vpop.f32.mrf.mxu1  ;;  %2364 = vmatmul.mubr.bf16.gmra.mxu0 %v5945_v55  ;;  %2717 = vmatmul.mubr.bf16.gmra.mxu1 %v5945_v55 }
 0x226   :  { %8121 = vst [vmem:[#allocation223_spill] sm:$0xff] %v6519_v51  ;;  %8122 = vst [vmem:[#allocation224_spill] sm:$0xff] %v6521_v44  ;;  %2373 = vmatprep.mubr.bf16.mxu0 %v5947_v10  ;;  %2726 = vmatprep.mubr.bf16.mxu1 %v5947_v10 }
 0x227   :  { %v6527_v11 = vpop.f32.mrf.mxu0  ;;  %v6529_v19 = vpop.f32.mrf.mxu1 }
 0x228   :  { %8123 = vst [vmem:[#allocation225_spill] sm:$0xff] %v6527_v11  ;;  %8124 = vst [vmem:[#allocation226_spill] sm:$0xff] %v6529_v19 }
 0x229   :  { %v6531_v58 = vpop.f32.mrf.mxu0  ;;  %v6533_v60 = vpop.f32.mrf.mxu1 }
 0x22a   :  { %8125 = vst [vmem:[#allocation227_spill] sm:$0xff] %v6531_v58  ;;  %8126 = vst [vmem:[#allocation228_spill] sm:$0xff] %v6533_v60 }
 0x22b   :  { %v6535_v37 = vpop.f32.mrf.mxu0  ;;  %v6537_v51 = vpop.f32.mrf.mxu1 }
 0x22c   :  { %8127 = vst [vmem:[#allocation229_spill] sm:$0xff] %v6535_v37  ;;  %8128 = vst [vmem:[#allocation230_spill] sm:$0xff] %v6537_v51 }
 0x22d   :  { %v6539_v44 = vpop.f32.mrf.mxu0  ;;  %v6541_v40 = vpop.f32.mrf.mxu1  ;;  %2374 = vmatmul.mubr.bf16.gmra.mxu0 %v5953_v62  ;;  %2727 = vmatmul.mubr.bf16.gmra.mxu1 %v5953_v62 }
 0x22e   :  { %8129 = vst [vmem:[#allocation231_spill] sm:$0xff] %v6539_v44  ;;  %8130 = vst [vmem:[#allocation232_spill] sm:$0xff] %v6541_v40  ;;  %2383 = vmatprep.mubr.bf16.mxu0 %v5955_v0  ;;  %2736 = vmatprep.mubr.bf16.mxu1 %v5955_v0 }
 0x22f   :  { %v6547_v19 = vpop.f32.mrf.mxu0  ;;  %v6549_v58 = vpop.f32.mrf.mxu1 }
 0x230   :  { %8131 = vst [vmem:[#allocation233_spill] sm:$0xff] %v6547_v19  ;;  %8132 = vst [vmem:[#allocation234_spill] sm:$0xff] %v6549_v58 }
 0x231   :  { %v6551_v60 = vpop.f32.mrf.mxu0  ;;  %v6553_v37 = vpop.f32.mrf.mxu1 }
 0x232   :  { %8133 = vst [vmem:[#allocation235_spill] sm:$0xff] %v6551_v60  ;;  %8134 = vst [vmem:[#allocation236_spill] sm:$0xff] %v6553_v37 }
 0x233   :  { %v6555_v51 = vpop.f32.mrf.mxu0  ;;  %v6557_v44 = vpop.f32.mrf.mxu1 }
 0x234   :  { %8135 = vst [vmem:[#allocation237_spill] sm:$0xff] %v6555_v51  ;;  %8136 = vst [vmem:[#allocation238_spill] sm:$0xff] %v6557_v44 }
 0x235   :  { %v6559_v40 = vpop.f32.mrf.mxu0  ;;  %v6561_v11 = vpop.f32.mrf.mxu1  ;;  %2384 = vmatmul.mubr.bf16.gmra.mxu0 %v5961_v15  ;;  %2737 = vmatmul.mubr.bf16.gmra.mxu1 %v5961_v15 }
 0x236   :  { %8137 = vst [vmem:[#allocation239_spill] sm:$0xff] %v6559_v40  ;;  %8138 = vst [vmem:[#allocation240_spill] sm:$0xff] %v6561_v11  ;;  %2393 = vmatprep.mubr.bf16.mxu0 %v5963_v16  ;;  %2746 = vmatprep.mubr.bf16.mxu1 %v5963_v16 }
 0x237   :  { %v6567_v58 = vpop.f32.mrf.mxu0  ;;  %v6569_v60 = vpop.f32.mrf.mxu1 }
 0x238   :  { %8139 = vst [vmem:[#allocation241_spill] sm:$0xff] %v6567_v58  ;;  %8140 = vst [vmem:[#allocation242_spill] sm:$0xff] %v6569_v60 }
 0x239   :  { %v6571_v37 = vpop.f32.mrf.mxu0  ;;  %v6573_v51 = vpop.f32.mrf.mxu1 }
 0x23a   :  { %8141 = vst [vmem:[#allocation243_spill] sm:$0xff] %v6571_v37  ;;  %8142 = vst [vmem:[#allocation244_spill] sm:$0xff] %v6573_v51 }
 0x23b   :  { %v6575_v44 = vpop.f32.mrf.mxu0  ;;  %v6577_v40 = vpop.f32.mrf.mxu1 }
 0x23c   :  { %8143 = vst [vmem:[#allocation245_spill] sm:$0xff] %v6575_v44  ;;  %8144 = vst [vmem:[#allocation246_spill] sm:$0xff] %v6577_v40 }
 0x23d   :  { %v6579_v11 = vpop.f32.mrf.mxu0  ;;  %v6581_v19 = vpop.f32.mrf.mxu1  ;;  %2394 = vmatmul.mubr.bf16.gmra.mxu0 %v5969_v59  ;;  %2747 = vmatmul.mubr.bf16.gmra.mxu1 %v5969_v59 }
 0x23e   :  { %8145 = vst [vmem:[#allocation247_spill] sm:$0xff] %v6579_v11  ;;  %8146 = vst [vmem:[#allocation248_spill] sm:$0xff] %v6581_v19  ;;  %2403 = vmatprep.mubr.bf16.mxu0 %v5971_v27  ;;  %2756 = vmatprep.mubr.bf16.mxu1 %v5971_v27 }
 0x23f   :  { %v6587_v60 = vpop.f32.mrf.mxu0  ;;  %v6589_v37 = vpop.f32.mrf.mxu1 }
 0x240   :  { %8147 = vst [vmem:[#allocation249_spill] sm:$0xff] %v6587_v60  ;;  %8148 = vst [vmem:[#allocation250_spill] sm:$0xff] %v6589_v37 }
 0x241   :  { %v6591_v51 = vpop.f32.mrf.mxu0  ;;  %v6593_v44 = vpop.f32.mrf.mxu1 }
 0x242   :  { %8149 = vst [vmem:[#allocation251_spill] sm:$0xff] %v6591_v51  ;;  %8150 = vst [vmem:[#allocation252_spill] sm:$0xff] %v6593_v44 }
 0x243   :  { %v6595_v40 = vpop.f32.mrf.mxu0  ;;  %v6597_v11 = vpop.f32.mrf.mxu1 }
 0x244   :  { %8151 = vst [vmem:[#allocation253_spill] sm:$0xff] %v6595_v40  ;;  %8152 = vst [vmem:[#allocation254_spill] sm:$0xff] %v6597_v11 }
 0x245   :  { %v6599_v19 = vpop.f32.mrf.mxu0  ;;  %v6601_v58 = vpop.f32.mrf.mxu1  ;;  %2404 = vmatmul.mubr.bf16.gmra.mxu0 %v5977_v18  ;;  %2757 = vmatmul.mubr.bf16.gmra.mxu1 %v5977_v18 }
 0x246   :  { %8153 = vst [vmem:[#allocation255_spill] sm:$0xff] %v6599_v19  ;;  %8154 = vst [vmem:[#allocation256_spill] sm:$0xff] %v6601_v58  ;;  %2413 = vmatprep.mubr.bf16.mxu0 %v5979_v14  ;;  %2766 = vmatprep.mubr.bf16.mxu1 %v5979_v14 }
 0x247   :  { %v6607_v37 = vpop.f32.mrf.mxu0  ;;  %v6609_v51 = vpop.f32.mrf.mxu1 }
 0x248   :  { %8155 = vst [vmem:[#allocation257_spill] sm:$0xff] %v6607_v37  ;;  %8156 = vst [vmem:[#allocation258_spill] sm:$0xff] %v6609_v51 }
 0x249   :  { %v6611_v44 = vpop.f32.mrf.mxu0  ;;  %v6613_v40 = vpop.f32.mrf.mxu1 }
 0x24a   :  { %8157 = vst [vmem:[#allocation259_spill] sm:$0xff] %v6611_v44  ;;  %8158 = vst [vmem:[#allocation260_spill] sm:$0xff] %v6613_v40 }
 0x24b   :  { %v6615_v11 = vpop.f32.mrf.mxu0  ;;  %v6617_v19 = vpop.f32.mrf.mxu1 }
 0x24c   :  { %8159 = vst [vmem:[#allocation261_spill] sm:$0xff] %v6615_v11  ;;  %8160 = vst [vmem:[#allocation262_spill] sm:$0xff] %v6617_v19 }
 0x24d   :  { %v6619_v58 = vpop.f32.mrf.mxu0  ;;  %v6621_v60 = vpop.f32.mrf.mxu1  ;;  %2414 = vmatmul.mubr.bf16.gmra.mxu0 %v5985_v28  ;;  %2767 = vmatmul.mubr.bf16.gmra.mxu1 %v5985_v28 }
 0x24e   :  { %8161 = vst [vmem:[#allocation263_spill] sm:$0xff] %v6619_v58  ;;  %8162 = vst [vmem:[#allocation264_spill] sm:$0xff] %v6621_v60  ;;  %2423 = vmatprep.mubr.bf16.mxu0 %v5987_v3  ;;  %2776 = vmatprep.mubr.bf16.mxu1 %v5987_v3 }
 0x24f   :  { %v6627_v51 = vpop.f32.mrf.mxu0  ;;  %v6629_v44 = vpop.f32.mrf.mxu1 }
 0x250   :  { %8163 = vst [vmem:[#allocation265_spill] sm:$0xff] %v6627_v51  ;;  %8164 = vst [vmem:[#allocation266_spill] sm:$0xff] %v6629_v44 }
 0x251   :  { %v6631_v40 = vpop.f32.mrf.mxu0  ;;  %v6633_v11 = vpop.f32.mrf.mxu1 }
 0x252   :  { %8165 = vst [vmem:[#allocation267_spill] sm:$0xff] %v6631_v40  ;;  %8166 = vst [vmem:[#allocation268_spill] sm:$0xff] %v6633_v11 }
 0x253   :  { %v6635_v19 = vpop.f32.mrf.mxu0  ;;  %v6637_v58 = vpop.f32.mrf.mxu1 }
 0x254   :  { %8167 = vst [vmem:[#allocation269_spill] sm:$0xff] %v6635_v19  ;;  %8168 = vst [vmem:[#allocation270_spill] sm:$0xff] %v6637_v58 }
 0x255   :  { %v6639_v60 = vpop.f32.mrf.mxu0  ;;  %v6641_v37 = vpop.f32.mrf.mxu1  ;;  %2424 = vmatmul.mubr.bf16.gmra.mxu0 %v5993_v32  ;;  %2777 = vmatmul.mubr.bf16.gmra.mxu1 %v5993_v32 }
 0x256   :  { %8169 = vst [vmem:[#allocation271_spill] sm:$0xff] %v6639_v60  ;;  %8170 = vst [vmem:[#allocation272_spill] sm:$0xff] %v6641_v37  ;;  %2433 = vmatprep.mubr.bf16.mxu0 %v5995_v5  ;;  %2786 = vmatprep.mubr.bf16.mxu1 %v5995_v5 }
 0x257   :  { %v6647_v44 = vpop.f32.mrf.mxu0  ;;  %v6649_v40 = vpop.f32.mrf.mxu1 }
 0x258   :  { %8171 = vst [vmem:[#allocation273_spill] sm:$0xff] %v6647_v44  ;;  %8172 = vst [vmem:[#allocation274_spill] sm:$0xff] %v6649_v40 }
 0x259   :  { %v6651_v11 = vpop.f32.mrf.mxu0  ;;  %v6653_v19 = vpop.f32.mrf.mxu1 }
 0x25a   :  { %8173 = vst [vmem:[#allocation275_spill] sm:$0xff] %v6651_v11  ;;  %8174 = vst [vmem:[#allocation276_spill] sm:$0xff] %v6653_v19 }
 0x25b   :  { %v6655_v58 = vpop.f32.mrf.mxu0  ;;  %v6657_v60 = vpop.f32.mrf.mxu1 }
 0x25c   :  { %8175 = vst [vmem:[#allocation277_spill] sm:$0xff] %v6655_v58  ;;  %8176 = vst [vmem:[#allocation278_spill] sm:$0xff] %v6657_v60 }
 0x25d   :  { %v6659_v37 = vpop.f32.mrf.mxu0  ;;  %v6661_v51 = vpop.f32.mrf.mxu1  ;;  %2434 = vmatmul.mubr.bf16.gmra.mxu0 %v6001_v21  ;;  %2787 = vmatmul.mubr.bf16.gmra.mxu1 %v6001_v21 }
 0x25e   :  { %8177 = vst [vmem:[#allocation279_spill] sm:$0xff] %v6659_v37  ;;  %8178 = vst [vmem:[#allocation280_spill] sm:$0xff] %v6661_v51  ;;  %2443 = vmatprep.mubr.bf16.mxu0 %v6003_v31  ;;  %2796 = vmatprep.mubr.bf16.mxu1 %v6003_v31 }
 0x25f   :  { %v6667_v40 = vpop.f32.mrf.mxu0  ;;  %v6669_v11 = vpop.f32.mrf.mxu1 }
 0x260   :  { %8179 = vst [vmem:[#allocation281_spill] sm:$0xff] %v6667_v40  ;;  %8180 = vst [vmem:[#allocation282_spill] sm:$0xff] %v6669_v11 }
 0x261   :  { %v6671_v19 = vpop.f32.mrf.mxu0  ;;  %v6673_v58 = vpop.f32.mrf.mxu1 }
 0x262   :  { %8181 = vst [vmem:[#allocation283_spill] sm:$0xff] %v6671_v19  ;;  %8182 = vst [vmem:[#allocation284_spill] sm:$0xff] %v6673_v58 }
 0x263   :  { %v6675_v60 = vpop.f32.mrf.mxu0  ;;  %v6677_v37 = vpop.f32.mrf.mxu1 }
 0x264   :  { %8183 = vst [vmem:[#allocation285_spill] sm:$0xff] %v6675_v60  ;;  %8184 = vst [vmem:[#allocation286_spill] sm:$0xff] %v6677_v37 }
 0x265   :  { %v6679_v51 = vpop.f32.mrf.mxu0  ;;  %2444 = vmatmul.mubr.bf16.gmra.mxu0 %v6009_v33  ;;  %v6682_v44 = vpop.f32.mrf.mxu1  ;;  %2797 = vmatmul.mubr.bf16.gmra.mxu1 %v6009_v33 }
 0x266   :  { %2453 = vmatprep.mubr.bf16.mxu0 %v6011_v9  ;;  %2806 = vmatprep.mubr.bf16.mxu1 %v6011_v9 }
 0x267   :  { %v6687_v11 = vpop.f32.mrf.mxu0  ;;  %v6689_v19 = vpop.f32.mrf.mxu1 }
 0x269   :  { %v6691_v58 = vpop.f32.mrf.mxu0  ;;  %v6693_v60 = vpop.f32.mrf.mxu1 }
 0x26b   :  { %v6695_v37 = vpop.f32.mrf.mxu0  ;;  %v6697_v40 = vpop.f32.mrf.mxu1 }
 0x26c   :  { %8185 = vst [vmem:[#allocation287_spill] sm:$0xff] %v6695_v37  ;;  %8186 = vst [vmem:[#allocation288_spill] sm:$0xff] %v6697_v40 }
 0x26d   :  { %v6699_v38 = vpop.f32.mrf.mxu0  ;;  %2454 = vmatmul.mubr.bf16.gmra.mxu0 %v6029_v12  ;;  %v6702_v42 = vpop.f32.mrf.mxu1  ;;  %2807 = vmatmul.mubr.bf16.gmra.mxu1 %v6029_v12 }
 0x26e   :  { %8187 = vst [vmem:[#allocation289_spill] sm:$0xff] %v6699_v38  ;;  %8188 = vst [vmem:[#allocation290_spill] sm:$0xff] %v6702_v42  ;;  %2463 = vmatprep.mubr.bf16.mxu0 %v8189_v7  ;;  %2816 = vmatprep.mubr.bf16.mxu1 %v8189_v7  ;;  %v8197_v42 = vld [vmem:[#allocation34_spill] sm:$0xff]  ;;  %v8199_v7 = vld [vmem:[#allocation35_spill] sm:$0xff] }
 0x26f   :  { %v6707_v39 = vpop.f32.mrf.mxu0  ;;  %v6709_v57 = vpop.f32.mrf.mxu1 }
 0x270   :  { %8190 = vst [vmem:[#allocation291_spill] sm:$0xff] %v6707_v39  ;;  %8191 = vst [vmem:[#allocation292_spill] sm:$0xff] %v6709_v57 }
 0x271   :  { %v6711_v54 = vpop.f32.mrf.mxu0  ;;  %v6713_v53 = vpop.f32.mrf.mxu1 }
 0x272   :  { %8192 = vst [vmem:[#allocation293_spill] sm:$0xff] %v6711_v54  ;;  %8193 = vst [vmem:[#allocation294_spill] sm:$0xff] %v6713_v53 }
 0x273   :  { %v6715_v40 = vpop.f32.mrf.mxu0  ;;  %v6717_v38 = vpop.f32.mrf.mxu1 }
 0x274   :  { %8194 = vst [vmem:[#allocation295_spill] sm:$0xff] %v6715_v40  ;;  %8195 = vst [vmem:[#allocation296_spill] sm:$0xff] %v6717_v38 }
 0x275   :  { %v6719_v37 = vpop.f32.mrf.mxu0  ;;  %2464 = vmatmul.mubr.bf16.gmra.mxu0 %v8197_v42  ;;  %v6722_v12 = vpop.f32.mrf.mxu1  ;;  %2817 = vmatmul.mubr.bf16.gmra.mxu1 %v8197_v42 }
 0x276   :  { %8196 = vst [vmem:[#allocation297_spill] sm:$0xff] %v6719_v37  ;;  %8198 = vst [vmem:[#allocation298_spill] sm:$0xff] %v6722_v12  ;;  %2473 = vmatprep.mubr.bf16.mxu0 %v8199_v7  ;;  %2826 = vmatprep.mubr.bf16.mxu1 %v8199_v7  ;;  %v8207_v12 = vld [vmem:[#allocation44_spill] sm:$0xff]  ;;  %v8209_v7 = vld [vmem:[#allocation45_spill] sm:$0xff] }
 0x277   :  { %v6727_v57 = vpop.f32.mrf.mxu0  ;;  %v6729_v54 = vpop.f32.mrf.mxu1 }
 0x278   :  { %8200 = vst [vmem:[#allocation299_spill] sm:$0xff] %v6727_v57  ;;  %8201 = vst [vmem:[#allocation300_spill] sm:$0xff] %v6729_v54 }
 0x279   :  { %v6731_v53 = vpop.f32.mrf.mxu0  ;;  %v6733_v40 = vpop.f32.mrf.mxu1 }
 0x27a   :  { %8202 = vst [vmem:[#allocation301_spill] sm:$0xff] %v6731_v53  ;;  %8203 = vst [vmem:[#allocation302_spill] sm:$0xff] %v6733_v40 }
 0x27b   :  { %v6735_v38 = vpop.f32.mrf.mxu0  ;;  %v6737_v37 = vpop.f32.mrf.mxu1 }
 0x27c   :  { %8204 = vst [vmem:[#allocation303_spill] sm:$0xff] %v6735_v38  ;;  %8205 = vst [vmem:[#allocation304_spill] sm:$0xff] %v6737_v37 }
 0x27d   :  { %v6739_v39 = vpop.f32.mrf.mxu0  ;;  %2474 = vmatmul.mubr.bf16.gmra.mxu0 %v8207_v12  ;;  %v6742_v42 = vpop.f32.mrf.mxu1  ;;  %2827 = vmatmul.mubr.bf16.gmra.mxu1 %v8207_v12 }
 0x27e   :  { %8206 = vst [vmem:[#allocation305_spill] sm:$0xff] %v6739_v39  ;;  %8208 = vst [vmem:[#allocation306_spill] sm:$0xff] %v6742_v42  ;;  %2483 = vmatprep.mubr.bf16.mxu0 %v8209_v7  ;;  %2836 = vmatprep.mubr.bf16.mxu1 %v8209_v7  ;;  %v8217_v42 = vld [vmem:[#allocation54_spill] sm:$0xff]  ;;  %v8219_v7 = vld [vmem:[#allocation55_spill] sm:$0xff] }
 0x27f   :  { %v6747_v54 = vpop.f32.mrf.mxu0  ;;  %v6749_v53 = vpop.f32.mrf.mxu1 }
 0x280   :  { %8210 = vst [vmem:[#allocation307_spill] sm:$0xff] %v6747_v54  ;;  %8211 = vst [vmem:[#allocation308_spill] sm:$0xff] %v6749_v53 }
 0x281   :  { %v6751_v40 = vpop.f32.mrf.mxu0  ;;  %v6753_v38 = vpop.f32.mrf.mxu1 }
 0x282   :  { %8212 = vst [vmem:[#allocation309_spill] sm:$0xff] %v6751_v40  ;;  %8213 = vst [vmem:[#allocation310_spill] sm:$0xff] %v6753_v38 }
 0x283   :  { %v6755_v37 = vpop.f32.mrf.mxu0  ;;  %v6757_v39 = vpop.f32.mrf.mxu1 }
 0x284   :  { %8214 = vst [vmem:[#allocation311_spill] sm:$0xff] %v6755_v37  ;;  %8215 = vst [vmem:[#allocation312_spill] sm:$0xff] %v6757_v39 }
 0x285   :  { %v6759_v57 = vpop.f32.mrf.mxu0  ;;  %2484 = vmatmul.mubr.bf16.gmra.mxu0 %v8217_v42  ;;  %v6762_v12 = vpop.f32.mrf.mxu1  ;;  %2837 = vmatmul.mubr.bf16.gmra.mxu1 %v8217_v42 }
 0x286   :  { %8216 = vst [vmem:[#allocation313_spill] sm:$0xff] %v6759_v57  ;;  %8218 = vst [vmem:[#allocation314_spill] sm:$0xff] %v6762_v12  ;;  %2493 = vmatprep.mubr.bf16.mxu0 %v8219_v7  ;;  %2846 = vmatprep.mubr.bf16.mxu1 %v8219_v7  ;;  %v8227_v12 = vld [vmem:[#allocation64_spill] sm:$0xff]  ;;  %v8229_v7 = vld [vmem:[#allocation65_spill] sm:$0xff] }
 0x287   :  { %v6767_v53 = vpop.f32.mrf.mxu0  ;;  %v6769_v40 = vpop.f32.mrf.mxu1 }
 0x288   :  { %8220 = vst [vmem:[#allocation315_spill] sm:$0xff] %v6767_v53  ;;  %8221 = vst [vmem:[#allocation316_spill] sm:$0xff] %v6769_v40 }
 0x289   :  { %v6771_v38 = vpop.f32.mrf.mxu0  ;;  %v6773_v37 = vpop.f32.mrf.mxu1 }
 0x28a   :  { %8222 = vst [vmem:[#allocation317_spill] sm:$0xff] %v6771_v38  ;;  %8223 = vst [vmem:[#allocation318_spill] sm:$0xff] %v6773_v37 }
 0x28b   :  { %v6775_v39 = vpop.f32.mrf.mxu0  ;;  %v6777_v57 = vpop.f32.mrf.mxu1 }
 0x28c   :  { %8224 = vst [vmem:[#allocation319_spill] sm:$0xff] %v6775_v39  ;;  %8225 = vst [vmem:[#allocation320_spill] sm:$0xff] %v6777_v57 }
 0x28d   :  { %v6779_v54 = vpop.f32.mrf.mxu0  ;;  %2494 = vmatmul.mubr.bf16.gmra.mxu0 %v8227_v12  ;;  %v6782_v42 = vpop.f32.mrf.mxu1  ;;  %2847 = vmatmul.mubr.bf16.gmra.mxu1 %v8227_v12 }
 0x28e   :  { %8226 = vst [vmem:[#allocation321_spill] sm:$0xff] %v6779_v54  ;;  %8228 = vst [vmem:[#allocation322_spill] sm:$0xff] %v6782_v42  ;;  %2503 = vmatprep.mubr.bf16.mxu0 %v8229_v7  ;;  %2856 = vmatprep.mubr.bf16.mxu1 %v8229_v7  ;;  %v8237_v42 = vld [vmem:[#allocation74_spill] sm:$0xff]  ;;  %v8239_v7 = vld [vmem:[#allocation75_spill] sm:$0xff] }
 0x28f   :  { %v6787_v40 = vpop.f32.mrf.mxu0  ;;  %v6789_v38 = vpop.f32.mrf.mxu1 }
 0x290   :  { %8230 = vst [vmem:[#allocation323_spill] sm:$0xff] %v6787_v40  ;;  %8231 = vst [vmem:[#allocation324_spill] sm:$0xff] %v6789_v38 }
 0x291   :  { %v6791_v37 = vpop.f32.mrf.mxu0  ;;  %v6793_v39 = vpop.f32.mrf.mxu1 }
 0x292   :  { %8232 = vst [vmem:[#allocation325_spill] sm:$0xff] %v6791_v37  ;;  %8233 = vst [vmem:[#allocation326_spill] sm:$0xff] %v6793_v39 }
 0x293   :  { %v6795_v57 = vpop.f32.mrf.mxu0  ;;  %v6797_v54 = vpop.f32.mrf.mxu1 }
 0x294   :  { %8234 = vst [vmem:[#allocation327_spill] sm:$0xff] %v6795_v57  ;;  %8235 = vst [vmem:[#allocation328_spill] sm:$0xff] %v6797_v54 }
 0x295   :  { %v6799_v53 = vpop.f32.mrf.mxu0  ;;  %2504 = vmatmul.mubr.bf16.gmra.mxu0 %v8237_v42  ;;  %v6802_v12 = vpop.f32.mrf.mxu1  ;;  %2857 = vmatmul.mubr.bf16.gmra.mxu1 %v8237_v42 }
 0x296   :  { %8236 = vst [vmem:[#allocation329_spill] sm:$0xff] %v6799_v53  ;;  %8238 = vst [vmem:[#allocation330_spill] sm:$0xff] %v6802_v12  ;;  %2513 = vmatprep.mubr.bf16.mxu0 %v8239_v7  ;;  %2866 = vmatprep.mubr.bf16.mxu1 %v8239_v7  ;;  %v8247_v12 = vld [vmem:[#allocation84_spill] sm:$0xff]  ;;  %v8249_v7 = vld [vmem:[#allocation15_spill] sm:$0xff] }
 0x297   :  { %v6807_v38 = vpop.f32.mrf.mxu0  ;;  %v6809_v37 = vpop.f32.mrf.mxu1 }
 0x298   :  { %8240 = vst [vmem:[#allocation331_spill] sm:$0xff] %v6807_v38  ;;  %8241 = vst [vmem:[#allocation332_spill] sm:$0xff] %v6809_v37 }
 0x299   :  { %v6811_v39 = vpop.f32.mrf.mxu0  ;;  %v6813_v57 = vpop.f32.mrf.mxu1 }
 0x29a   :  { %8242 = vst [vmem:[#allocation333_spill] sm:$0xff] %v6811_v39  ;;  %8243 = vst [vmem:[#allocation334_spill] sm:$0xff] %v6813_v57 }
 0x29b   :  { %v6815_v54 = vpop.f32.mrf.mxu0  ;;  %v6817_v53 = vpop.f32.mrf.mxu1 }
 0x29c   :  { %8244 = vst [vmem:[#allocation335_spill] sm:$0xff] %v6815_v54  ;;  %8245 = vst [vmem:[#allocation336_spill] sm:$0xff] %v6817_v53 }
 0x29d   :  { %v6819_v40 = vpop.f32.mrf.mxu0  ;;  %2514 = vmatmul.mubr.bf16.gmra.mxu0 %v8247_v12  ;;  %v6822_v42 = vpop.f32.mrf.mxu1  ;;  %2867 = vmatmul.mubr.bf16.gmra.mxu1 %v8247_v12  ;;  %v8258_v12 = vld [vmem:[#allocation16_spill] sm:$0xff] }
 0x29e   :  { %8246 = vst [vmem:[#allocation337_spill] sm:$0xff] %v6819_v40  ;;  %8248 = vst [vmem:[#allocation338_spill] sm:$0xff] %v6822_v42  ;;  %3293 = vmatprep.mubr.bf16.mxu0 %v8249_v7  ;;  %3646 = vmatprep.mubr.bf16.mxu1 %v8249_v7  ;;  %v8259_v7 = vld [vmem:[#allocation17_spill] sm:$0xff] }
 0x29f   :  { %v6827_v37 = vpop.f32.mrf.mxu0  ;;  %v6829_v39 = vpop.f32.mrf.mxu1 }
 0x2a0   :  { %8250 = vst [vmem:[#allocation15_spill] sm:$0xff] %v6827_v37  ;;  %8251 = vst [vmem:[#allocation339_spill] sm:$0xff] %v6829_v39 }
 0x2a1   :  { %v6831_v57 = vpop.f32.mrf.mxu0  ;;  %v6833_v54 = vpop.f32.mrf.mxu1 }
 0x2a2   :  { %8252 = vst [vmem:[#allocation340_spill] sm:$0xff] %v6831_v57  ;;  %8253 = vst [vmem:[#allocation341_spill] sm:$0xff] %v6833_v54 }
 0x2a3   :  { %v6835_v53 = vpop.f32.mrf.mxu0  ;;  %v6837_v40 = vpop.f32.mrf.mxu1 }
 0x2a4   :  { %8254 = vst [vmem:[#allocation342_spill] sm:$0xff] %v6835_v53  ;;  %8255 = vst [vmem:[#allocation343_spill] sm:$0xff] %v6837_v40 }
 0x2a5   :  { %v6839_v38 = vpop.f32.mrf.mxu0  ;;  %v6841_v42 = vpop.f32.mrf.mxu1  ;;  %3294 = vmatmul.mubr.bf16.vlgmr.msra.gmra.mxu0 %v8258_v12  ;;  %3647 = vmatmul.mubr.bf16.vlgmr.msra.gmra.mxu1 %v8258_v12 }
 0x2a6   :  { %8256 = vst [vmem:[#allocation344_spill] sm:$0xff] %v6839_v38  ;;  %8257 = vst [vmem:[#allocation345_spill] sm:$0xff] %v6841_v42  ;;  %3303 = vmatprep.mubr.bf16.mxu0 %v8259_v7  ;;  %3656 = vmatprep.mubr.bf16.mxu1 %v8259_v7 }
 0x2a7   :  { %v6847_v39 = vpop.f32.mrf.mxu0  ;;  %v6849_v57 = vpop.f32.mrf.mxu1 }
 0x2a9   :  { %v6851_v54 = vpop.f32.mrf.mxu0  ;;  %v6853_v53 = vpop.f32.mrf.mxu1 }
 0x2aa   :  { %8260 = vst [vmem:[#allocation16_spill] sm:$0xff] %v6851_v54  ;;  %8261 = vst [vmem:[#allocation17_spill] sm:$0xff] %v6853_v53 }
 0x2ab   :  { %v6855_v40 = vpop.f32.mrf.mxu0  ;;  %v6857_v38 = vpop.f32.mrf.mxu1 }
 0x2ac   :  { %8262 = vst [vmem:[#allocation346_spill] sm:$0xff] %v6855_v40  ;;  %8263 = vst [vmem:[#allocation347_spill] sm:$0xff] %v6857_v38 }
 0x2ad   :  { %v6859_v42 = vpop.f32.mrf.mxu0  ;;  %v6861_v37 = vpop.f32.mrf.mxu1  ;;  %3304 = vmatmul.mubr.bf16.gmra.mxu0 %v5752_v47  ;;  %3657 = vmatmul.mubr.bf16.gmra.mxu1 %v5752_v47 }
 0x2ae   :  { %8264 = vst [vmem:[#allocation348_spill] sm:$0xff] %v6859_v42  ;;  %8265 = vst [vmem:[#allocation349_spill] sm:$0xff] %v6861_v37  ;;  %3313 = vmatprep.mubr.bf16.mxu0 %v5761_v50  ;;  %3666 = vmatprep.mubr.bf16.mxu1 %v5761_v50 }
 0x2af   :  { %v6867_v12 = vpop.f32.mrf.mxu0  ;;  %v6869_v7 = vpop.f32.mrf.mxu1 }
 0x2b1   :  { %v6871_v53 = vpop.f32.mrf.mxu0  ;;  %v6873_v40 = vpop.f32.mrf.mxu1 }
 0x2b2   :  { %8266 = vst [vmem:[#allocation350_spill] sm:$0xff] %v6871_v53  ;;  %8267 = vst [vmem:[#allocation351_spill] sm:$0xff] %v6873_v40 }
 0x2b3   :  { %v6875_v38 = vpop.f32.mrf.mxu0  ;;  %v6877_v42 = vpop.f32.mrf.mxu1 }
 0x2b4   :  { %8268 = vst [vmem:[#allocation352_spill] sm:$0xff] %v6875_v38  ;;  %8269 = vst [vmem:[#allocation353_spill] sm:$0xff] %v6877_v42 }
 0x2b5   :  { %v6879_v37 = vpop.f32.mrf.mxu0  ;;  %v6881_v54 = vpop.f32.mrf.mxu1  ;;  %3314 = vmatmul.mubr.bf16.gmra.mxu0 %v5777_v4  ;;  %3667 = vmatmul.mubr.bf16.gmra.mxu1 %v5777_v4 }
 0x2b6   :  { %8270 = vst [vmem:[#allocation354_spill] sm:$0xff] %v6879_v37  ;;  %8271 = vst [vmem:[#allocation355_spill] sm:$0xff] %v6881_v54  ;;  %3323 = vmatprep.mubr.bf16.mxu0 %v5781_v17  ;;  %3676 = vmatprep.mubr.bf16.mxu1 %v5781_v17 }
 0x2b7   :  { %v6887_v47 = vpop.f32.mrf.mxu0  ;;  %v6889_v50 = vpop.f32.mrf.mxu1 }
 0x2b9   :  { %v6891_v40 = vpop.f32.mrf.mxu0  ;;  %v6893_v38 = vpop.f32.mrf.mxu1 }
 0x2ba   :  { %8272 = vst [vmem:[#allocation356_spill] sm:$0xff] %v6891_v40  ;;  %8273 = vst [vmem:[#allocation357_spill] sm:$0xff] %v6893_v38 }
 0x2bb   :  { %v6895_v42 = vpop.f32.mrf.mxu0  ;;  %v6897_v37 = vpop.f32.mrf.mxu1 }
 0x2bc   :  { %8274 = vst [vmem:[#allocation358_spill] sm:$0xff] %v6895_v42  ;;  %8275 = vst [vmem:[#allocation359_spill] sm:$0xff] %v6897_v37 }
 0x2bd   :  { %v6899_v54 = vpop.f32.mrf.mxu0  ;;  %v6901_v53 = vpop.f32.mrf.mxu1  ;;  %3324 = vmatmul.mubr.bf16.gmra.mxu0 %v5803_v23  ;;  %3677 = vmatmul.mubr.bf16.gmra.mxu1 %v5803_v23 }
 0x2be   :  { %8276 = vst [vmem:[#allocation360_spill] sm:$0xff] %v6899_v54  ;;  %8277 = vst [vmem:[#allocation361_spill] sm:$0xff] %v6901_v53  ;;  %3333 = vmatprep.mubr.bf16.mxu0 %v5809_v34  ;;  %3686 = vmatprep.mubr.bf16.mxu1 %v5809_v34 }
 0x2bf   :  { %v6907_v4 = vpop.f32.mrf.mxu0  ;;  %v6909_v17 = vpop.f32.mrf.mxu1 }
 0x2c1   :  { %v6911_v38 = vpop.f32.mrf.mxu0  ;;  %v6913_v42 = vpop.f32.mrf.mxu1 }
 0x2c2   :  { %8278 = vst [vmem:[#allocation362_spill] sm:$0xff] %v6911_v38  ;;  %8279 = vst [vmem:[#allocation363_spill] sm:$0xff] %v6913_v42 }
 0x2c3   :  { %v6915_v37 = vpop.f32.mrf.mxu0  ;;  %v6917_v54 = vpop.f32.mrf.mxu1 }
 0x2c4   :  { %8280 = vst [vmem:[#allocation364_spill] sm:$0xff] %v6915_v37  ;;  %8281 = vst [vmem:[#allocation365_spill] sm:$0xff] %v6917_v54 }
 0x2c5   :  { %v6919_v53 = vpop.f32.mrf.mxu0  ;;  %v6921_v40 = vpop.f32.mrf.mxu1  ;;  %3334 = vmatmul.mubr.bf16.gmra.mxu0 %v5841_v46  ;;  %3687 = vmatmul.mubr.bf16.gmra.mxu1 %v5841_v46 }
 0x2c6   :  { %8282 = vst [vmem:[#allocation366_spill] sm:$0xff] %v6919_v53  ;;  %8283 = vst [vmem:[#allocation367_spill] sm:$0xff] %v6921_v40  ;;  %3343 = vmatprep.mubr.bf16.mxu0 %v5847_v49  ;;  %3696 = vmatprep.mubr.bf16.mxu1 %v5847_v49 }
 0x2c7   :  { %v6927_v23 = vpop.f32.mrf.mxu0  ;;  %v6929_v34 = vpop.f32.mrf.mxu1 }
 0x2c9   :  { %v6931_v42 = vpop.f32.mrf.mxu0  ;;  %v6933_v37 = vpop.f32.mrf.mxu1 }
 0x2ca   :  { %8284 = vst [vmem:[#allocation368_spill] sm:$0xff] %v6931_v42  ;;  %8285 = vst [vmem:[#allocation369_spill] sm:$0xff] %v6933_v37 }
 0x2cb   :  { %v6935_v54 = vpop.f32.mrf.mxu0  ;;  %v6937_v53 = vpop.f32.mrf.mxu1 }
 0x2cc   :  { %8286 = vst [vmem:[#allocation370_spill] sm:$0xff] %v6935_v54  ;;  %8287 = vst [vmem:[#allocation371_spill] sm:$0xff] %v6937_v53 }
 0x2cd   :  { %v6939_v40 = vpop.f32.mrf.mxu0  ;;  %v6941_v38 = vpop.f32.mrf.mxu1  ;;  %3344 = vmatmul.mubr.bf16.gmra.mxu0 %v5857_v63  ;;  %3697 = vmatmul.mubr.bf16.gmra.mxu1 %v5857_v63 }
 0x2ce   :  { %8288 = vst [vmem:[#allocation372_spill] sm:$0xff] %v6939_v40  ;;  %8289 = vst [vmem:[#allocation373_spill] sm:$0xff] %v6941_v38  ;;  %3353 = vmatprep.mubr.bf16.mxu0 %v5859_v30  ;;  %3706 = vmatprep.mubr.bf16.mxu1 %v5859_v30 }
 0x2cf   :  { %v6947_v46 = vpop.f32.mrf.mxu0  ;;  %v6949_v49 = vpop.f32.mrf.mxu1 }
 0x2d1   :  { %v6951_v37 = vpop.f32.mrf.mxu0  ;;  %v6953_v54 = vpop.f32.mrf.mxu1 }
 0x2d2   :  { %8290 = vst [vmem:[#allocation374_spill] sm:$0xff] %v6951_v37  ;;  %8291 = vst [vmem:[#allocation375_spill] sm:$0xff] %v6953_v54 }
 0x2d3   :  { %v6955_v53 = vpop.f32.mrf.mxu0  ;;  %v6957_v40 = vpop.f32.mrf.mxu1 }
 0x2d4   :  { %8292 = vst [vmem:[#allocation376_spill] sm:$0xff] %v6955_v53  ;;  %8293 = vst [vmem:[#allocation377_spill] sm:$0xff] %v6957_v40 }
 0x2d5   :  { %v6959_v38 = vpop.f32.mrf.mxu0  ;;  %v6961_v42 = vpop.f32.mrf.mxu1  ;;  %3354 = vmatmul.mubr.bf16.gmra.mxu0 %v5865_v29  ;;  %3707 = vmatmul.mubr.bf16.gmra.mxu1 %v5865_v29 }
 0x2d6   :  { %8294 = vst [vmem:[#allocation378_spill] sm:$0xff] %v6959_v38  ;;  %8295 = vst [vmem:[#allocation379_spill] sm:$0xff] %v6961_v42  ;;  %3363 = vmatprep.mubr.bf16.mxu0 %v5867_v2  ;;  %3716 = vmatprep.mubr.bf16.mxu1 %v5867_v2 }
 0x2d7   :  { %v6967_v63 = vpop.f32.mrf.mxu0  ;;  %v6969_v30 = vpop.f32.mrf.mxu1 }
 0x2d9   :  { %v6971_v54 = vpop.f32.mrf.mxu0  ;;  %v6973_v53 = vpop.f32.mrf.mxu1 }
 0x2da   :  { %8296 = vst [vmem:[#allocation380_spill] sm:$0xff] %v6971_v54  ;;  %8297 = vst [vmem:[#allocation381_spill] sm:$0xff] %v6973_v53 }
 0x2db   :  { %v6975_v40 = vpop.f32.mrf.mxu0  ;;  %v6977_v38 = vpop.f32.mrf.mxu1 }
 0x2dc   :  { %8298 = vst [vmem:[#allocation382_spill] sm:$0xff] %v6975_v40  ;;  %8299 = vst [vmem:[#allocation383_spill] sm:$0xff] %v6977_v38 }
 0x2dd   :  { %v6979_v42 = vpop.f32.mrf.mxu0  ;;  %v6981_v37 = vpop.f32.mrf.mxu1  ;;  %3364 = vmatmul.mubr.bf16.gmra.mxu0 %v5873_v1  ;;  %3717 = vmatmul.mubr.bf16.gmra.mxu1 %v5873_v1 }
 0x2de   :  { %8300 = vst [vmem:[#allocation384_spill] sm:$0xff] %v6979_v42  ;;  %8301 = vst [vmem:[#allocation385_spill] sm:$0xff] %v6981_v37  ;;  %3373 = vmatprep.mubr.bf16.mxu0 %v5875_v20  ;;  %3726 = vmatprep.mubr.bf16.mxu1 %v5875_v20 }
 0x2df   :  { %v6987_v29 = vpop.f32.mrf.mxu0  ;;  %v6989_v2 = vpop.f32.mrf.mxu1 }
 0x2e1   :  { %v6991_v53 = vpop.f32.mrf.mxu0  ;;  %v6993_v40 = vpop.f32.mrf.mxu1 }
 0x2e2   :  { %8302 = vst [vmem:[#allocation386_spill] sm:$0xff] %v6991_v53  ;;  %8303 = vst [vmem:[#allocation387_spill] sm:$0xff] %v6993_v40 }
 0x2e3   :  { %v6995_v38 = vpop.f32.mrf.mxu0  ;;  %v6997_v42 = vpop.f32.mrf.mxu1 }
 0x2e4   :  { %8304 = vst [vmem:[#allocation388_spill] sm:$0xff] %v6995_v38  ;;  %8305 = vst [vmem:[#allocation389_spill] sm:$0xff] %v6997_v42 }
 0x2e5   :  { %v6999_v37 = vpop.f32.mrf.mxu0  ;;  %v7001_v54 = vpop.f32.mrf.mxu1  ;;  %3374 = vmatmul.mubr.bf16.gmra.mxu0 %v5881_v22  ;;  %3727 = vmatmul.mubr.bf16.gmra.mxu1 %v5881_v22 }
 0x2e6   :  { %8306 = vst [vmem:[#allocation390_spill] sm:$0xff] %v6999_v37  ;;  %8307 = vst [vmem:[#allocation391_spill] sm:$0xff] %v7001_v54  ;;  %3383 = vmatprep.mubr.bf16.mxu0 %v5883_v6  ;;  %3736 = vmatprep.mubr.bf16.mxu1 %v5883_v6 }
 0x2e7   :  { %v7007_v1 = vpop.f32.mrf.mxu0  ;;  %v7009_v20 = vpop.f32.mrf.mxu1 }
 0x2e9   :  { %v7011_v40 = vpop.f32.mrf.mxu0  ;;  %v7013_v38 = vpop.f32.mrf.mxu1 }
 0x2ea   :  { %8308 = vst [vmem:[#allocation392_spill] sm:$0xff] %v7011_v40  ;;  %8309 = vst [vmem:[#allocation393_spill] sm:$0xff] %v7013_v38 }
 0x2eb   :  { %v7015_v42 = vpop.f32.mrf.mxu0  ;;  %v7017_v37 = vpop.f32.mrf.mxu1 }
 0x2ec   :  { %8310 = vst [vmem:[#allocation394_spill] sm:$0xff] %v7015_v42  ;;  %8311 = vst [vmem:[#allocation395_spill] sm:$0xff] %v7017_v37 }
 0x2ed   :  { %v7019_v54 = vpop.f32.mrf.mxu0  ;;  %v7021_v53 = vpop.f32.mrf.mxu1  ;;  %3384 = vmatmul.mubr.bf16.gmra.mxu0 %v5889_v35  ;;  %3737 = vmatmul.mubr.bf16.gmra.mxu1 %v5889_v35 }
 0x2ee   :  { %8312 = vst [vmem:[#allocation396_spill] sm:$0xff] %v7019_v54  ;;  %8313 = vst [vmem:[#allocation397_spill] sm:$0xff] %v7021_v53  ;;  %3393 = vmatprep.mubr.bf16.mxu0 %v5891_v24  ;;  %3746 = vmatprep.mubr.bf16.mxu1 %v5891_v24 }
 0x2ef   :  { %v7027_v22 = vpop.f32.mrf.mxu0  ;;  %v7029_v6 = vpop.f32.mrf.mxu1 }
 0x2f1   :  { %v7031_v38 = vpop.f32.mrf.mxu0  ;;  %v7033_v42 = vpop.f32.mrf.mxu1 }
 0x2f2   :  { %8314 = vst [vmem:[#allocation398_spill] sm:$0xff] %v7031_v38  ;;  %8315 = vst [vmem:[#allocation399_spill] sm:$0xff] %v7033_v42 }
 0x2f3   :  { %v7035_v37 = vpop.f32.mrf.mxu0  ;;  %v7037_v54 = vpop.f32.mrf.mxu1 }
 0x2f4   :  { %8316 = vst [vmem:[#allocation400_spill] sm:$0xff] %v7035_v37  ;;  %8317 = vst [vmem:[#allocation401_spill] sm:$0xff] %v7037_v54 }
 0x2f5   :  { %v7039_v53 = vpop.f32.mrf.mxu0  ;;  %v7041_v40 = vpop.f32.mrf.mxu1  ;;  %3394 = vmatmul.mubr.bf16.gmra.mxu0 %v5897_v8  ;;  %3747 = vmatmul.mubr.bf16.gmra.mxu1 %v5897_v8 }
 0x2f6   :  { %8318 = vst [vmem:[#allocation402_spill] sm:$0xff] %v7039_v53  ;;  %8319 = vst [vmem:[#allocation403_spill] sm:$0xff] %v7041_v40  ;;  %3403 = vmatprep.mubr.bf16.mxu0 %v5899_v25  ;;  %3756 = vmatprep.mubr.bf16.mxu1 %v5899_v25 }
 0x2f7   :  { %v7047_v35 = vpop.f32.mrf.mxu0  ;;  %v7049_v24 = vpop.f32.mrf.mxu1 }
 0x2f9   :  { %v7051_v42 = vpop.f32.mrf.mxu0  ;;  %v7053_v37 = vpop.f32.mrf.mxu1 }
 0x2fa   :  { %8320 = vst [vmem:[#allocation404_spill] sm:$0xff] %v7051_v42  ;;  %8321 = vst [vmem:[#allocation405_spill] sm:$0xff] %v7053_v37 }
 0x2fb   :  { %v7055_v54 = vpop.f32.mrf.mxu0  ;;  %v7057_v53 = vpop.f32.mrf.mxu1 }
 0x2fc   :  { %8322 = vst [vmem:[#allocation406_spill] sm:$0xff] %v7055_v54  ;;  %8323 = vst [vmem:[#allocation407_spill] sm:$0xff] %v7057_v53 }
 0x2fd   :  { %v7059_v40 = vpop.f32.mrf.mxu0  ;;  %v7061_v38 = vpop.f32.mrf.mxu1  ;;  %3404 = vmatmul.mubr.bf16.gmra.mxu0 %v5905_v43  ;;  %3757 = vmatmul.mubr.bf16.gmra.mxu1 %v5905_v43 }
 0x2fe   :  { %8324 = vst [vmem:[#allocation408_spill] sm:$0xff] %v7059_v40  ;;  %8325 = vst [vmem:[#allocation409_spill] sm:$0xff] %v7061_v38  ;;  %3413 = vmatprep.mubr.bf16.mxu0 %v5907_v26  ;;  %3766 = vmatprep.mubr.bf16.mxu1 %v5907_v26 }
 0x2ff   :  { %v7067_v8 = vpop.f32.mrf.mxu0  ;;  %v7069_v25 = vpop.f32.mrf.mxu1 }
 0x301   :  { %v7071_v37 = vpop.f32.mrf.mxu0  ;;  %v7073_v54 = vpop.f32.mrf.mxu1 }
 0x302   :  { %8326 = vst [vmem:[#allocation410_spill] sm:$0xff] %v7071_v37  ;;  %8327 = vst [vmem:[#allocation411_spill] sm:$0xff] %v7073_v54 }
 0x303   :  { %v7075_v53 = vpop.f32.mrf.mxu0  ;;  %v7077_v40 = vpop.f32.mrf.mxu1 }
 0x304   :  { %8328 = vst [vmem:[#allocation412_spill] sm:$0xff] %v7075_v53  ;;  %8329 = vst [vmem:[#allocation413_spill] sm:$0xff] %v7077_v40 }
 0x305   :  { %v7079_v38 = vpop.f32.mrf.mxu0  ;;  %v7081_v42 = vpop.f32.mrf.mxu1  ;;  %3414 = vmatmul.mubr.bf16.gmra.mxu0 %v5913_v36  ;;  %3767 = vmatmul.mubr.bf16.gmra.mxu1 %v5913_v36 }
 0x306   :  { %8330 = vst [vmem:[#allocation414_spill] sm:$0xff] %v7079_v38  ;;  %8331 = vst [vmem:[#allocation415_spill] sm:$0xff] %v7081_v42  ;;  %3423 = vmatprep.mubr.bf16.mxu0 %v5915_v41  ;;  %3776 = vmatprep.mubr.bf16.mxu1 %v5915_v41 }
 0x307   :  { %v7087_v43 = vpop.f32.mrf.mxu0  ;;  %v7089_v26 = vpop.f32.mrf.mxu1 }
 0x309   :  { %v7091_v54 = vpop.f32.mrf.mxu0  ;;  %v7093_v53 = vpop.f32.mrf.mxu1 }
 0x30a   :  { %8332 = vst [vmem:[#allocation416_spill] sm:$0xff] %v7091_v54  ;;  %8333 = vst [vmem:[#allocation417_spill] sm:$0xff] %v7093_v53 }
 0x30b   :  { %v7095_v40 = vpop.f32.mrf.mxu0  ;;  %v7097_v38 = vpop.f32.mrf.mxu1 }
 0x30c   :  { %8334 = vst [vmem:[#allocation418_spill] sm:$0xff] %v7095_v40  ;;  %8335 = vst [vmem:[#allocation419_spill] sm:$0xff] %v7097_v38 }
 0x30d   :  { %v7099_v42 = vpop.f32.mrf.mxu0  ;;  %v7101_v37 = vpop.f32.mrf.mxu1  ;;  %3424 = vmatmul.mubr.bf16.gmra.mxu0 %v5921_v45  ;;  %3777 = vmatmul.mubr.bf16.gmra.mxu1 %v5921_v45 }
 0x30e   :  { %8336 = vst [vmem:[#allocation420_spill] sm:$0xff] %v7099_v42  ;;  %8337 = vst [vmem:[#allocation421_spill] sm:$0xff] %v7101_v37  ;;  %3433 = vmatprep.mubr.bf16.mxu0 %v5923_v13  ;;  %3786 = vmatprep.mubr.bf16.mxu1 %v5923_v13 }
 0x30f   :  { %v7107_v36 = vpop.f32.mrf.mxu0  ;;  %v7109_v41 = vpop.f32.mrf.mxu1 }
 0x311   :  { %v7111_v53 = vpop.f32.mrf.mxu0  ;;  %v7113_v40 = vpop.f32.mrf.mxu1 }
 0x312   :  { %8338 = vst [vmem:[#allocation422_spill] sm:$0xff] %v7111_v53  ;;  %8339 = vst [vmem:[#allocation423_spill] sm:$0xff] %v7113_v40 }
 0x313   :  { %v7115_v38 = vpop.f32.mrf.mxu0  ;;  %v7117_v42 = vpop.f32.mrf.mxu1 }
 0x314   :  { %8340 = vst [vmem:[#allocation424_spill] sm:$0xff] %v7115_v38  ;;  %8341 = vst [vmem:[#allocation425_spill] sm:$0xff] %v7117_v42 }
 0x315   :  { %v7119_v37 = vpop.f32.mrf.mxu0  ;;  %v7121_v54 = vpop.f32.mrf.mxu1  ;;  %3434 = vmatmul.mubr.bf16.gmra.mxu0 %v5929_v52  ;;  %3787 = vmatmul.mubr.bf16.gmra.mxu1 %v5929_v52 }
 0x316   :  { %8342 = vst [vmem:[#allocation426_spill] sm:$0xff] %v7119_v37  ;;  %8343 = vst [vmem:[#allocation427_spill] sm:$0xff] %v7121_v54  ;;  %3443 = vmatprep.mubr.bf16.mxu0 %v5931_v48  ;;  %3796 = vmatprep.mubr.bf16.mxu1 %v5931_v48 }
 0x317   :  { %v7127_v45 = vpop.f32.mrf.mxu0  ;;  %v7129_v13 = vpop.f32.mrf.mxu1 }
 0x319   :  { %v7131_v40 = vpop.f32.mrf.mxu0  ;;  %v7133_v38 = vpop.f32.mrf.mxu1 }
 0x31a   :  { %8344 = vst [vmem:[#allocation428_spill] sm:$0xff] %v7131_v40  ;;  %8345 = vst [vmem:[#allocation429_spill] sm:$0xff] %v7133_v38 }
 0x31b   :  { %v7135_v42 = vpop.f32.mrf.mxu0  ;;  %v7137_v37 = vpop.f32.mrf.mxu1 }
 0x31c   :  { %8346 = vst [vmem:[#allocation430_spill] sm:$0xff] %v7135_v42  ;;  %8347 = vst [vmem:[#allocation431_spill] sm:$0xff] %v7137_v37 }
 0x31d   :  { %v7139_v54 = vpop.f32.mrf.mxu0  ;;  %v7141_v53 = vpop.f32.mrf.mxu1  ;;  %3444 = vmatmul.mubr.bf16.gmra.mxu0 %v5937_v61  ;;  %3797 = vmatmul.mubr.bf16.gmra.mxu1 %v5937_v61 }
 0x31e   :  { %8348 = vst [vmem:[#allocation432_spill] sm:$0xff] %v7139_v54  ;;  %8349 = vst [vmem:[#allocation433_spill] sm:$0xff] %v7141_v53  ;;  %3453 = vmatprep.mubr.bf16.mxu0 %v5939_v56  ;;  %3806 = vmatprep.mubr.bf16.mxu1 %v5939_v56 }
 0x31f   :  { %v7147_v52 = vpop.f32.mrf.mxu0  ;;  %v7149_v48 = vpop.f32.mrf.mxu1 }
 0x321   :  { %v7151_v38 = vpop.f32.mrf.mxu0  ;;  %v7153_v42 = vpop.f32.mrf.mxu1 }
 0x322   :  { %8350 = vst [vmem:[#allocation434_spill] sm:$0xff] %v7151_v38  ;;  %8351 = vst [vmem:[#allocation435_spill] sm:$0xff] %v7153_v42 }
 0x323   :  { %v7155_v37 = vpop.f32.mrf.mxu0  ;;  %v7157_v54 = vpop.f32.mrf.mxu1 }
 0x324   :  { %8352 = vst [vmem:[#allocation436_spill] sm:$0xff] %v7155_v37  ;;  %8353 = vst [vmem:[#allocation437_spill] sm:$0xff] %v7157_v54 }
 0x325   :  { %v7159_v53 = vpop.f32.mrf.mxu0  ;;  %v7161_v40 = vpop.f32.mrf.mxu1  ;;  %3454 = vmatmul.mubr.bf16.gmra.mxu0 %v5945_v55  ;;  %3807 = vmatmul.mubr.bf16.gmra.mxu1 %v5945_v55 }
 0x326   :  { %8354 = vst [vmem:[#allocation438_spill] sm:$0xff] %v7159_v53  ;;  %8355 = vst [vmem:[#allocation439_spill] sm:$0xff] %v7161_v40  ;;  %3463 = vmatprep.mubr.bf16.mxu0 %v5947_v10  ;;  %3816 = vmatprep.mubr.bf16.mxu1 %v5947_v10 }
 0x327   :  { %v7167_v61 = vpop.f32.mrf.mxu0  ;;  %v7169_v56 = vpop.f32.mrf.mxu1 }
 0x329   :  { %v7171_v42 = vpop.f32.mrf.mxu0  ;;  %v7173_v37 = vpop.f32.mrf.mxu1 }
 0x32a   :  { %8356 = vst [vmem:[#allocation440_spill] sm:$0xff] %v7171_v42  ;;  %8357 = vst [vmem:[#allocation441_spill] sm:$0xff] %v7173_v37 }
 0x32b   :  { %v7175_v54 = vpop.f32.mrf.mxu0  ;;  %v7177_v53 = vpop.f32.mrf.mxu1 }
 0x32c   :  { %8358 = vst [vmem:[#allocation442_spill] sm:$0xff] %v7175_v54  ;;  %8359 = vst [vmem:[#allocation443_spill] sm:$0xff] %v7177_v53 }
 0x32d   :  { %v7179_v40 = vpop.f32.mrf.mxu0  ;;  %v7181_v38 = vpop.f32.mrf.mxu1  ;;  %3464 = vmatmul.mubr.bf16.gmra.mxu0 %v5953_v62  ;;  %3817 = vmatmul.mubr.bf16.gmra.mxu1 %v5953_v62 }
 0x32e   :  { %8360 = vst [vmem:[#allocation444_spill] sm:$0xff] %v7179_v40  ;;  %8361 = vst [vmem:[#allocation445_spill] sm:$0xff] %v7181_v38  ;;  %3473 = vmatprep.mubr.bf16.mxu0 %v5955_v0  ;;  %3826 = vmatprep.mubr.bf16.mxu1 %v5955_v0 }
 0x32f   :  { %v7187_v55 = vpop.f32.mrf.mxu0  ;;  %v7189_v10 = vpop.f32.mrf.mxu1 }
 0x331   :  { %v7191_v37 = vpop.f32.mrf.mxu0  ;;  %v7193_v54 = vpop.f32.mrf.mxu1 }
 0x332   :  { %8362 = vst [vmem:[#allocation446_spill] sm:$0xff] %v7191_v37  ;;  %8363 = vst [vmem:[#allocation447_spill] sm:$0xff] %v7193_v54 }
 0x333   :  { %v7195_v53 = vpop.f32.mrf.mxu0  ;;  %v7197_v40 = vpop.f32.mrf.mxu1 }
 0x334   :  { %8364 = vst [vmem:[#allocation448_spill] sm:$0xff] %v7195_v53  ;;  %8365 = vst [vmem:[#allocation449_spill] sm:$0xff] %v7197_v40 }
 0x335   :  { %v7199_v38 = vpop.f32.mrf.mxu0  ;;  %v7201_v42 = vpop.f32.mrf.mxu1  ;;  %3474 = vmatmul.mubr.bf16.gmra.mxu0 %v5961_v15  ;;  %3827 = vmatmul.mubr.bf16.gmra.mxu1 %v5961_v15 }
 0x336   :  { %8366 = vst [vmem:[#allocation450_spill] sm:$0xff] %v7199_v38  ;;  %8367 = vst [vmem:[#allocation451_spill] sm:$0xff] %v7201_v42  ;;  %3483 = vmatprep.mubr.bf16.mxu0 %v5963_v16  ;;  %3836 = vmatprep.mubr.bf16.mxu1 %v5963_v16 }
 0x337   :  { %v7207_v62 = vpop.f32.mrf.mxu0  ;;  %v7209_v0 = vpop.f32.mrf.mxu1 }
 0x339   :  { %v7211_v54 = vpop.f32.mrf.mxu0  ;;  %v7213_v53 = vpop.f32.mrf.mxu1 }
 0x33a   :  { %8368 = vst [vmem:[#allocation452_spill] sm:$0xff] %v7211_v54  ;;  %8369 = vst [vmem:[#allocation453_spill] sm:$0xff] %v7213_v53 }
 0x33b   :  { %v7215_v40 = vpop.f32.mrf.mxu0  ;;  %v7217_v38 = vpop.f32.mrf.mxu1 }
 0x33c   :  { %8370 = vst [vmem:[#allocation454_spill] sm:$0xff] %v7215_v40  ;;  %8371 = vst [vmem:[#allocation455_spill] sm:$0xff] %v7217_v38 }
 0x33d   :  { %v7219_v42 = vpop.f32.mrf.mxu0  ;;  %v7221_v37 = vpop.f32.mrf.mxu1  ;;  %3484 = vmatmul.mubr.bf16.gmra.mxu0 %v5969_v59  ;;  %3837 = vmatmul.mubr.bf16.gmra.mxu1 %v5969_v59 }
 0x33e   :  { %8372 = vst [vmem:[#allocation456_spill] sm:$0xff] %v7219_v42  ;;  %8373 = vst [vmem:[#allocation457_spill] sm:$0xff] %v7221_v37  ;;  %3493 = vmatprep.mubr.bf16.mxu0 %v5971_v27  ;;  %3846 = vmatprep.mubr.bf16.mxu1 %v5971_v27 }
 0x33f   :  { %v7227_v15 = vpop.f32.mrf.mxu0  ;;  %v7229_v16 = vpop.f32.mrf.mxu1 }
 0x340   :  { %8374 = vst [vmem:[#allocation458_spill] sm:$0xff] %v7229_v16  ;;  %v8421_v16 = vld [vmem:[#allocation28_spill] sm:$0xff] }
 0x341   :  { %v7231_v53 = vpop.f32.mrf.mxu0  ;;  %v7233_v40 = vpop.f32.mrf.mxu1 }
 0x342   :  { %8375 = vst [vmem:[#allocation459_spill] sm:$0xff] %v7231_v53  ;;  %8376 = vst [vmem:[#allocation460_spill] sm:$0xff] %v7233_v40 }
 0x343   :  { %v7235_v38 = vpop.f32.mrf.mxu0  ;;  %v7237_v42 = vpop.f32.mrf.mxu1 }
 0x344   :  { %8377 = vst [vmem:[#allocation461_spill] sm:$0xff] %v7235_v38  ;;  %8378 = vst [vmem:[#allocation462_spill] sm:$0xff] %v7237_v42 }
 0x345   :  { %v7239_v37 = vpop.f32.mrf.mxu0  ;;  %v7241_v54 = vpop.f32.mrf.mxu1  ;;  %3494 = vmatmul.mubr.bf16.gmra.mxu0 %v5977_v18  ;;  %3847 = vmatmul.mubr.bf16.gmra.mxu1 %v5977_v18 }
 0x346   :  { %8379 = vst [vmem:[#allocation463_spill] sm:$0xff] %v7239_v37  ;;  %8380 = vst [vmem:[#allocation464_spill] sm:$0xff] %v7241_v54  ;;  %3503 = vmatprep.mubr.bf16.mxu0 %v5979_v14  ;;  %3856 = vmatprep.mubr.bf16.mxu1 %v5979_v14 }
 0x347   :  { %v7247_v59 = vpop.f32.mrf.mxu0  ;;  %v7249_v27 = vpop.f32.mrf.mxu1 }
 0x348   :  { %8381 = vst [vmem:[#allocation465_spill] sm:$0xff] %v7247_v59  ;;  %8382 = vst [vmem:[#allocation466_spill] sm:$0xff] %v7249_v27 }
 0x349   :  { %v7251_v40 = vpop.f32.mrf.mxu0  ;;  %v7253_v38 = vpop.f32.mrf.mxu1 }
 0x34a   :  { %8383 = vst [vmem:[#allocation467_spill] sm:$0xff] %v7251_v40  ;;  %8384 = vst [vmem:[#allocation468_spill] sm:$0xff] %v7253_v38 }
 0x34b   :  { %v7255_v42 = vpop.f32.mrf.mxu0  ;;  %v7257_v37 = vpop.f32.mrf.mxu1 }
 0x34c   :  { %8385 = vst [vmem:[#allocation469_spill] sm:$0xff] %v7255_v42  ;;  %8386 = vst [vmem:[#allocation470_spill] sm:$0xff] %v7257_v37 }
 0x34d   :  { %v7259_v54 = vpop.f32.mrf.mxu0  ;;  %v7261_v53 = vpop.f32.mrf.mxu1  ;;  %3504 = vmatmul.mubr.bf16.gmra.mxu0 %v5985_v28  ;;  %3857 = vmatmul.mubr.bf16.gmra.mxu1 %v5985_v28 }
 0x34e   :  { %8387 = vst [vmem:[#allocation471_spill] sm:$0xff] %v7259_v54  ;;  %8388 = vst [vmem:[#allocation472_spill] sm:$0xff] %v7261_v53  ;;  %3513 = vmatprep.mubr.bf16.mxu0 %v5987_v3  ;;  %3866 = vmatprep.mubr.bf16.mxu1 %v5987_v3 }
 0x34f   :  { %v7267_v18 = vpop.f32.mrf.mxu0  ;;  %v7269_v14 = vpop.f32.mrf.mxu1 }
 0x350   :  { %8389 = vst [vmem:[#allocation473_spill] sm:$0xff] %v7267_v18  ;;  %8390 = vst [vmem:[#allocation474_spill] sm:$0xff] %v7269_v14 }
 0x351   :  { %v7271_v38 = vpop.f32.mrf.mxu0  ;;  %v7273_v42 = vpop.f32.mrf.mxu1 }
 0x352   :  { %8391 = vst [vmem:[#allocation475_spill] sm:$0xff] %v7271_v38  ;;  %8392 = vst [vmem:[#allocation476_spill] sm:$0xff] %v7273_v42 }
 0x353   :  { %v7275_v37 = vpop.f32.mrf.mxu0  ;;  %v7277_v54 = vpop.f32.mrf.mxu1 }
 0x354   :  { %8393 = vst [vmem:[#allocation477_spill] sm:$0xff] %v7275_v37  ;;  %8394 = vst [vmem:[#allocation478_spill] sm:$0xff] %v7277_v54 }
 0x355   :  { %v7279_v53 = vpop.f32.mrf.mxu0  ;;  %v7281_v40 = vpop.f32.mrf.mxu1  ;;  %3514 = vmatmul.mubr.bf16.gmra.mxu0 %v5993_v32  ;;  %3867 = vmatmul.mubr.bf16.gmra.mxu1 %v5993_v32 }
 0x356   :  { %8395 = vst [vmem:[#allocation479_spill] sm:$0xff] %v7279_v53  ;;  %8396 = vst [vmem:[#allocation480_spill] sm:$0xff] %v7281_v40  ;;  %3523 = vmatprep.mubr.bf16.mxu0 %v5995_v5  ;;  %3876 = vmatprep.mubr.bf16.mxu1 %v5995_v5 }
 0x357   :  { %v7287_v28 = vpop.f32.mrf.mxu0  ;;  %v7289_v3 = vpop.f32.mrf.mxu1 }
 0x358   :  { %8397 = vst [vmem:[#allocation481_spill] sm:$0xff] %v7287_v28  ;;  %8398 = vst [vmem:[#allocation482_spill] sm:$0xff] %v7289_v3  ;;  %v8413_v28 = vld [vmem:[#allocation20_spill] sm:$0xff] }
 0x359   :  { %v7291_v42 = vpop.f32.mrf.mxu0  ;;  %v7293_v37 = vpop.f32.mrf.mxu1 }
 0x35a   :  { %8399 = vst [vmem:[#allocation483_spill] sm:$0xff] %v7291_v42  ;;  %8400 = vst [vmem:[#allocation484_spill] sm:$0xff] %v7293_v37 }
 0x35b   :  { %v7295_v54 = vpop.f32.mrf.mxu0  ;;  %v7297_v53 = vpop.f32.mrf.mxu1 }
 0x35c   :  { %8401 = vst [vmem:[#allocation485_spill] sm:$0xff] %v7295_v54  ;;  %8402 = vst [vmem:[#allocation486_spill] sm:$0xff] %v7297_v53 }
 0x35d   :  { %v7299_v40 = vpop.f32.mrf.mxu0  ;;  %v7301_v38 = vpop.f32.mrf.mxu1  ;;  %3524 = vmatmul.mubr.bf16.gmra.mxu0 %v6001_v21  ;;  %3877 = vmatmul.mubr.bf16.gmra.mxu1 %v6001_v21  ;;  %v8412_v21 = vld [vmem:[#allocation19_spill] sm:$0xff] }
 0x35e   :  { %8403 = vst [vmem:[#allocation487_spill] sm:$0xff] %v7299_v40  ;;  %8404 = vst [vmem:[#allocation488_spill] sm:$0xff] %v7301_v38  ;;  %3533 = vmatprep.mubr.bf16.mxu0 %v6003_v31  ;;  %3886 = vmatprep.mubr.bf16.mxu1 %v6003_v31  ;;  %v8411_v38 = vld [vmem:[#allocation18_spill] sm:$0xff]  ;;  %v2559_v3 = vadd.f32 %v6682_v44, %v8412_v21  ;;  %v2208_v31 = vadd.f32 %v6687_v11, %v8413_v28  ;;  %v8416_v28 = vld [vmem:[#allocation23_spill] sm:$0xff] }
 0x35f   :  { %v7307_v32 = vpop.f32.mrf.mxu0  ;;  %v7309_v5 = vpop.f32.mrf.mxu1  ;;  %v2206_v42 = vadd.f32 %v6679_v51, %v8411_v38  ;;  %v8415_v51 = vld [vmem:[#allocation22_spill] sm:$0xff]  ;;  %v2563_v21 = vadd.f32 %v6693_v60, %v8416_v28  ;;  %v8422_v60 = vld [vmem:[#allocation289_spill] sm:$0xff] }
 0x360   :  { %8405 = vst [vmem:[#allocation489_spill] sm:$0xff] %v7307_v32  ;;  %8406 = vst [vmem:[#allocation490_spill] sm:$0xff] %v7309_v5  ;;  %v2210_v11 = vadd.f32 %v6691_v58, %v8415_v51  ;;  %v8425_v28 = vld [vmem:[#allocation30_spill] sm:$0xff] }
 0x361   :  { %v7311_v37 = vpop.f32.mrf.mxu0  ;;  %v7313_v54 = vpop.f32.mrf.mxu1 }
 0x362   :  { %8407 = vst [vmem:[#allocation491_spill] sm:$0xff] %v7311_v37  ;;  %8408 = vst [vmem:[#allocation492_spill] sm:$0xff] %v7313_v54  ;;  %v8414_v54 = vld [vmem:[#allocation21_spill] sm:$0xff] }
 0x363   :  { %v7315_v53 = vpop.f32.mrf.mxu0  ;;  %v7317_v40 = vpop.f32.mrf.mxu1 }
 0x364   :  { %8409 = vst [vmem:[#allocation493_spill] sm:$0xff] %v7315_v53  ;;  %8410 = vst [vmem:[#allocation494_spill] sm:$0xff] %v7317_v40  ;;  %v2561_v53 = vadd.f32 %v6689_v19, %v8414_v54  ;;  %v8418_v19 = vld [vmem:[#allocation287_spill] sm:$0xff] }
 0x365   :  { %v3295_v32 = vpop.f32.mrf.mxu0  ;;  %3534 = vmatmul.mubr.bf16.gmra.mxu0 %v6009_v33  ;;  %v3648_v5 = vpop.f32.mrf.mxu1  ;;  %3887 = vmatmul.mubr.bf16.gmra.mxu1 %v6009_v33 }
 0x366   :  { %v3967_v37 = vadd.f32 %v3295_v32, %v2206_v42  ;;  %v3969_v40 = vadd.f32 %v3648_v5, %v2559_v3  ;;  %3543 = vmatprep.mubr.bf16.mxu0 %v6011_v9  ;;  %3896 = vmatprep.mubr.bf16.mxu1 %v6011_v9  ;;  %v8417_v42 = vld [vmem:[#allocation26_spill] sm:$0xff]  ;;  %v8419_v32 = vld [vmem:[#allocation27_spill] sm:$0xff]  ;;  %v8420_v5 = vld [vmem:[#allocation288_spill] sm:$0xff] }
 0x367   :  { %v3297_v38 = vpop.f32.mrf.mxu0  ;;  %v3650_v44 = vpop.f32.mrf.mxu1  ;;  %v2212_v3 = vadd.f32 %v8418_v19, %v8417_v42  ;;  %v2565_v9 = vadd.f32 %v8420_v5, %v8419_v32  ;;  %v8426_v42 = vld [vmem:[#allocation291_spill] sm:$0xff]  ;;  %v8431_v5 = vld [vmem:[#allocation32_spill] sm:$0xff] }
 0x368   :  { %4223 = vst [vmem:[#allocation10] sm:$0xff] %v3967_v37  ;;  %4225 = vst [vmem:[#allocation10 + $0x10] sm:$0xff] %v3969_v40  ;;  %v3968_v33 = vadd.f32 %v3297_v38, %v2208_v31  ;;  %v3970_v14 = vadd.f32 %v3650_v44, %v2561_v53  ;;  %v2216_v37 = vadd.f32 %v8422_v60, %v8421_v16  ;;  %v8423_v40 = vld [vmem:[#allocation29_spill] sm:$0xff]  ;;  %v8424_v31 = vld [vmem:[#allocation290_spill] sm:$0xff] }
 0x369   :  { %v3299_v18 = vpop.f32.mrf.mxu0  ;;  %v3652_v54 = vpop.f32.mrf.mxu1  ;;  %v2569_v53 = vadd.f32 %v8424_v31, %v8423_v40  ;;  %v2218_v19 = vadd.f32 %v8426_v42, %v8425_v28  ;;  %v8434_v60 = vld [vmem:[#allocation294_spill] sm:$0xff] }
 0x36a   :  { %4224 = vst [vmem:[#allocation10 + $0x8] sm:$0xff] %v3968_v33  ;;  %4226 = vst [vmem:[#allocation10 + $0x18] sm:$0xff] %v3970_v14  ;;  %v3971_v27 = vadd.f32 %v3299_v18, %v2210_v11  ;;  %v3973_v59 = vadd.f32 %v3652_v54, %v2563_v21  ;;  %v8427_v33 = vld [vmem:[#allocation24_spill] sm:$0xff]  ;;  %v8428_v14 = vld [vmem:[#allocation31_spill] sm:$0xff] }
 0x36b   :  { %v3301_v58 = vpop.f32.mrf.mxu0  ;;  %v3654_v51 = vpop.f32.mrf.mxu1  ;;  %v8429_v11 = vld [vmem:[#allocation292_spill] sm:$0xff] }
 0x36c   :  { %4227 = vst [vmem:[#allocation10 + $0x20] sm:$0xff] %v3971_v27  ;;  %4229 = vst [vmem:[#allocation10 + $0x30] sm:$0xff] %v3973_v59  ;;  %v3972_v38 = vadd.f32 %v3301_v58, %v2212_v3  ;;  %v3974_v44 = vadd.f32 %v3654_v51, %v2565_v9  ;;  %v2571_v21 = vadd.f32 %v8429_v11, %v8428_v14  ;;  %v8430_v27 = vld [vmem:[#allocation25_spill] sm:$0xff] }
 0x36d   :  { %v3305_v32 = vpop.f32.mrf.mxu0  ;;  %3544 = vmatmul.mubr.bf16.gmra.mxu0 %v8427_v33  ;;  %v3658_v18 = vpop.f32.mrf.mxu1  ;;  %3897 = vmatmul.mubr.bf16.gmra.mxu1 %v8427_v33  ;;  %v8432_v9 = vld [vmem:[#allocation293_spill] sm:$0xff]  ;;  %v8438_v33 = vld [vmem:[#allocation296_spill] sm:$0xff] }
 0x36e   :  { %4228 = vst [vmem:[#allocation10 + $0x28] sm:$0xff] %v3972_v38  ;;  %4230 = vst [vmem:[#allocation10 + $0x38] sm:$0xff] %v3974_v44  ;;  %v3975_v16 = vadd.f32 %v3305_v32, %v2216_v37  ;;  %v3977_v54 = vadd.f32 %v3658_v18, %v2569_v53  ;;  %3553 = vmatprep.mubr.bf16.mxu0 %v8430_v27  ;;  %3906 = vmatprep.mubr.bf16.mxu1 %v8430_v27  ;;  %v8433_v51 = vld [vmem:[#allocation33_spill] sm:$0xff]  ;;  %v8435_v37 = vld [vmem:[#allocation36_spill] sm:$0xff] }
 0x36f   :  { %v3307_v59 = vpop.f32.mrf.mxu0  ;;  %v3660_v3 = vpop.f32.mrf.mxu1  ;;  %v2220_v58 = vadd.f32 %v8432_v9, %v8431_v5  ;;  %v2573_v40 = vadd.f32 %v8434_v60, %v8433_v51  ;;  %v8436_v53 = vld [vmem:[#allocation295_spill] sm:$0xff]  ;;  %v8437_v32 = vld [vmem:[#allocation37_spill] sm:$0xff]  ;;  %v8439_v9 = vld [vmem:[#allocation38_spill] sm:$0xff] }
 0x370   :  { %4231 = vst [vmem:[#allocation10 + $0x40] sm:$0xff] %v3975_v16  ;;  %4233 = vst [vmem:[#allocation10 + $0x50] sm:$0xff] %v3977_v54  ;;  %v3976_v31 = vadd.f32 %v3307_v59, %v2218_v19  ;;  %v3978_v28 = vadd.f32 %v3660_v3, %v2571_v21  ;;  %v2222_v42 = vadd.f32 %v8436_v53, %v8435_v37  ;;  %v8440_v51 = vld [vmem:[#allocation297_spill] sm:$0xff]  ;;  %v8441_v54 = vld [vmem:[#allocation39_spill] sm:$0xff] }
 0x371   :  { %v3309_v38 = vpop.f32.mrf.mxu0  ;;  %v3662_v44 = vpop.f32.mrf.mxu1  ;;  %v2575_v18 = vadd.f32 %v8438_v33, %v8437_v32  ;;  %v2226_v16 = vadd.f32 %v8440_v51, %v8439_v9  ;;  %v8442_v19 = vld [vmem:[#allocation298_spill] sm:$0xff]  ;;  %v8443_v60 = vld [vmem:[#allocation40_spill] sm:$0xff]  ;;  %v8444_v37 = vld [vmem:[#allocation299_spill] sm:$0xff] }
 0x372   :  { %4232 = vst [vmem:[#allocation10 + $0x48] sm:$0xff] %v3976_v31  ;;  %4234 = vst [vmem:[#allocation10 + $0x58] sm:$0xff] %v3978_v28  ;;  %v3979_v14 = vadd.f32 %v3309_v38, %v2220_v58  ;;  %v3981_v11 = vadd.f32 %v3662_v44, %v2573_v40  ;;  %v2579_v21 = vadd.f32 %v8442_v19, %v8441_v54  ;;  %v8445_v31 = vld [vmem:[#allocation34_spill] sm:$0xff]  ;;  %v8446_v40 = vld [vmem:[#allocation41_spill] sm:$0xff] }
 0x373   :  { %v3311_v27 = vpop.f32.mrf.mxu0  ;;  %v3664_v5 = vpop.f32.mrf.mxu1  ;;  %v2228_v53 = vadd.f32 %v8444_v37, %v8443_v60  ;;  %v8447_v28 = vld [vmem:[#allocation300_spill] sm:$0xff]  ;;  %v8451_v9 = vld [vmem:[#allocation43_spill] sm:$0xff]  ;;  %v8452_v51 = vld [vmem:[#allocation302_spill] sm:$0xff] }
 0x374   :  { %4235 = vst [vmem:[#allocation10 + $0x60] sm:$0xff] %v3979_v14  ;;  %4237 = vst [vmem:[#allocation10 + $0x70] sm:$0xff] %v3981_v11  ;;  %v3980_v59 = vadd.f32 %v3311_v27, %v2222_v42  ;;  %v3982_v3 = vadd.f32 %v3664_v5, %v2575_v18  ;;  %v2581_v38 = vadd.f32 %v8447_v28, %v8446_v40  ;;  %v8448_v14 = vld [vmem:[#allocation35_spill] sm:$0xff]  ;;  %v8449_v11 = vld [vmem:[#allocation42_spill] sm:$0xff] }
 0x375   :  { %v3315_v32 = vpop.f32.mrf.mxu0  ;;  %3554 = vmatmul.mubr.bf16.gmra.mxu0 %v8445_v31  ;;  %v3668_v58 = vpop.f32.mrf.mxu1  ;;  %3907 = vmatmul.mubr.bf16.gmra.mxu1 %v8445_v31  ;;  %v8450_v27 = vld [vmem:[#allocation301_spill] sm:$0xff]  ;;  %v2583_v54 = vadd.f32 %v8452_v51, %v8451_v9  ;;  %v8456_v31 = vld [vmem:[#allocation304_spill] sm:$0xff]  ;;  %v8461_v51 = vld [vmem:[#allocation50_spill] sm:$0xff] }
 0x376   :  { %4236 = vst [vmem:[#allocation10 + $0x68] sm:$0xff] %v3980_v59  ;;  %4238 = vst [vmem:[#allocation10 + $0x78] sm:$0xff] %v3982_v3  ;;  %v3983_v44 = vadd.f32 %v3315_v32, %v2226_v16  ;;  %v3985_v33 = vadd.f32 %v3668_v58, %v2579_v21  ;;  %3563 = vmatprep.mubr.bf16.mxu0 %v8448_v14  ;;  %3916 = vmatprep.mubr.bf16.mxu1 %v8448_v14  ;;  %v8453_v16 = vld [vmem:[#allocation46_spill] sm:$0xff]  ;;  %v8454_v21 = vld [vmem:[#allocation303_spill] sm:$0xff] }
 0x377   :  { %v3317_v42 = vpop.f32.mrf.mxu0  ;;  %v3670_v18 = vpop.f32.mrf.mxu1  ;;  %v2230_v5 = vadd.f32 %v8450_v27, %v8449_v11  ;;  %v2232_v37 = vadd.f32 %v8454_v21, %v8453_v16  ;;  %v8455_v32 = vld [vmem:[#allocation47_spill] sm:$0xff]  ;;  %v8457_v27 = vld [vmem:[#allocation48_spill] sm:$0xff]  ;;  %v8458_v9 = vld [vmem:[#allocation305_spill] sm:$0xff] }
 0x378   :  { %4239 = vst [vmem:[#allocation10 + $0x80] sm:$0xff] %v3983_v44  ;;  %4241 = vst [vmem:[#allocation10 + $0x90] sm:$0xff] %v3985_v33  ;;  %v3984_v19 = vadd.f32 %v3317_v42, %v2228_v53  ;;  %v3986_v60 = vadd.f32 %v3670_v18, %v2581_v38  ;;  %v2585_v58 = vadd.f32 %v8456_v31, %v8455_v32  ;;  %v8459_v33 = vld [vmem:[#allocation49_spill] sm:$0xff]  ;;  %v8460_v53 = vld [vmem:[#allocation306_spill] sm:$0xff] }
 0x379   :  { %v3319_v59 = vpop.f32.mrf.mxu0  ;;  %v3672_v3 = vpop.f32.mrf.mxu1  ;;  %v2236_v44 = vadd.f32 %v8458_v9, %v8457_v27  ;;  %v2589_v38 = vadd.f32 %v8460_v53, %v8459_v33  ;;  %v8462_v16 = vld [vmem:[#allocation307_spill] sm:$0xff]  ;;  %v8469_v27 = vld [vmem:[#allocation53_spill] sm:$0xff]  ;;  %v8470_v9 = vld [vmem:[#allocation310_spill] sm:$0xff] }
 0x37a   :  { %4240 = vst [vmem:[#allocation10 + $0x88] sm:$0xff] %v3984_v19  ;;  %4242 = vst [vmem:[#allocation10 + $0x98] sm:$0xff] %v3986_v60  ;;  %v3987_v40 = vadd.f32 %v3319_v59, %v2230_v5  ;;  %v3989_v28 = vadd.f32 %v3672_v3, %v2583_v54  ;;  %v2238_v21 = vadd.f32 %v8462_v16, %v8461_v51  ;;  %v8463_v19 = vld [vmem:[#allocation44_spill] sm:$0xff]  ;;  %v8464_v54 = vld [vmem:[#allocation51_spill] sm:$0xff] }
 0x37b   :  { %v3321_v14 = vpop.f32.mrf.mxu0  ;;  %v3674_v11 = vpop.f32.mrf.mxu1  ;;  %v8465_v60 = vld [vmem:[#allocation308_spill] sm:$0xff]  ;;  %v2593_v33 = vadd.f32 %v8470_v9, %v8469_v27  ;;  %v8476_v27 = vld [vmem:[#allocation313_spill] sm:$0xff] }
 0x37c   :  { %4243 = vst [vmem:[#allocation10 + $0xa0] sm:$0xff] %v3987_v40  ;;  %4245 = vst [vmem:[#allocation10 + $0xb0] sm:$0xff] %v3989_v28  ;;  %v3988_v42 = vadd.f32 %v3321_v14, %v2232_v37  ;;  %v3990_v18 = vadd.f32 %v3674_v11, %v2585_v58  ;;  %v2591_v59 = vadd.f32 %v8465_v60, %v8464_v54  ;;  %v8466_v40 = vld [vmem:[#allocation45_spill] sm:$0xff]  ;;  %v8467_v28 = vld [vmem:[#allocation52_spill] sm:$0xff] }
 0x37d   :  { %v3325_v32 = vpop.f32.mrf.mxu0  ;;  %3564 = vmatmul.mubr.bf16.gmra.mxu0 %v8463_v19  ;;  %v3678_v5 = vpop.f32.mrf.mxu1  ;;  %3917 = vmatmul.mubr.bf16.gmra.mxu1 %v8463_v19  ;;  %v8468_v14 = vld [vmem:[#allocation309_spill] sm:$0xff]  ;;  %v8474_v19 = vld [vmem:[#allocation312_spill] sm:$0xff] }
 0x37e   :  { %4244 = vst [vmem:[#allocation10 + $0xa8] sm:$0xff] %v3988_v42  ;;  %4246 = vst [vmem:[#allocation10 + $0xb8] sm:$0xff] %v3990_v18  ;;  %v3991_v3 = vadd.f32 %v3325_v32, %v2236_v44  ;;  %v3993_v31 = vadd.f32 %v3678_v5, %v2589_v38  ;;  %3573 = vmatprep.mubr.bf16.mxu0 %v8466_v40  ;;  %3926 = vmatprep.mubr.bf16.mxu1 %v8466_v40  ;;  %v8471_v44 = vld [vmem:[#allocation56_spill] sm:$0xff]  ;;  %v8472_v38 = vld [vmem:[#allocation311_spill] sm:$0xff] }
 0x37f   :  { %v3327_v37 = vpop.f32.mrf.mxu0  ;;  %v3680_v58 = vpop.f32.mrf.mxu1  ;;  %v2240_v11 = vadd.f32 %v8468_v14, %v8467_v28  ;;  %v2242_v16 = vadd.f32 %v8472_v38, %v8471_v44  ;;  %v8473_v32 = vld [vmem:[#allocation57_spill] sm:$0xff]  ;;  %v8475_v14 = vld [vmem:[#allocation58_spill] sm:$0xff]  ;;  %v8479_v9 = vld [vmem:[#allocation60_spill] sm:$0xff] }
 0x380   :  { %4247 = vst [vmem:[#allocation10 + $0xc0] sm:$0xff] %v3991_v3  ;;  %4249 = vst [vmem:[#allocation10 + $0xd0] sm:$0xff] %v3993_v31  ;;  %v3992_v53 = vadd.f32 %v3327_v37, %v2238_v21  ;;  %v3994_v51 = vadd.f32 %v3680_v58, %v2591_v59  ;;  %v2595_v5 = vadd.f32 %v8474_v19, %v8473_v32  ;;  %v8477_v31 = vld [vmem:[#allocation59_spill] sm:$0xff]  ;;  %v8478_v21 = vld [vmem:[#allocation314_spill] sm:$0xff] }
 0x381   :  { %v3329_v42 = vpop.f32.mrf.mxu0  ;;  %v3682_v18 = vpop.f32.mrf.mxu1  ;;  %v2246_v3 = vadd.f32 %v8476_v27, %v8475_v14  ;;  %v2599_v59 = vadd.f32 %v8478_v21, %v8477_v31  ;;  %v8480_v44 = vld [vmem:[#allocation315_spill] sm:$0xff]  ;;  %v8488_v27 = vld [vmem:[#allocation318_spill] sm:$0xff] }
 0x382   :  { %4248 = vst [vmem:[#allocation10 + $0xc8] sm:$0xff] %v3992_v53  ;;  %4250 = vst [vmem:[#allocation10 + $0xd8] sm:$0xff] %v3994_v51  ;;  %v3995_v54 = vadd.f32 %v3329_v42, %v2240_v11  ;;  %v3997_v60 = vadd.f32 %v3682_v18, %v2593_v33  ;;  %v2248_v38 = vadd.f32 %v8480_v44, %v8479_v9  ;;  %v8481_v53 = vld [vmem:[#allocation54_spill] sm:$0xff]  ;;  %v8482_v33 = vld [vmem:[#allocation61_spill] sm:$0xff] }
 0x383   :  { %v3331_v40 = vpop.f32.mrf.mxu0  ;;  %v3684_v28 = vpop.f32.mrf.mxu1  ;;  %v8483_v51 = vld [vmem:[#allocation316_spill] sm:$0xff]  ;;  %v8487_v14 = vld [vmem:[#allocation63_spill] sm:$0xff] }
 0x384   :  { %4251 = vst [vmem:[#allocation10 + $0xe0] sm:$0xff] %v3995_v54  ;;  %4253 = vst [vmem:[#allocation10 + $0xf0] sm:$0xff] %v3997_v60  ;;  %v3996_v37 = vadd.f32 %v3331_v40, %v2242_v16  ;;  %v3998_v58 = vadd.f32 %v3684_v28, %v2595_v5  ;;  %v2601_v42 = vadd.f32 %v8483_v51, %v8482_v33  ;;  %v8484_v54 = vld [vmem:[#allocation55_spill] sm:$0xff]  ;;  %v8485_v60 = vld [vmem:[#allocation62_spill] sm:$0xff] }
 0x385   :  { %v3335_v32 = vpop.f32.mrf.mxu0  ;;  %3574 = vmatmul.mubr.bf16.gmra.mxu0 %v8481_v53  ;;  %v3688_v11 = vpop.f32.mrf.mxu1  ;;  %3927 = vmatmul.mubr.bf16.gmra.mxu1 %v8481_v53  ;;  %v8486_v40 = vld [vmem:[#allocation317_spill] sm:$0xff]  ;;  %v2603_v31 = vadd.f32 %v8488_v27, %v8487_v14  ;;  %v8492_v53 = vld [vmem:[#allocation320_spill] sm:$0xff]  ;;  %v8497_v27 = vld [vmem:[#allocation70_spill] sm:$0xff] }
 0x386   :  { %4252 = vst [vmem:[#allocation10 + $0xe8] sm:$0xff] %v3996_v37  ;;  %4254 = vst [vmem:[#allocation10 + $0xf8] sm:$0xff] %v3998_v58  ;;  %v3999_v18 = vadd.f32 %v3335_v32, %v2246_v3  ;;  %v4001_v19 = vadd.f32 %v3688_v11, %v2599_v59  ;;  %3583 = vmatprep.mubr.bf16.mxu0 %v8484_v54  ;;  %3936 = vmatprep.mubr.bf16.mxu1 %v8484_v54  ;;  %v8489_v3 = vld [vmem:[#allocation66_spill] sm:$0xff]  ;;  %v8490_v59 = vld [vmem:[#allocation319_spill] sm:$0xff] }
 0x387   :  { %v3337_v16 = vpop.f32.mrf.mxu0  ;;  %v3690_v5 = vpop.f32.mrf.mxu1  ;;  %v2250_v28 = vadd.f32 %v8486_v40, %v8485_v60  ;;  %v2252_v44 = vadd.f32 %v8490_v59, %v8489_v3  ;;  %v8491_v32 = vld [vmem:[#allocation67_spill] sm:$0xff]  ;;  %v8493_v40 = vld [vmem:[#allocation68_spill] sm:$0xff]  ;;  %v8494_v14 = vld [vmem:[#allocation321_spill] sm:$0xff] }
 0x388   :  { %4255 = vst [vmem:[#allocation10 + $0x100] sm:$0xff] %v3999_v18  ;;  %4257 = vst [vmem:[#allocation10 + $0x110] sm:$0xff] %v4001_v19  ;;  %v4000_v21 = vadd.f32 %v3337_v16, %v2248_v38  ;;  %v4002_v9 = vadd.f32 %v3690_v5, %v2601_v42  ;;  %v2605_v11 = vadd.f32 %v8492_v53, %v8491_v32  ;;  %v8495_v19 = vld [vmem:[#allocation69_spill] sm:$0xff]  ;;  %v8496_v38 = vld [vmem:[#allocation322_spill] sm:$0xff] }
 0x389   :  { %v3339_v37 = vpop.f32.mrf.mxu0  ;;  %v3692_v58 = vpop.f32.mrf.mxu1  ;;  %v2256_v18 = vadd.f32 %v8494_v14, %v8493_v40  ;;  %v2609_v42 = vadd.f32 %v8496_v38, %v8495_v19  ;;  %v8498_v3 = vld [vmem:[#allocation323_spill] sm:$0xff]  ;;  %v8505_v40 = vld [vmem:[#allocation73_spill] sm:$0xff]  ;;  %v8506_v14 = vld [vmem:[#allocation326_spill] sm:$0xff] }
 0x38a   :  { %4256 = vst [vmem:[#allocation10 + $0x108] sm:$0xff] %v4000_v21  ;;  %4258 = vst [vmem:[#allocation10 + $0x118] sm:$0xff] %v4002_v9  ;;  %v4003_v33 = vadd.f32 %v3339_v37, %v2250_v28  ;;  %v4005_v51 = vadd.f32 %v3692_v58, %v2603_v31  ;;  %v2258_v59 = vadd.f32 %v8498_v3, %v8497_v27  ;;  %v8499_v21 = vld [vmem:[#allocation64_spill] sm:$0xff]  ;;  %v8500_v31 = vld [vmem:[#allocation71_spill] sm:$0xff] }
 0x38b   :  { %v3341_v54 = vpop.f32.mrf.mxu0  ;;  %v3694_v60 = vpop.f32.mrf.mxu1  ;;  %v8501_v9 = vld [vmem:[#allocation324_spill] sm:$0xff]  ;;  %v2613_v19 = vadd.f32 %v8506_v14, %v8505_v40  ;;  %v8512_v40 = vld [vmem:[#allocation329_spill] sm:$0xff] }
 0x38c   :  { %4259 = vst [vmem:[#allocation10 + $0x120] sm:$0xff] %v4003_v33  ;;  %4261 = vst [vmem:[#allocation10 + $0x130] sm:$0xff] %v4005_v51  ;;  %v4004_v16 = vadd.f32 %v3341_v54, %v2252_v44  ;;  %v4006_v5 = vadd.f32 %v3694_v60, %v2605_v11  ;;  %v2611_v37 = vadd.f32 %v8501_v9, %v8500_v31  ;;  %v8502_v33 = vld [vmem:[#allocation65_spill] sm:$0xff]  ;;  %v8503_v51 = vld [vmem:[#allocation72_spill] sm:$0xff] }
 0x38d   :  { %v3345_v32 = vpop.f32.mrf.mxu0  ;;  %3584 = vmatmul.mubr.bf16.gmra.mxu0 %v8499_v21  ;;  %v3698_v28 = vpop.f32.mrf.mxu1  ;;  %3937 = vmatmul.mubr.bf16.gmra.mxu1 %v8499_v21  ;;  %v8504_v54 = vld [vmem:[#allocation325_spill] sm:$0xff]  ;;  %v8510_v21 = vld [vmem:[#allocation328_spill] sm:$0xff] }
 0x38e   :  { %4260 = vst [vmem:[#allocation10 + $0x128] sm:$0xff] %v4004_v16  ;;  %4262 = vst [vmem:[#allocation10 + $0x138] sm:$0xff] %v4006_v5  ;;  %v4007_v58 = vadd.f32 %v3345_v32, %v2256_v18  ;;  %v4009_v53 = vadd.f32 %v3698_v28, %v2609_v42  ;;  %3593 = vmatprep.mubr.bf16.mxu0 %v8502_v33  ;;  %3946 = vmatprep.mubr.bf16.mxu1 %v8502_v33  ;;  %v8507_v18 = vld [vmem:[#allocation76_spill] sm:$0xff]  ;;  %v8508_v42 = vld [vmem:[#allocation327_spill] sm:$0xff] }
 0x38f   :  { %v3347_v44 = vpop.f32.mrf.mxu0  ;;  %v3700_v11 = vpop.f32.mrf.mxu1  ;;  %v2260_v60 = vadd.f32 %v8504_v54, %v8503_v51  ;;  %v2262_v3 = vadd.f32 %v8508_v42, %v8507_v18  ;;  %v8509_v32 = vld [vmem:[#allocation77_spill] sm:$0xff]  ;;  %v8511_v54 = vld [vmem:[#allocation78_spill] sm:$0xff]  ;;  %v8515_v14 = vld [vmem:[#allocation80_spill] sm:$0xff] }
 0x390   :  { %4263 = vst [vmem:[#allocation10 + $0x140] sm:$0xff] %v4007_v58  ;;  %4265 = vst [vmem:[#allocation10 + $0x150] sm:$0xff] %v4009_v53  ;;  %v4008_v38 = vadd.f32 %v3347_v44, %v2258_v59  ;;  %v4010_v27 = vadd.f32 %v3700_v11, %v2611_v37  ;;  %v2615_v28 = vadd.f32 %v8510_v21, %v8509_v32  ;;  %v8513_v53 = vld [vmem:[#allocation79_spill] sm:$0xff]  ;;  %v8514_v59 = vld [vmem:[#allocation330_spill] sm:$0xff] }
 0x391   :  { %v3349_v16 = vpop.f32.mrf.mxu0  ;;  %v3702_v5 = vpop.f32.mrf.mxu1  ;;  %v2266_v58 = vadd.f32 %v8512_v40, %v8511_v54  ;;  %v2619_v37 = vadd.f32 %v8514_v59, %v8513_v53  ;;  %v8516_v18 = vld [vmem:[#allocation331_spill] sm:$0xff]  ;;  %v8524_v40 = vld [vmem:[#allocation334_spill] sm:$0xff] }
 0x392   :  { %4264 = vst [vmem:[#allocation10 + $0x148] sm:$0xff] %v4008_v38  ;;  %4266 = vst [vmem:[#allocation10 + $0x158] sm:$0xff] %v4010_v27  ;;  %v4011_v31 = vadd.f32 %v3349_v16, %v2260_v60  ;;  %v4013_v9 = vadd.f32 %v3702_v5, %v2613_v19  ;;  %v2268_v42 = vadd.f32 %v8516_v18, %v8515_v14  ;;  %v8517_v38 = vld [vmem:[#allocation74_spill] sm:$0xff]  ;;  %v8518_v19 = vld [vmem:[#allocation81_spill] sm:$0xff] }
 0x393   :  { %v3351_v33 = vpop.f32.mrf.mxu0  ;;  %v3704_v51 = vpop.f32.mrf.mxu1  ;;  %v8519_v27 = vld [vmem:[#allocation332_spill] sm:$0xff]  ;;  %v8523_v54 = vld [vmem:[#allocation83_spill] sm:$0xff] }
 0x394   :  { %4267 = vst [vmem:[#allocation10 + $0x160] sm:$0xff] %v4011_v31  ;;  %4269 = vst [vmem:[#allocation10 + $0x170] sm:$0xff] %v4013_v9  ;;  %v4012_v44 = vadd.f32 %v3351_v33, %v2262_v3  ;;  %v4014_v11 = vadd.f32 %v3704_v51, %v2615_v28  ;;  %v2621_v16 = vadd.f32 %v8519_v27, %v8518_v19  ;;  %v8520_v31 = vld [vmem:[#allocation75_spill] sm:$0xff]  ;;  %v8521_v9 = vld [vmem:[#allocation82_spill] sm:$0xff] }
 0x395   :  { %v3355_v32 = vpop.f32.mrf.mxu0  ;;  %3594 = vmatmul.mubr.bf16.gmra.mxu0 %v8517_v38  ;;  %v3708_v60 = vpop.f32.mrf.mxu1  ;;  %3947 = vmatmul.mubr.bf16.gmra.mxu1 %v8517_v38  ;;  %v8522_v33 = vld [vmem:[#allocation333_spill] sm:$0xff]  ;;  %v2623_v53 = vadd.f32 %v8524_v40, %v8523_v54  ;;  %v8528_v38 = vld [vmem:[#allocation336_spill] sm:$0xff] }
 0x396   :  { %4268 = vst [vmem:[#allocation10 + $0x168] sm:$0xff] %v4012_v44  ;;  %4270 = vst [vmem:[#allocation10 + $0x178] sm:$0xff] %v4014_v11  ;;  %v4015_v5 = vadd.f32 %v3355_v32, %v2266_v58  ;;  %v4017_v21 = vadd.f32 %v3708_v60, %v2619_v37  ;;  %3603 = vmatprep.mubr.bf16.mxu0 %v8520_v31  ;;  %3956 = vmatprep.mubr.bf16.mxu1 %v8520_v31  ;;  %v8525_v58 = vld [vmem:[#allocation85_spill] sm:$0xff]  ;;  %v8526_v37 = vld [vmem:[#allocation335_spill] sm:$0xff] }
 0x397   :  { %v3357_v3 = vpop.f32.mrf.mxu0  ;;  %v3710_v28 = vpop.f32.mrf.mxu1  ;;  %v2270_v51 = vadd.f32 %v8522_v33, %v8521_v9  ;;  %v2272_v18 = vadd.f32 %v8526_v37, %v8525_v58  ;;  %v8527_v32 = vld [vmem:[#allocation86_spill] sm:$0xff]  ;;  %v8529_v33 = vld [vmem:[#allocation87_spill] sm:$0xff]  ;;  %v8530_v54 = vld [vmem:[#allocation337_spill] sm:$0xff] }
 0x398   :  { %4271 = vst [vmem:[#allocation10 + $0x180] sm:$0xff] %v4015_v5  ;;  %4273 = vst [vmem:[#allocation10 + $0x190] sm:$0xff] %v4017_v21  ;;  %v4016_v59 = vadd.f32 %v3357_v3, %v2268_v42  ;;  %v4018_v14 = vadd.f32 %v3710_v28, %v2621_v16  ;;  %v2625_v60 = vadd.f32 %v8528_v38, %v8527_v32  ;;  %v8531_v21 = vld [vmem:[#allocation88_spill] sm:$0xff]  ;;  %v8532_v42 = vld [vmem:[#allocation338_spill] sm:$0xff] }
 0x399   :  { %v3359_v44 = vpop.f32.mrf.mxu0  ;;  %v3712_v11 = vpop.f32.mrf.mxu1  ;;  %v2276_v5 = vadd.f32 %v8530_v54, %v8529_v33  ;;  %v2629_v16 = vadd.f32 %v8532_v42, %v8531_v21  ;;  %v8533_v58 = vld [vmem:[#allocation84_spill] sm:$0xff]  ;;  %v8541_v33 = vld [vmem:[#allocation341_spill] sm:$0xff] }
 0x39a   :  { %4272 = vst [vmem:[#allocation10 + $0x188] sm:$0xff] %v4016_v59  ;;  %4274 = vst [vmem:[#allocation10 + $0x198] sm:$0xff] %v4018_v14  ;;  %v4019_v19 = vadd.f32 %v3359_v44, %v2270_v51  ;;  %v4021_v27 = vadd.f32 %v3712_v11, %v2623_v53  ;;  %v8534_v51 = vld [vmem:[#allocation89_spill] sm:$0xff]  ;;  %v8535_v53 = vld [vmem:[#allocation15_spill] sm:$0xff] }
 0x39b   :  { %v3361_v31 = vpop.f32.mrf.mxu0  ;;  %v3714_v9 = vpop.f32.mrf.mxu1  ;;  %v2278_v59 = vadd.f32 %v8535_v53, %v8534_v51  ;;  %v8536_v14 = vld [vmem:[#allocation90_spill] sm:$0xff]  ;;  %v8537_v44 = vld [vmem:[#allocation339_spill] sm:$0xff]  ;;  %v8542_v53 = vld [vmem:[#allocation93_spill] sm:$0xff] }
 0x39c   :  { %4275 = vst [vmem:[#allocation10 + $0x1a0] sm:$0xff] %v4019_v19  ;;  %4277 = vst [vmem:[#allocation10 + $0x1b0] sm:$0xff] %v4021_v27  ;;  %v4020_v3 = vadd.f32 %v3361_v31, %v2272_v18  ;;  %v4022_v28 = vadd.f32 %v3714_v9, %v2625_v60  ;;  %v2631_v11 = vadd.f32 %v8537_v44, %v8536_v14  ;;  %v8538_v18 = vld [vmem:[#allocation91_spill] sm:$0xff]  ;;  %v8539_v60 = vld [vmem:[#allocation340_spill] sm:$0xff] }
 0x39d   :  { %v3365_v40 = vpop.f32.mrf.mxu0  ;;  %3604 = vmatmul.mubr.bf16.gmra.mxu0 %v8533_v58  ;;  %v3718_v37 = vpop.f32.mrf.mxu1  ;;  %3957 = vmatmul.mubr.bf16.gmra.mxu1 %v8533_v58  ;;  %v2280_v31 = vadd.f32 %v8539_v60, %v8538_v18  ;;  %v8540_v9 = vld [vmem:[#allocation92_spill] sm:$0xff]  ;;  %v8543_v14 = vld [vmem:[#allocation342_spill] sm:$0xff]  ;;  %v8546_v60 = vld [vmem:[#allocation95_spill] sm:$0xff] }
 0x39e   :  { %4276 = vst [vmem:[#allocation10 + $0x1a8] sm:$0xff] %v4020_v3  ;;  %4278 = vst [vmem:[#allocation10 + $0x1b8] sm:$0xff] %v4022_v28  ;;  %v4023_v32 = vadd.f32 %v3365_v40, %v2276_v5  ;;  %v4025_v38 = vadd.f32 %v3718_v37, %v2629_v16  ;;  %v2633_v54 = vadd.f32 %v8541_v33, %v8540_v9  ;;  %v8544_v28 = vld [vmem:[#allocation94_spill] sm:$0xff]  ;;  %v8545_v5 = vld [vmem:[#allocation343_spill] sm:$0xff] }
 0x39f   :  { %v3367_v19 = vpop.f32.mrf.mxu0  ;;  %v3720_v27 = vpop.f32.mrf.mxu1  ;;  %v2282_v3 = vadd.f32 %v8543_v14, %v8542_v53  ;;  %v2635_v16 = vadd.f32 %v8545_v5, %v8544_v28  ;;  %v8547_v9 = vld [vmem:[#allocation344_spill] sm:$0xff]  ;;  %v8550_v14 = vld [vmem:[#allocation97_spill] sm:$0xff]  ;;  %v8552_v5 = vld [vmem:[#allocation99_spill] sm:$0xff] }
 0x3a0   :  { %4279 = vst [vmem:[#allocation10 + $0x1c0] sm:$0xff] %v4023_v32  ;;  %4281 = vst [vmem:[#allocation10 + $0x1d0] sm:$0xff] %v4025_v38  ;;  %v4024_v21 = vadd.f32 %v3367_v19, %v2278_v59  ;;  %v4026_v42 = vadd.f32 %v3720_v27, %v2631_v11  ;;  %v2286_v32 = vadd.f32 %v8547_v9, %v8546_v60  ;;  %v8548_v38 = vld [vmem:[#allocation96_spill] sm:$0xff]  ;;  %v8549_v59 = vld [vmem:[#allocation345_spill] sm:$0xff] }
 0x3a1   :  { %v3369_v58 = vpop.f32.mrf.mxu0  ;;  %v3722_v51 = vpop.f32.mrf.mxu1  ;;  %v2639_v11 = vadd.f32 %v8549_v59, %v8548_v38  ;;  %v8553_v60 = vld [vmem:[#allocation16_spill] sm:$0xff]  ;;  %v8556_v38 = vld [vmem:[#allocation101_spill] sm:$0xff] }
 0x3a2   :  { %4280 = vst [vmem:[#allocation10 + $0x1c8] sm:$0xff] %v4024_v21  ;;  %4282 = vst [vmem:[#allocation10 + $0x1d8] sm:$0xff] %v4026_v42  ;;  %v4027_v40 = vadd.f32 %v3369_v58, %v2280_v31  ;;  %v4029_v37 = vadd.f32 %v3722_v51, %v2633_v54  ;;  %v2288_v21 = vadd.f32 %v6847_v39, %v8550_v14  ;;  %v8551_v42 = vld [vmem:[#allocation98_spill] sm:$0xff] }
 0x3a3   :  { %v3371_v44 = vpop.f32.mrf.mxu0  ;;  %v3724_v18 = vpop.f32.mrf.mxu1  ;;  %v2641_v31 = vadd.f32 %v6849_v57, %v8551_v42  ;;  %v8557_v57 = vld [vmem:[#allocation346_spill] sm:$0xff]  ;;  %v8560_v42 = vld [vmem:[#allocation103_spill] sm:$0xff] }
 0x3a4   :  { %4283 = vst [vmem:[#allocation10 + $0x1e0] sm:$0xff] %v4027_v40  ;;  %4285 = vst [vmem:[#allocation10 + $0x1f0] sm:$0xff] %v4029_v37  ;;  %v4028_v19 = vadd.f32 %v3371_v44, %v2282_v3  ;;  %v4030_v27 = vadd.f32 %v3724_v18, %v2635_v16  ;;  %v2290_v40 = vadd.f32 %v8553_v60, %v8552_v5  ;;  %v8554_v37 = vld [vmem:[#allocation100_spill] sm:$0xff]  ;;  %v8555_v3 = vld [vmem:[#allocation17_spill] sm:$0xff] }
 0x3a5   :  { %v3375_v33 = vpop.f32.mrf.mxu0  ;;  %v3728_v53 = vpop.f32.mrf.mxu1  ;;  %v2643_v16 = vadd.f32 %v8555_v3, %v8554_v37  ;;  %v2292_v59 = vadd.f32 %v8557_v57, %v8556_v38  ;;  %v8561_v5 = vld [vmem:[#allocation348_spill] sm:$0xff]  ;;  %v8564_v3 = vld [vmem:[#allocation105_spill] sm:$0xff]  ;;  %v8566_v57 = vld [vmem:[#allocation107_spill] sm:$0xff] }
 0x3a6   :  { %4284 = vst [vmem:[#allocation10 + $0x1e8] sm:$0xff] %v4028_v19  ;;  %4286 = vst [vmem:[#allocation10 + $0x1f8] sm:$0xff] %v4030_v27  ;;  %v4031_v54 = vadd.f32 %v3375_v33, %v2286_v32  ;;  %v4033_v58 = vadd.f32 %v3728_v53, %v2639_v11  ;;  %v8558_v19 = vld [vmem:[#allocation102_spill] sm:$0xff]  ;;  %v8559_v32 = vld [vmem:[#allocation347_spill] sm:$0xff] }
 0x3a7   :  { %v3377_v51 = vpop.f32.mrf.mxu0  ;;  %v3730_v28 = vpop.f32.mrf.mxu1  ;;  %v2645_v11 = vadd.f32 %v8559_v32, %v8558_v19  ;;  %v8567_v19 = vld [vmem:[#allocation350_spill] sm:$0xff] }
 0x3a8   :  { %4287 = vst [vmem:[#allocation10 + $0x200] sm:$0xff] %v4031_v54  ;;  %4289 = vst [vmem:[#allocation10 + $0x210] sm:$0xff] %v4033_v58  ;;  %v4032_v44 = vadd.f32 %v3377_v51, %v2288_v21  ;;  %v4034_v18 = vadd.f32 %v3730_v28, %v2641_v31  ;;  %v2296_v54 = vadd.f32 %v8561_v5, %v8560_v42  ;;  %v8562_v58 = vld [vmem:[#allocation104_spill] sm:$0xff]  ;;  %v8563_v21 = vld [vmem:[#allocation349_spill] sm:$0xff] }
 0x3a9   :  { %v3379_v39 = vpop.f32.mrf.mxu0  ;;  %v3732_v9 = vpop.f32.mrf.mxu1  ;;  %v2649_v31 = vadd.f32 %v8563_v21, %v8562_v58  ;;  %v2300_v32 = vadd.f32 %v8567_v19, %v8566_v57  ;;  %v8570_v42 = vld [vmem:[#allocation109_spill] sm:$0xff]  ;;  %v8572_v58 = vld [vmem:[#allocation110_spill] sm:$0xff] }
 0x3aa   :  { %4288 = vst [vmem:[#allocation10 + $0x208] sm:$0xff] %v4032_v44  ;;  %4290 = vst [vmem:[#allocation10 + $0x218] sm:$0xff] %v4034_v18  ;;  %v4035_v27 = vadd.f32 %v3379_v39, %v2290_v40  ;;  %v4037_v33 = vadd.f32 %v3732_v9, %v2643_v16  ;;  %v2298_v44 = vadd.f32 %v6867_v12, %v8564_v3  ;;  %v8565_v18 = vld [vmem:[#allocation106_spill] sm:$0xff]  ;;  %v8578_v19 = vld [vmem:[#allocation113_spill] sm:$0xff] }
 0x3ab   :  { %v3381_v53 = vpop.f32.mrf.mxu0  ;;  %v3734_v14 = vpop.f32.mrf.mxu1  ;;  %v2651_v40 = vadd.f32 %v6869_v7, %v8565_v18  ;;  %v8571_v7 = vld [vmem:[#allocation352_spill] sm:$0xff]  ;;  %v8575_v3 = vld [vmem:[#allocation354_spill] sm:$0xff] }
 0x3ac   :  { %4291 = vst [vmem:[#allocation10 + $0x220] sm:$0xff] %v4035_v27  ;;  %4293 = vst [vmem:[#allocation10 + $0x230] sm:$0xff] %v4037_v33  ;;  %v4036_v51 = vadd.f32 %v3381_v53, %v2292_v59  ;;  %v4038_v28 = vadd.f32 %v3734_v14, %v2645_v11  ;;  %v8568_v27 = vld [vmem:[#allocation108_spill] sm:$0xff]  ;;  %v8569_v59 = vld [vmem:[#allocation351_spill] sm:$0xff]  ;;  %v2302_v5 = vadd.f32 %v8571_v7, %v8570_v42 }
 0x3ad   :  { %v3385_v60 = vpop.f32.mrf.mxu0  ;;  %v3738_v37 = vpop.f32.mrf.mxu1  ;;  %v2653_v11 = vadd.f32 %v8569_v59, %v8568_v27  ;;  %v2308_v27 = vadd.f32 %v6887_v47, %v8578_v19  ;;  %v8579_v59 = vld [vmem:[#allocation114_spill] sm:$0xff]  ;;  %v8581_v42 = vld [vmem:[#allocation356_spill] sm:$0xff] }
 0x3ae   :  { %4292 = vst [vmem:[#allocation10 + $0x228] sm:$0xff] %v4036_v51  ;;  %4294 = vst [vmem:[#allocation10 + $0x238] sm:$0xff] %v4038_v28  ;;  %v4039_v16 = vadd.f32 %v3385_v60, %v2296_v54  ;;  %v4041_v39 = vadd.f32 %v3738_v37, %v2649_v31  ;;  %v8573_v54 = vld [vmem:[#allocation353_spill] sm:$0xff]  ;;  %v8574_v37 = vld [vmem:[#allocation111_spill] sm:$0xff] }
 0x3af   :  { %v3387_v9 = vpop.f32.mrf.mxu0  ;;  %v3740_v38 = vpop.f32.mrf.mxu1  ;;  %v2655_v21 = vadd.f32 %v8573_v54, %v8572_v58  ;;  %v2306_v18 = vadd.f32 %v8575_v3, %v8574_v37  ;;  %v8582_v58 = vld [vmem:[#allocation116_spill] sm:$0xff]  ;;  %v8586_v37 = vld [vmem:[#allocation118_spill] sm:$0xff]  ;;  %v8587_v3 = vld [vmem:[#allocation359_spill] sm:$0xff] }
 0x3b0   :  { %4295 = vst [vmem:[#allocation10 + $0x240] sm:$0xff] %v4039_v16  ;;  %4297 = vst [vmem:[#allocation10 + $0x250] sm:$0xff] %v4041_v39  ;;  %v4040_v33 = vadd.f32 %v3387_v9, %v2298_v44  ;;  %v4042_v53 = vadd.f32 %v3740_v38, %v2651_v40  ;;  %v8576_v16 = vld [vmem:[#allocation112_spill] sm:$0xff]  ;;  %v8577_v44 = vld [vmem:[#allocation355_spill] sm:$0xff] }
 0x3b1   :  { %v3389_v12 = vpop.f32.mrf.mxu0  ;;  %v3742_v14 = vpop.f32.mrf.mxu1  ;;  %v2659_v40 = vadd.f32 %v8577_v44, %v8576_v16  ;;  %v8590_v19 = vld [vmem:[#allocation120_spill] sm:$0xff] }
 0x3b2   :  { %4296 = vst [vmem:[#allocation10 + $0x248] sm:$0xff] %v4040_v33  ;;  %4298 = vst [vmem:[#allocation10 + $0x258] sm:$0xff] %v4042_v53  ;;  %v4043_v31 = vadd.f32 %v3389_v12, %v2300_v32  ;;  %v4045_v51 = vadd.f32 %v3742_v14, %v2653_v11  ;;  %v2661_v32 = vadd.f32 %v6889_v50, %v8579_v59  ;;  %v8580_v14 = vld [vmem:[#allocation115_spill] sm:$0xff]  ;;  %v8585_v50 = vld [vmem:[#allocation358_spill] sm:$0xff] }
 0x3b3   :  { %v3391_v28 = vpop.f32.mrf.mxu0  ;;  %v3744_v60 = vpop.f32.mrf.mxu1  ;;  %v2310_v7 = vadd.f32 %v8581_v42, %v8580_v14  ;;  %v8593_v42 = vld [vmem:[#allocation122_spill] sm:$0xff] }
 0x3b4   :  { %4299 = vst [vmem:[#allocation10 + $0x260] sm:$0xff] %v4043_v31  ;;  %4301 = vst [vmem:[#allocation10 + $0x270] sm:$0xff] %v4045_v51  ;;  %v4044_v39 = vadd.f32 %v3391_v28, %v2302_v5  ;;  %v4046_v9 = vadd.f32 %v3744_v60, %v2655_v21  ;;  %v8583_v5 = vld [vmem:[#allocation357_spill] sm:$0xff] }
 0x3b5   :  { %v3395_v38 = vpop.f32.mrf.mxu0  ;;  %v3748_v57 = vpop.f32.mrf.mxu1  ;;  %v2663_v54 = vadd.f32 %v8583_v5, %v8582_v58  ;;  %v8584_v28 = vld [vmem:[#allocation117_spill] sm:$0xff] }
 0x3b6   :  { %4300 = vst [vmem:[#allocation10 + $0x268] sm:$0xff] %v4044_v39  ;;  %4302 = vst [vmem:[#allocation10 + $0x278] sm:$0xff] %v4046_v9  ;;  %v4047_v11 = vadd.f32 %v3395_v38, %v2306_v18  ;;  %v4049_v33 = vadd.f32 %v3748_v57, %v2659_v40  ;;  %v2312_v60 = vadd.f32 %v8585_v50, %v8584_v28  ;;  %v8588_v9 = vld [vmem:[#allocation119_spill] sm:$0xff]  ;;  %v8589_v38 = vld [vmem:[#allocation360_spill] sm:$0xff] }
 0x3b7   :  { %v3397_v53 = vpop.f32.mrf.mxu0  ;;  %v3750_v12 = vpop.f32.mrf.mxu1  ;;  %v2665_v18 = vadd.f32 %v8587_v3, %v8586_v37  ;;  %v2316_v57 = vadd.f32 %v8589_v38, %v8588_v9  ;;  %v8596_v28 = vld [vmem:[#allocation124_spill] sm:$0xff]  ;;  %v8597_v50 = vld [vmem:[#allocation363_spill] sm:$0xff] }
 0x3b8   :  { %4303 = vst [vmem:[#allocation10 + $0x280] sm:$0xff] %v4047_v11  ;;  %4305 = vst [vmem:[#allocation10 + $0x290] sm:$0xff] %v4049_v33  ;;  %v4048_v21 = vadd.f32 %v3397_v53, %v2308_v27  ;;  %v4050_v31 = vadd.f32 %v3750_v12, %v2661_v32  ;;  %v8591_v27 = vld [vmem:[#allocation361_spill] sm:$0xff] }
 0x3b9   :  { %v3399_v47 = vpop.f32.mrf.mxu0  ;;  %v3752_v51 = vpop.f32.mrf.mxu1  ;;  %v2669_v59 = vadd.f32 %v8591_v27, %v8590_v19  ;;  %v8592_v12 = vld [vmem:[#allocation121_spill] sm:$0xff] }
 0x3ba   :  { %4304 = vst [vmem:[#allocation10 + $0x288] sm:$0xff] %v4048_v21  ;;  %4306 = vst [vmem:[#allocation10 + $0x298] sm:$0xff] %v4050_v31  ;;  %v4051_v16 = vadd.f32 %v3399_v47, %v2310_v7  ;;  %v4053_v44 = vadd.f32 %v3752_v51, %v2663_v54  ;;  %v2318_v14 = vadd.f32 %v6907_v4, %v8592_v12  ;;  %v8594_v31 = vld [vmem:[#allocation123_spill] sm:$0xff]  ;;  %v8595_v47 = vld [vmem:[#allocation362_spill] sm:$0xff] }
 0x3bb   :  { %v3401_v40 = vpop.f32.mrf.mxu0  ;;  %v3754_v39 = vpop.f32.mrf.mxu1  ;;  %v2671_v7 = vadd.f32 %v6909_v17, %v8593_v42  ;;  %v2320_v51 = vadd.f32 %v8595_v47, %v8594_v31  ;;  %v8599_v17 = vld [vmem:[#allocation364_spill] sm:$0xff] }
 0x3bc   :  { %4307 = vst [vmem:[#allocation10 + $0x2a0] sm:$0xff] %v4051_v16  ;;  %4309 = vst [vmem:[#allocation10 + $0x2b0] sm:$0xff] %v4053_v44  ;;  %v4052_v32 = vadd.f32 %v3401_v40, %v2312_v60  ;;  %v4054_v11 = vadd.f32 %v3754_v39, %v2665_v18  ;;  %v2673_v60 = vadd.f32 %v8597_v50, %v8596_v28  ;;  %v8598_v16 = vld [vmem:[#allocation125_spill] sm:$0xff]  ;;  %v8600_v40 = vld [vmem:[#allocation126_spill] sm:$0xff] }
 0x3bd   :  { %v3405_v33 = vpop.f32.mrf.mxu0  ;;  %v3758_v53 = vpop.f32.mrf.mxu1  ;;  %v2322_v44 = vadd.f32 %v8599_v17, %v8598_v16  ;;  %v8601_v39 = vld [vmem:[#allocation365_spill] sm:$0xff] }
 0x3be   :  { %4308 = vst [vmem:[#allocation10 + $0x2a8] sm:$0xff] %v4052_v32  ;;  %4310 = vst [vmem:[#allocation10 + $0x2b8] sm:$0xff] %v4054_v11  ;;  %v4055_v58 = vadd.f32 %v3405_v33, %v2316_v57  ;;  %v4057_v5 = vadd.f32 %v3758_v53, %v2669_v59  ;;  %v2675_v9 = vadd.f32 %v8601_v39, %v8600_v40  ;;  %v8602_v59 = vld [vmem:[#allocation127_spill] sm:$0xff]  ;;  %v8603_v32 = vld [vmem:[#allocation366_spill] sm:$0xff] }
 0x3bf   :  { %v3407_v54 = vpop.f32.mrf.mxu0  ;;  %v3760_v21 = vpop.f32.mrf.mxu1  ;;  %v2326_v11 = vadd.f32 %v8603_v32, %v8602_v59  ;;  %v8604_v33 = vld [vmem:[#allocation128_spill] sm:$0xff]  ;;  %v8605_v53 = vld [vmem:[#allocation367_spill] sm:$0xff]  ;;  %v8612_v39 = vld [vmem:[#allocation133_spill] sm:$0xff] }
 0x3c0   :  { %4311 = vst [vmem:[#allocation10 + $0x2c0] sm:$0xff] %v4055_v58  ;;  %4313 = vst [vmem:[#allocation10 + $0x2d0] sm:$0xff] %v4057_v5  ;;  %v4056_v37 = vadd.f32 %v3407_v54, %v2318_v14  ;;  %v4058_v3 = vadd.f32 %v3760_v21, %v2671_v7  ;;  %v2679_v12 = vadd.f32 %v8605_v53, %v8604_v33  ;;  %v8606_v5 = vld [vmem:[#allocation129_spill] sm:$0xff]  ;;  %v8607_v21 = vld [vmem:[#allocation130_spill] sm:$0xff] }
 0x3c1   :  { %v3409_v4 = vpop.f32.mrf.mxu0  ;;  %v3762_v18 = vpop.f32.mrf.mxu1  ;;  %v2328_v54 = vadd.f32 %v6927_v23, %v8606_v5  ;;  %v2681_v31 = vadd.f32 %v6929_v34, %v8607_v21  ;;  %v8613_v34 = vld [vmem:[#allocation370_spill] sm:$0xff]  ;;  %v8616_v33 = vld [vmem:[#allocation135_spill] sm:$0xff]  ;;  %v8617_v53 = vld [vmem:[#allocation372_spill] sm:$0xff] }
 0x3c2   :  { %4312 = vst [vmem:[#allocation10 + $0x2c8] sm:$0xff] %v4056_v37  ;;  %4314 = vst [vmem:[#allocation10 + $0x2d8] sm:$0xff] %v4058_v3  ;;  %v4059_v38 = vadd.f32 %v3409_v4, %v2320_v51  ;;  %v4061_v57 = vadd.f32 %v3762_v18, %v2673_v60  ;;  %v8608_v60 = vld [vmem:[#allocation131_spill] sm:$0xff]  ;;  %v8609_v37 = vld [vmem:[#allocation368_spill] sm:$0xff] }
 0x3c3   :  { %v3411_v19 = vpop.f32.mrf.mxu0  ;;  %v3764_v27 = vpop.f32.mrf.mxu1  ;;  %v2330_v3 = vadd.f32 %v8609_v37, %v8608_v60  ;;  %v8610_v4 = vld [vmem:[#allocation132_spill] sm:$0xff]  ;;  %v8611_v18 = vld [vmem:[#allocation369_spill] sm:$0xff] }
 0x3c4   :  { %4315 = vst [vmem:[#allocation10 + $0x2e0] sm:$0xff] %v4059_v38  ;;  %4317 = vst [vmem:[#allocation10 + $0x2f0] sm:$0xff] %v4061_v57  ;;  %v4060_v14 = vadd.f32 %v3411_v19, %v2322_v44  ;;  %v4062_v42 = vadd.f32 %v3764_v27, %v2675_v9  ;;  %v2683_v16 = vadd.f32 %v8611_v18, %v8610_v4  ;;  %v8614_v38 = vld [vmem:[#allocation134_spill] sm:$0xff]  ;;  %v8615_v57 = vld [vmem:[#allocation371_spill] sm:$0xff] }
 0x3c5   :  { %v3415_v7 = vpop.f32.mrf.mxu0  ;;  %v3768_v58 = vpop.f32.mrf.mxu1  ;;  %v2332_v9 = vadd.f32 %v8613_v34, %v8612_v39  ;;  %v2685_v19 = vadd.f32 %v8615_v57, %v8614_v38  ;;  %v8622_v4 = vld [vmem:[#allocation139_spill] sm:$0xff]  ;;  %v8623_v18 = vld [vmem:[#allocation374_spill] sm:$0xff] }
 0x3c6   :  { %4316 = vst [vmem:[#allocation10 + $0x2e8] sm:$0xff] %v4060_v14  ;;  %4318 = vst [vmem:[#allocation10 + $0x2f8] sm:$0xff] %v4062_v42  ;;  %v4063_v47 = vadd.f32 %v3415_v7, %v2326_v11  ;;  %v4065_v51 = vadd.f32 %v3768_v58, %v2679_v12  ;;  %v2336_v12 = vadd.f32 %v8617_v53, %v8616_v33  ;;  %v8618_v14 = vld [vmem:[#allocation136_spill] sm:$0xff]  ;;  %v8619_v42 = vld [vmem:[#allocation373_spill] sm:$0xff] }
 0x3c7   :  { %v3417_v28 = vpop.f32.mrf.mxu0  ;;  %v3770_v50 = vpop.f32.mrf.mxu1  ;;  %v2689_v7 = vadd.f32 %v8619_v42, %v8618_v14  ;;  %v8628_v57 = vld [vmem:[#allocation142_spill] sm:$0xff]  ;;  %v8630_v53 = vld [vmem:[#allocation143_spill] sm:$0xff]  ;;  %v8632_v42 = vld [vmem:[#allocation144_spill] sm:$0xff] }
 0x3c8   :  { %4319 = vst [vmem:[#allocation10 + $0x300] sm:$0xff] %v4063_v47  ;;  %4321 = vst [vmem:[#allocation10 + $0x310] sm:$0xff] %v4065_v51  ;;  %v4064_v17 = vadd.f32 %v3417_v28, %v2328_v54  ;;  %v4066_v44 = vadd.f32 %v3770_v50, %v2681_v31  ;;  %v8620_v31 = vld [vmem:[#allocation137_spill] sm:$0xff]  ;;  %v8621_v51 = vld [vmem:[#allocation138_spill] sm:$0xff] }
 0x3c9   :  { %v3419_v23 = vpop.f32.mrf.mxu0  ;;  %v3772_v40 = vpop.f32.mrf.mxu1  ;;  %v2338_v47 = vadd.f32 %v6947_v46, %v8620_v31  ;;  %v2691_v28 = vadd.f32 %v6949_v49, %v8621_v51  ;;  %v8627_v49 = vld [vmem:[#allocation376_spill] sm:$0xff] }
 0x3ca   :  { %4320 = vst [vmem:[#allocation10 + $0x308] sm:$0xff] %v4064_v17  ;;  %4322 = vst [vmem:[#allocation10 + $0x318] sm:$0xff] %v4066_v44  ;;  %v4067_v27 = vadd.f32 %v3419_v23, %v2330_v3  ;;  %v4069_v59 = vadd.f32 %v3772_v40, %v2683_v16  ;;  %v2340_v16 = vadd.f32 %v8623_v18, %v8622_v4  ;;  %v8624_v17 = vld [vmem:[#allocation140_spill] sm:$0xff]  ;;  %v8625_v44 = vld [vmem:[#allocation375_spill] sm:$0xff] }
 0x3cb   :  { %v3421_v32 = vpop.f32.mrf.mxu0  ;;  %v3774_v11 = vpop.f32.mrf.mxu1  ;;  %v2693_v23 = vadd.f32 %v8625_v44, %v8624_v17  ;;  %v8636_v18 = vld [vmem:[#allocation147_spill] sm:$0xff]  ;;  %v8638_v44 = vld [vmem:[#allocation148_spill] sm:$0xff] }
 0x3cc   :  { %4323 = vst [vmem:[#allocation10 + $0x320] sm:$0xff] %v4067_v27  ;;  %4325 = vst [vmem:[#allocation10 + $0x330] sm:$0xff] %v4069_v59  ;;  %v4068_v58 = vadd.f32 %v3421_v32, %v2332_v9  ;;  %v4070_v5 = vadd.f32 %v3774_v11, %v2685_v19  ;;  %v8626_v9 = vld [vmem:[#allocation141_spill] sm:$0xff] }
 0x3cd   :  { %v3425_v54 = vpop.f32.mrf.mxu0  ;;  %v3778_v21 = vpop.f32.mrf.mxu1  ;;  %v2342_v38 = vadd.f32 %v8627_v49, %v8626_v9  ;;  %v8629_v19 = vld [vmem:[#allocation377_spill] sm:$0xff] }
 0x3ce   :  { %4324 = vst [vmem:[#allocation10 + $0x328] sm:$0xff] %v4068_v58  ;;  %4326 = vst [vmem:[#allocation10 + $0x338] sm:$0xff] %v4070_v5  ;;  %v4071_v50 = vadd.f32 %v3425_v54, %v2336_v12  ;;  %v4073_v60 = vadd.f32 %v3778_v21, %v2689_v7  ;;  %v2695_v27 = vadd.f32 %v8629_v19, %v8628_v57  ;;  %v8631_v12 = vld [vmem:[#allocation378_spill] sm:$0xff]  ;;  %v8633_v7 = vld [vmem:[#allocation379_spill] sm:$0xff] }
 0x3cf   :  { %v3427_v37 = vpop.f32.mrf.mxu0  ;;  %v3780_v3 = vpop.f32.mrf.mxu1  ;;  %v2346_v14 = vadd.f32 %v8631_v12, %v8630_v53  ;;  %v2699_v58 = vadd.f32 %v8633_v7, %v8632_v42  ;;  %v8640_v9 = vld [vmem:[#allocation149_spill] sm:$0xff]  ;;  %v8643_v57 = vld [vmem:[#allocation383_spill] sm:$0xff]  ;;  %v8645_v53 = vld [vmem:[#allocation384_spill] sm:$0xff] }
 0x3d0   :  { %4327 = vst [vmem:[#allocation10 + $0x340] sm:$0xff] %v4071_v50  ;;  %4329 = vst [vmem:[#allocation10 + $0x350] sm:$0xff] %v4073_v60  ;;  %v4072_v40 = vadd.f32 %v3427_v37, %v2338_v47  ;;  %v4074_v39 = vadd.f32 %v3780_v3, %v2691_v28  ;;  %v8634_v47 = vld [vmem:[#allocation145_spill] sm:$0xff]  ;;  %v8635_v28 = vld [vmem:[#allocation146_spill] sm:$0xff] }
 0x3d1   :  { %v3429_v46 = vpop.f32.mrf.mxu0  ;;  %v3782_v34 = vpop.f32.mrf.mxu1  ;;  %v2348_v51 = vadd.f32 %v6967_v63, %v8634_v47  ;;  %v2701_v50 = vadd.f32 %v6969_v30, %v8635_v28  ;;  %v8641_v30 = vld [vmem:[#allocation382_spill] sm:$0xff]  ;;  %v8647_v42 = vld [vmem:[#allocation385_spill] sm:$0xff] }
 0x3d2   :  { %4328 = vst [vmem:[#allocation10 + $0x348] sm:$0xff] %v4072_v40  ;;  %4330 = vst [vmem:[#allocation10 + $0x358] sm:$0xff] %v4074_v39  ;;  %v4075_v59 = vadd.f32 %v3429_v46, %v2340_v16  ;;  %v4077_v32 = vadd.f32 %v3782_v34, %v2693_v23  ;;  %v8637_v16 = vld [vmem:[#allocation380_spill] sm:$0xff]  ;;  %v8639_v23 = vld [vmem:[#allocation381_spill] sm:$0xff]  ;;  %v2352_v49 = vadd.f32 %v8641_v30, %v8640_v9 }
 0x3d3   :  { %v3431_v11 = vpop.f32.mrf.mxu0  ;;  %v3784_v33 = vpop.f32.mrf.mxu1  ;;  %v2350_v17 = vadd.f32 %v8637_v16, %v8636_v18  ;;  %v2703_v40 = vadd.f32 %v8639_v23, %v8638_v44  ;;  %v8651_v18 = vld [vmem:[#allocation386_spill] sm:$0xff]  ;;  %v8653_v44 = vld [vmem:[#allocation387_spill] sm:$0xff]  ;;  %v8657_v30 = vld [vmem:[#allocation389_spill] sm:$0xff] }
 0x3d4   :  { %4331 = vst [vmem:[#allocation10 + $0x360] sm:$0xff] %v4075_v59  ;;  %4333 = vst [vmem:[#allocation10 + $0x370] sm:$0xff] %v4077_v32  ;;  %v4076_v5 = vadd.f32 %v3431_v11, %v2342_v38  ;;  %v4078_v54 = vadd.f32 %v3784_v33, %v2695_v27  ;;  %v8642_v38 = vld [vmem:[#allocation150_spill] sm:$0xff]  ;;  %v8644_v33 = vld [vmem:[#allocation151_spill] sm:$0xff] }
 0x3d5   :  { %v3435_v21 = vpop.f32.mrf.mxu0  ;;  %v3788_v31 = vpop.f32.mrf.mxu1  ;;  %v2705_v19 = vadd.f32 %v8643_v57, %v8642_v38  ;;  %v2356_v12 = vadd.f32 %v8645_v53, %v8644_v33  ;;  %v8656_v9 = vld [vmem:[#allocation158_spill] sm:$0xff]  ;;  %v8660_v33 = vld [vmem:[#allocation160_spill] sm:$0xff]  ;;  %v8661_v53 = vld [vmem:[#allocation391_spill] sm:$0xff] }
 0x3d6   :  { %4332 = vst [vmem:[#allocation10 + $0x368] sm:$0xff] %v4076_v5  ;;  %4334 = vst [vmem:[#allocation10 + $0x378] sm:$0xff] %v4078_v54  ;;  %v4079_v60 = vadd.f32 %v3435_v21, %v2346_v14  ;;  %v4081_v37 = vadd.f32 %v3788_v31, %v2699_v58  ;;  %v8646_v14 = vld [vmem:[#allocation152_spill] sm:$0xff]  ;;  %v8648_v31 = vld [vmem:[#allocation153_spill] sm:$0xff] }
 0x3d7   :  { %v3437_v3 = vpop.f32.mrf.mxu0  ;;  %v3790_v4 = vpop.f32.mrf.mxu1  ;;  %v2709_v7 = vadd.f32 %v8647_v42, %v8646_v14  ;;  %v2358_v47 = vadd.f32 %v6987_v29, %v8648_v31 }
 0x3d8   :  { %4335 = vst [vmem:[#allocation10 + $0x380] sm:$0xff] %v4079_v60  ;;  %4337 = vst [vmem:[#allocation10 + $0x390] sm:$0xff] %v4081_v37  ;;  %v4080_v39 = vadd.f32 %v3437_v3, %v2348_v51  ;;  %v4082_v46 = vadd.f32 %v3790_v4, %v2701_v50  ;;  %v8649_v51 = vld [vmem:[#allocation154_spill] sm:$0xff]  ;;  %v8650_v4 = vld [vmem:[#allocation155_spill] sm:$0xff] }
 0x3d9   :  { %v3439_v63 = vpop.f32.mrf.mxu0  ;;  %v3792_v34 = vpop.f32.mrf.mxu1  ;;  %v2711_v28 = vadd.f32 %v6989_v2, %v8649_v51  ;;  %v2360_v16 = vadd.f32 %v8651_v18, %v8650_v4  ;;  %v8655_v2 = vld [vmem:[#allocation388_spill] sm:$0xff]  ;;  %v8667_v18 = vld [vmem:[#allocation393_spill] sm:$0xff] }
 0x3da   :  { %4336 = vst [vmem:[#allocation10 + $0x388] sm:$0xff] %v4080_v39  ;;  %4338 = vst [vmem:[#allocation10 + $0x398] sm:$0xff] %v4082_v46  ;;  %v4083_v27 = vadd.f32 %v3439_v63, %v2350_v17  ;;  %v4085_v59 = vadd.f32 %v3792_v34, %v2703_v40  ;;  %v8652_v17 = vld [vmem:[#allocation156_spill] sm:$0xff]  ;;  %v8654_v63 = vld [vmem:[#allocation157_spill] sm:$0xff] }
 0x3db   :  { %v3441_v32 = vpop.f32.mrf.mxu0  ;;  %v3794_v11 = vpop.f32.mrf.mxu1  ;;  %v2713_v23 = vadd.f32 %v8653_v44, %v8652_v17  ;;  %v2362_v34 = vadd.f32 %v8655_v2, %v8654_v63  ;;  %v8666_v4 = vld [vmem:[#allocation164_spill] sm:$0xff] }
 0x3dc   :  { %4339 = vst [vmem:[#allocation10 + $0x3a0] sm:$0xff] %v4083_v27  ;;  %4341 = vst [vmem:[#allocation10 + $0x3b0] sm:$0xff] %v4085_v59  ;;  %v4084_v58 = vadd.f32 %v3441_v32, %v2352_v49  ;;  %v4086_v5 = vadd.f32 %v3794_v11, %v2705_v19  ;;  %v2715_v49 = vadd.f32 %v8657_v30, %v8656_v9  ;;  %v8658_v59 = vld [vmem:[#allocation159_spill] sm:$0xff]  ;;  %v8659_v32 = vld [vmem:[#allocation390_spill] sm:$0xff] }
 0x3dd   :  { %v3445_v54 = vpop.f32.mrf.mxu0  ;;  %v3798_v21 = vpop.f32.mrf.mxu1  ;;  %v2366_v11 = vadd.f32 %v8659_v32, %v8658_v59 }
 0x3de   :  { %4340 = vst [vmem:[#allocation10 + $0x3a8] sm:$0xff] %v4084_v58  ;;  %4342 = vst [vmem:[#allocation10 + $0x3b8] sm:$0xff] %v4086_v5  ;;  %v4087_v50 = vadd.f32 %v3445_v54, %v2356_v12  ;;  %v4089_v60 = vadd.f32 %v3798_v21, %v2709_v7  ;;  %v2719_v12 = vadd.f32 %v8661_v53, %v8660_v33  ;;  %v8662_v5 = vld [vmem:[#allocation161_spill] sm:$0xff]  ;;  %v8663_v21 = vld [vmem:[#allocation162_spill] sm:$0xff] }
 0x3df   :  { %v3447_v37 = vpop.f32.mrf.mxu0  ;;  %v3800_v3 = vpop.f32.mrf.mxu1  ;;  %v2368_v54 = vadd.f32 %v7007_v1, %v8662_v5  ;;  %v2721_v31 = vadd.f32 %v7009_v20, %v8663_v21  ;;  %v8669_v20 = vld [vmem:[#allocation394_spill] sm:$0xff] }
 0x3e0   :  { %4343 = vst [vmem:[#allocation10 + $0x3c0] sm:$0xff] %v4087_v50  ;;  %4345 = vst [vmem:[#allocation10 + $0x3d0] sm:$0xff] %v4089_v60  ;;  %v4088_v40 = vadd.f32 %v3447_v37, %v2358_v47  ;;  %v4090_v39 = vadd.f32 %v3800_v3, %v2711_v28  ;;  %v8664_v60 = vld [vmem:[#allocation163_spill] sm:$0xff]  ;;  %v8665_v37 = vld [vmem:[#allocation392_spill] sm:$0xff] }
 0x3e1   :  { %v3449_v29 = vpop.f32.mrf.mxu0  ;;  %v3802_v46 = vpop.f32.mrf.mxu1  ;;  %v2370_v3 = vadd.f32 %v8665_v37, %v8664_v60 }
 0x3e2   :  { %4344 = vst [vmem:[#allocation10 + $0x3c8] sm:$0xff] %v4088_v40  ;;  %4346 = vst [vmem:[#allocation10 + $0x3d8] sm:$0xff] %v4090_v39  ;;  %v4091_v38 = vadd.f32 %v3449_v29, %v2360_v16  ;;  %v4093_v57 = vadd.f32 %v3802_v46, %v2713_v23  ;;  %v2723_v16 = vadd.f32 %v8667_v18, %v8666_v4  ;;  %v8668_v40 = vld [vmem:[#allocation165_spill] sm:$0xff]  ;;  %v8670_v29 = vld [vmem:[#allocation166_spill] sm:$0xff] }
 0x3e3   :  { %v3451_v19 = vpop.f32.mrf.mxu0  ;;  %v3804_v27 = vpop.f32.mrf.mxu1  ;;  %v2372_v39 = vadd.f32 %v8669_v20, %v8668_v40  ;;  %v8671_v46 = vld [vmem:[#allocation395_spill] sm:$0xff]  ;;  %v8682_v18 = vld [vmem:[#allocation173_spill] sm:$0xff] }
 0x3e4   :  { %4347 = vst [vmem:[#allocation10 + $0x3e0] sm:$0xff] %v4091_v38  ;;  %4349 = vst [vmem:[#allocation10 + $0x3f0] sm:$0xff] %v4093_v57  ;;  %v4092_v14 = vadd.f32 %v3451_v19, %v2362_v34  ;;  %v4094_v42 = vadd.f32 %v3804_v27, %v2715_v49  ;;  %v2725_v63 = vadd.f32 %v8671_v46, %v8670_v29  ;;  %v8672_v49 = vld [vmem:[#allocation167_spill] sm:$0xff]  ;;  %v8673_v38 = vld [vmem:[#allocation396_spill] sm:$0xff] }
 0x3e5   :  { %v3455_v7 = vpop.f32.mrf.mxu0  ;;  %v3808_v58 = vpop.f32.mrf.mxu1  ;;  %v2376_v57 = vadd.f32 %v8673_v38, %v8672_v49  ;;  %v8674_v19 = vld [vmem:[#allocation168_spill] sm:$0xff]  ;;  %v8675_v27 = vld [vmem:[#allocation397_spill] sm:$0xff]  ;;  %v8686_v29 = vld [vmem:[#allocation175_spill] sm:$0xff] }
 0x3e6   :  { %4348 = vst [vmem:[#allocation10 + $0x3e8] sm:$0xff] %v4092_v14  ;;  %4350 = vst [vmem:[#allocation10 + $0x3f8] sm:$0xff] %v4094_v42  ;;  %v4095_v47 = vadd.f32 %v3455_v7, %v2366_v11  ;;  %v4097_v51 = vadd.f32 %v3808_v58, %v2719_v12  ;;  %v2729_v59 = vadd.f32 %v8675_v27, %v8674_v19  ;;  %v8676_v12 = vld [vmem:[#allocation169_spill] sm:$0xff]  ;;  %v8677_v42 = vld [vmem:[#allocation170_spill] sm:$0xff] }
 0x3e7   :  { %v3457_v28 = vpop.f32.mrf.mxu0  ;;  %v3810_v50 = vpop.f32.mrf.mxu1  ;;  %v2378_v14 = vadd.f32 %v7027_v22, %v8676_v12  ;;  %v2731_v7 = vadd.f32 %v7029_v6, %v8677_v42  ;;  %v8683_v6 = vld [vmem:[#allocation400_spill] sm:$0xff]  ;;  %v8687_v46 = vld [vmem:[#allocation402_spill] sm:$0xff]  ;;  %v8690_v19 = vld [vmem:[#allocation177_spill] sm:$0xff] }
 0x3e8   :  { %4351 = vst [vmem:[#allocation10 + $0x400] sm:$0xff] %v4095_v47  ;;  %4353 = vst [vmem:[#allocation10 + $0x410] sm:$0xff] %v4097_v51  ;;  %v4096_v17 = vadd.f32 %v3457_v28, %v2368_v54  ;;  %v4098_v44 = vadd.f32 %v3810_v50, %v2721_v31  ;;  %v8678_v31 = vld [vmem:[#allocation171_spill] sm:$0xff]  ;;  %v8679_v47 = vld [vmem:[#allocation398_spill] sm:$0xff]  ;;  %v2388_v27 = vadd.f32 %v7047_v35, %v8690_v19 }
 0x3e9   :  { %v3459_v1 = vpop.f32.mrf.mxu0  ;;  %v3812_v23 = vpop.f32.mrf.mxu1  ;;  %v2380_v51 = vadd.f32 %v8679_v47, %v8678_v31  ;;  %v8680_v28 = vld [vmem:[#allocation172_spill] sm:$0xff]  ;;  %v8681_v50 = vld [vmem:[#allocation399_spill] sm:$0xff]  ;;  %v8707_v19 = vld [vmem:[#allocation410_spill] sm:$0xff] }
 0x3ea   :  { %4352 = vst [vmem:[#allocation10 + $0x408] sm:$0xff] %v4096_v17  ;;  %4354 = vst [vmem:[#allocation10 + $0x418] sm:$0xff] %v4098_v44  ;;  %v4099_v2 = vadd.f32 %v3459_v1, %v2370_v3  ;;  %v4101_v34 = vadd.f32 %v3812_v23, %v2723_v16  ;;  %v2733_v60 = vadd.f32 %v8681_v50, %v8680_v28  ;;  %v8684_v17 = vld [vmem:[#allocation174_spill] sm:$0xff]  ;;  %v8685_v44 = vld [vmem:[#allocation401_spill] sm:$0xff] }
 0x3eb   :  { %v3461_v9 = vpop.f32.mrf.mxu0  ;;  %v3814_v30 = vpop.f32.mrf.mxu1  ;;  %v2382_v16 = vadd.f32 %v8683_v6, %v8682_v18  ;;  %v2735_v1 = vadd.f32 %v8685_v44, %v8684_v17  ;;  %v8693_v42 = vld [vmem:[#allocation404_spill] sm:$0xff]  ;;  %v8698_v50 = vld [vmem:[#allocation182_spill] sm:$0xff]  ;;  %v8700_v6 = vld [vmem:[#allocation183_spill] sm:$0xff] }
 0x3ec   :  { %4355 = vst [vmem:[#allocation10 + $0x420] sm:$0xff] %v4099_v2  ;;  %4357 = vst [vmem:[#allocation10 + $0x430] sm:$0xff] %v4101_v34  ;;  %v4100_v32 = vadd.f32 %v3461_v9, %v2372_v39  ;;  %v4102_v11 = vadd.f32 %v3814_v30, %v2725_v63  ;;  %v2386_v63 = vadd.f32 %v8687_v46, %v8686_v29  ;;  %v8688_v2 = vld [vmem:[#allocation176_spill] sm:$0xff]  ;;  %v8689_v34 = vld [vmem:[#allocation403_spill] sm:$0xff] }
 0x3ed   :  { %v3465_v33 = vpop.f32.mrf.mxu0  ;;  %v3818_v53 = vpop.f32.mrf.mxu1  ;;  %v2739_v9 = vadd.f32 %v8689_v34, %v8688_v2  ;;  %v8702_v44 = vld [vmem:[#allocation184_spill] sm:$0xff]  ;;  %v8704_v46 = vld [vmem:[#allocation185_spill] sm:$0xff]  ;;  %v8705_v2 = vld [vmem:[#allocation186_spill] sm:$0xff] }
 0x3ee   :  { %4356 = vst [vmem:[#allocation10 + $0x428] sm:$0xff] %v4100_v32  ;;  %4358 = vst [vmem:[#allocation10 + $0x438] sm:$0xff] %v4102_v11  ;;  %v4103_v58 = vadd.f32 %v3465_v33, %v2376_v57  ;;  %v4105_v5 = vadd.f32 %v3818_v53, %v2729_v59  ;;  %v8691_v59 = vld [vmem:[#allocation178_spill] sm:$0xff]  ;;  %v2751_v34 = vadd.f32 %v7069_v25, %v8705_v2  ;;  %v8711_v25 = vld [vmem:[#allocation412_spill] sm:$0xff] }
 0x3ef   :  { %v3467_v54 = vpop.f32.mrf.mxu0  ;;  %v3820_v21 = vpop.f32.mrf.mxu1  ;;  %v2741_v32 = vadd.f32 %v7049_v24, %v8691_v59  ;;  %v8697_v24 = vld [vmem:[#allocation406_spill] sm:$0xff]  ;;  %v8708_v59 = vld [vmem:[#allocation188_spill] sm:$0xff] }
 0x3f0   :  { %4359 = vst [vmem:[#allocation10 + $0x440] sm:$0xff] %v4103_v58  ;;  %4361 = vst [vmem:[#allocation10 + $0x450] sm:$0xff] %v4105_v5  ;;  %v4104_v37 = vadd.f32 %v3467_v54, %v2378_v14  ;;  %v4106_v3 = vadd.f32 %v3820_v21, %v2731_v7  ;;  %v8692_v14 = vld [vmem:[#allocation179_spill] sm:$0xff]  ;;  %v8694_v58 = vld [vmem:[#allocation180_spill] sm:$0xff] }
 0x3f1   :  { %v3469_v22 = vpop.f32.mrf.mxu0  ;;  %v3822_v4 = vpop.f32.mrf.mxu1  ;;  %v2390_v7 = vadd.f32 %v8693_v42, %v8692_v14  ;;  %v8695_v5 = vld [vmem:[#allocation405_spill] sm:$0xff] }
 0x3f2   :  { %4360 = vst [vmem:[#allocation10 + $0x448] sm:$0xff] %v4104_v37  ;;  %4362 = vst [vmem:[#allocation10 + $0x458] sm:$0xff] %v4106_v3  ;;  %v4107_v23 = vadd.f32 %v3469_v22, %v2380_v51  ;;  %v4109_v40 = vadd.f32 %v3822_v4, %v2733_v60  ;;  %v2743_v54 = vadd.f32 %v8695_v5, %v8694_v58  ;;  %v8696_v51 = vld [vmem:[#allocation181_spill] sm:$0xff]  ;;  %v8699_v60 = vld [vmem:[#allocation407_spill] sm:$0xff] }
 0x3f3   :  { %v3471_v20 = vpop.f32.mrf.mxu0  ;;  %v3824_v39 = vpop.f32.mrf.mxu1  ;;  %v2392_v28 = vadd.f32 %v8697_v24, %v8696_v51  ;;  %v2745_v37 = vadd.f32 %v8699_v60, %v8698_v50  ;;  %v8710_v14 = vld [vmem:[#allocation189_spill] sm:$0xff]  ;;  %v8715_v51 = vld [vmem:[#allocation414_spill] sm:$0xff]  ;;  %v8717_v50 = vld [vmem:[#allocation415_spill] sm:$0xff] }
 0x3f4   :  { %4363 = vst [vmem:[#allocation10 + $0x460] sm:$0xff] %v4107_v23  ;;  %4365 = vst [vmem:[#allocation10 + $0x470] sm:$0xff] %v4109_v40  ;;  %v4108_v30 = vadd.f32 %v3471_v20, %v2382_v16  ;;  %v4110_v49 = vadd.f32 %v3824_v39, %v2735_v1  ;;  %v8701_v16 = vld [vmem:[#allocation408_spill] sm:$0xff]  ;;  %v8703_v1 = vld [vmem:[#allocation409_spill] sm:$0xff]  ;;  %v2402_v42 = vadd.f32 %v8711_v25, %v8710_v14 }
 0x3f5   :  { %v3475_v38 = vpop.f32.mrf.mxu0  ;;  %v3828_v57 = vpop.f32.mrf.mxu1  ;;  %v2396_v17 = vadd.f32 %v8701_v16, %v8700_v6  ;;  %v2749_v23 = vadd.f32 %v8703_v1, %v8702_v44  ;;  %v8713_v58 = vld [vmem:[#allocation413_spill] sm:$0xff]  ;;  %v8719_v16 = vld [vmem:[#allocation194_spill] sm:$0xff]  ;;  %v8730_v14 = vld [vmem:[#allocation200_spill] sm:$0xff] }
 0x3f6   :  { %4364 = vst [vmem:[#allocation10 + $0x468] sm:$0xff] %v4108_v30  ;;  %4366 = vst [vmem:[#allocation10 + $0x478] sm:$0xff] %v4110_v49  ;;  %v4111_v11 = vadd.f32 %v3475_v38, %v2386_v63  ;;  %v4113_v33 = vadd.f32 %v3828_v57, %v2739_v9  ;;  %v2398_v63 = vadd.f32 %v7067_v8, %v8704_v46  ;;  %v8706_v57 = vld [vmem:[#allocation187_spill] sm:$0xff]  ;;  %v8722_v46 = vld [vmem:[#allocation196_spill] sm:$0xff] }
 0x3f7   :  { %v3477_v53 = vpop.f32.mrf.mxu0  ;;  %v3830_v12 = vpop.f32.mrf.mxu1  ;;  %v8731_v25 = vld [vmem:[#allocation421_spill] sm:$0xff] }
 0x3f8   :  { %4367 = vst [vmem:[#allocation10 + $0x480] sm:$0xff] %v4111_v11  ;;  %4369 = vst [vmem:[#allocation10 + $0x490] sm:$0xff] %v4113_v33  ;;  %v4112_v21 = vadd.f32 %v3477_v53, %v2388_v27  ;;  %v4114_v31 = vadd.f32 %v3830_v12, %v2741_v32  ;;  %v2400_v27 = vadd.f32 %v8707_v19, %v8706_v57  ;;  %v8709_v32 = vld [vmem:[#allocation411_spill] sm:$0xff]  ;;  %v8726_v57 = vld [vmem:[#allocation198_spill] sm:$0xff] }
 0x3f9   :  { %v3479_v35 = vpop.f32.mrf.mxu0  ;;  %v3832_v47 = vpop.f32.mrf.mxu1  ;;  %v2753_v11 = vadd.f32 %v8709_v32, %v8708_v59  ;;  %v8727_v19 = vld [vmem:[#allocation419_spill] sm:$0xff] }
 0x3fa   :  { %4368 = vst [vmem:[#allocation10 + $0x488] sm:$0xff] %v4112_v21  ;;  %4370 = vst [vmem:[#allocation10 + $0x498] sm:$0xff] %v4114_v31  ;;  %v4115_v3 = vadd.f32 %v3479_v35, %v2390_v7  ;;  %v4117_v22 = vadd.f32 %v3832_v47, %v2743_v54  ;;  %v8712_v7 = vld [vmem:[#allocation190_spill] sm:$0xff]  ;;  %v8714_v47 = vld [vmem:[#allocation191_spill] sm:$0xff] }
 0x3fb   :  { %v3481_v4 = vpop.f32.mrf.mxu0  ;;  %v3834_v18 = vpop.f32.mrf.mxu1  ;;  %v2755_v5 = vadd.f32 %v8713_v58, %v8712_v7  ;;  %v2406_v24 = vadd.f32 %v8715_v51, %v8714_v47 }
 0x3fc   :  { %4371 = vst [vmem:[#allocation10 + $0x4a0] sm:$0xff] %v4115_v3  ;;  %4373 = vst [vmem:[#allocation10 + $0x4b0] sm:$0xff] %v4117_v22  ;;  %v4116_v40 = vadd.f32 %v3481_v4, %v2392_v28  ;;  %v4118_v20 = vadd.f32 %v3834_v18, %v2745_v37  ;;  %v8716_v28 = vld [vmem:[#allocation192_spill] sm:$0xff]  ;;  %v8718_v18 = vld [vmem:[#allocation193_spill] sm:$0xff] }
 0x3fd   :  { %v3485_v39 = vpop.f32.mrf.mxu0  ;;  %v3838_v29 = vpop.f32.mrf.mxu1  ;;  %v2759_v60 = vadd.f32 %v8717_v50, %v8716_v28  ;;  %v2408_v6 = vadd.f32 %v7087_v43, %v8718_v18 }
 0x3fe   :  { %4372 = vst [vmem:[#allocation10 + $0x4a8] sm:$0xff] %v4116_v40  ;;  %4374 = vst [vmem:[#allocation10 + $0x4b8] sm:$0xff] %v4118_v20  ;;  %v4119_v9 = vadd.f32 %v3485_v39, %v2396_v17  ;;  %v4121_v30 = vadd.f32 %v3838_v29, %v2749_v23  ;;  %v2761_v17 = vadd.f32 %v7089_v26, %v8719_v16  ;;  %v8720_v20 = vld [vmem:[#allocation195_spill] sm:$0xff]  ;;  %v8721_v39 = vld [vmem:[#allocation416_spill] sm:$0xff] }
 0x3ff   :  { %v3487_v49 = vpop.f32.mrf.mxu0  ;;  %v3840_v38 = vpop.f32.mrf.mxu1  ;;  %v2410_v29 = vadd.f32 %v8721_v39, %v8720_v20  ;;  %v8725_v26 = vld [vmem:[#allocation418_spill] sm:$0xff] }
 0x400   :  { %4375 = vst [vmem:[#allocation10 + $0x4c0] sm:$0xff] %v4119_v9  ;;  %4377 = vst [vmem:[#allocation10 + $0x4d0] sm:$0xff] %v4121_v30  ;;  %v4120_v33 = vadd.f32 %v3487_v49, %v2398_v63  ;;  %v4122_v53 = vadd.f32 %v3840_v38, %v2751_v34  ;;  %v8723_v63 = vld [vmem:[#allocation417_spill] sm:$0xff] }
 0x401   :  { %v3489_v8 = vpop.f32.mrf.mxu0  ;;  %v3842_v12 = vpop.f32.mrf.mxu1  ;;  %v2763_v2 = vadd.f32 %v8723_v63, %v8722_v46  ;;  %v8724_v49 = vld [vmem:[#allocation197_spill] sm:$0xff] }
 0x402   :  { %4376 = vst [vmem:[#allocation10 + $0x4c8] sm:$0xff] %v4120_v33  ;;  %4378 = vst [vmem:[#allocation10 + $0x4d8] sm:$0xff] %v4122_v53  ;;  %v4123_v54 = vadd.f32 %v3489_v8, %v2400_v27  ;;  %v4125_v21 = vadd.f32 %v3842_v12, %v2753_v11  ;;  %v2412_v38 = vadd.f32 %v8725_v26, %v8724_v49  ;;  %v8728_v53 = vld [vmem:[#allocation199_spill] sm:$0xff]  ;;  %v8729_v8 = vld [vmem:[#allocation420_spill] sm:$0xff] }
 0x403   :  { %v3491_v31 = vpop.f32.mrf.mxu0  ;;  %v3844_v35 = vpop.f32.mrf.mxu1  ;;  %v2765_v27 = vadd.f32 %v8727_v19, %v8726_v57  ;;  %v2416_v12 = vadd.f32 %v8729_v8, %v8728_v53 }
 0x404   :  { %4379 = vst [vmem:[#allocation10 + $0x4e0] sm:$0xff] %v4123_v54  ;;  %4381 = vst [vmem:[#allocation10 + $0x4f0] sm:$0xff] %v4125_v21  ;;  %v4124_v37 = vadd.f32 %v3491_v31, %v2402_v42  ;;  %v4126_v3 = vadd.f32 %v3844_v35, %v2755_v5  ;;  %v2769_v42 = vadd.f32 %v8731_v25, %v8730_v14  ;;  %v8732_v21 = vld [vmem:[#allocation201_spill] sm:$0xff]  ;;  %v8733_v35 = vld [vmem:[#allocation202_spill] sm:$0xff] }
 0x405   :  { %v3495_v22 = vpop.f32.mrf.mxu0  ;;  %v3848_v4 = vpop.f32.mrf.mxu1  ;;  %v2418_v31 = vadd.f32 %v7107_v36, %v8732_v21  ;;  %v2771_v47 = vadd.f32 %v7109_v41, %v8733_v35  ;;  %v8739_v41 = vld [vmem:[#allocation424_spill] sm:$0xff]  ;;  %v8748_v14 = vld [vmem:[#allocation211_spill] sm:$0xff]  ;;  %v8752_v35 = vld [vmem:[#allocation213_spill] sm:$0xff] }
 0x406   :  { %4380 = vst [vmem:[#allocation10 + $0x4e8] sm:$0xff] %v4124_v37  ;;  %4382 = vst [vmem:[#allocation10 + $0x4f8] sm:$0xff] %v4126_v3  ;;  %v4127_v44 = vadd.f32 %v3495_v22, %v2406_v24  ;;  %v4129_v1 = vadd.f32 %v3848_v4, %v2759_v60  ;;  %v8734_v60 = vld [vmem:[#allocation203_spill] sm:$0xff]  ;;  %v8735_v37 = vld [vmem:[#allocation422_spill] sm:$0xff] }
 0x407   :  { %v3497_v23 = vpop.f32.mrf.mxu0  ;;  %v3850_v40 = vpop.f32.mrf.mxu1  ;;  %v2420_v3 = vadd.f32 %v8735_v37, %v8734_v60  ;;  %v8736_v22 = vld [vmem:[#allocation204_spill] sm:$0xff]  ;;  %v8737_v4 = vld [vmem:[#allocation423_spill] sm:$0xff] }
 0x408   :  { %4383 = vst [vmem:[#allocation10 + $0x500] sm:$0xff] %v4127_v44  ;;  %4385 = vst [vmem:[#allocation10 + $0x510] sm:$0xff] %v4129_v1  ;;  %v4128_v34 = vadd.f32 %v3497_v23, %v2408_v6  ;;  %v4130_v9 = vadd.f32 %v3850_v40, %v2761_v17  ;;  %v2773_v18 = vadd.f32 %v8737_v4, %v8736_v22  ;;  %v8738_v44 = vld [vmem:[#allocation205_spill] sm:$0xff]  ;;  %v8740_v23 = vld [vmem:[#allocation206_spill] sm:$0xff] }
 0x409   :  { %v3499_v43 = vpop.f32.mrf.mxu0  ;;  %v3852_v30 = vpop.f32.mrf.mxu1  ;;  %v2422_v1 = vadd.f32 %v8739_v41, %v8738_v44  ;;  %v8741_v40 = vld [vmem:[#allocation425_spill] sm:$0xff]  ;;  %v8749_v25 = vld [vmem:[#allocation428_spill] sm:$0xff]  ;;  %v8756_v22 = vld [vmem:[#allocation215_spill] sm:$0xff] }
 0x40a   :  { %4384 = vst [vmem:[#allocation10 + $0x508] sm:$0xff] %v4128_v34  ;;  %4386 = vst [vmem:[#allocation10 + $0x518] sm:$0xff] %v4130_v9  ;;  %v4131_v59 = vadd.f32 %v3499_v43, %v2410_v29  ;;  %v4133_v32 = vadd.f32 %v3852_v30, %v2763_v2  ;;  %v2775_v20 = vadd.f32 %v8741_v40, %v8740_v23  ;;  %v8742_v2 = vld [vmem:[#allocation207_spill] sm:$0xff]  ;;  %v8743_v34 = vld [vmem:[#allocation426_spill] sm:$0xff] }
 0x40b   :  { %v3501_v11 = vpop.f32.mrf.mxu0  ;;  %v3854_v33 = vpop.f32.mrf.mxu1  ;;  %v2426_v9 = vadd.f32 %v8743_v34, %v8742_v2  ;;  %v8744_v43 = vld [vmem:[#allocation208_spill] sm:$0xff]  ;;  %v8745_v30 = vld [vmem:[#allocation427_spill] sm:$0xff]  ;;  %v8760_v23 = vld [vmem:[#allocation217_spill] sm:$0xff] }
 0x40c   :  { %4387 = vst [vmem:[#allocation10 + $0x520] sm:$0xff] %v4131_v59  ;;  %4389 = vst [vmem:[#allocation10 + $0x530] sm:$0xff] %v4133_v32  ;;  %v4132_v7 = vadd.f32 %v3501_v11, %v2412_v38  ;;  %v4134_v58 = vadd.f32 %v3854_v33, %v2765_v27  ;;  %v2779_v49 = vadd.f32 %v8745_v30, %v8744_v43  ;;  %v8746_v27 = vld [vmem:[#allocation209_spill] sm:$0xff]  ;;  %v8747_v32 = vld [vmem:[#allocation210_spill] sm:$0xff] }
 0x40d   :  { %v3505_v5 = vpop.f32.mrf.mxu0  ;;  %v3858_v54 = vpop.f32.mrf.mxu1  ;;  %v2428_v59 = vadd.f32 %v7127_v45, %v8746_v27  ;;  %v2781_v11 = vadd.f32 %v7129_v13, %v8747_v32  ;;  %v8753_v13 = vld [vmem:[#allocation430_spill] sm:$0xff]  ;;  %v8757_v4 = vld [vmem:[#allocation432_spill] sm:$0xff]  ;;  %v2438_v40 = vadd.f32 %v7147_v52, %v8760_v23  ;;  %v8762_v34 = vld [vmem:[#allocation219_spill] sm:$0xff] }
 0x40e   :  { %4388 = vst [vmem:[#allocation10 + $0x528] sm:$0xff] %v4132_v7  ;;  %4390 = vst [vmem:[#allocation10 + $0x538] sm:$0xff] %v4134_v58  ;;  %v4135_v51 = vadd.f32 %v3505_v5, %v2416_v12  ;;  %v4137_v24 = vadd.f32 %v3858_v54, %v2769_v42  ;;  %v2430_v42 = vadd.f32 %v8749_v25, %v8748_v14  ;;  %v8750_v7 = vld [vmem:[#allocation212_spill] sm:$0xff]  ;;  %v8751_v58 = vld [vmem:[#allocation429_spill] sm:$0xff] }
 0x40f   :  { %v3507_v28 = vpop.f32.mrf.mxu0  ;;  %v3860_v50 = vpop.f32.mrf.mxu1  ;;  %v2783_v5 = vadd.f32 %v8751_v58, %v8750_v7  ;;  %v8764_v30 = vld [vmem:[#allocation220_spill] sm:$0xff]  ;;  %v8766_v27 = vld [vmem:[#allocation221_spill] sm:$0xff]  ;;  %v8768_v32 = vld [vmem:[#allocation222_spill] sm:$0xff] }
 0x410   :  { %4391 = vst [vmem:[#allocation10 + $0x540] sm:$0xff] %v4135_v51  ;;  %4393 = vst [vmem:[#allocation10 + $0x550] sm:$0xff] %v4137_v24  ;;  %v4136_v6 = vadd.f32 %v3507_v28, %v2418_v31  ;;  %v4138_v16 = vadd.f32 %v3860_v50, %v2771_v47  ;;  %v2432_v47 = vadd.f32 %v8753_v13, %v8752_v35  ;;  %v8754_v51 = vld [vmem:[#allocation214_spill] sm:$0xff]  ;;  %v8755_v24 = vld [vmem:[#allocation431_spill] sm:$0xff] }
 0x411   :  { %v3509_v36 = vpop.f32.mrf.mxu0  ;;  %v3862_v17 = vpop.f32.mrf.mxu1  ;;  %v2785_v28 = vadd.f32 %v8755_v24, %v8754_v51  ;;  %v8770_v25 = vld [vmem:[#allocation223_spill] sm:$0xff]  ;;  %v8772_v58 = vld [vmem:[#allocation224_spill] sm:$0xff]  ;;  %v8774_v13 = vld [vmem:[#allocation225_spill] sm:$0xff] }
 0x412   :  { %4392 = vst [vmem:[#allocation10 + $0x548] sm:$0xff] %v4136_v6  ;;  %4394 = vst [vmem:[#allocation10 + $0x558] sm:$0xff] %v4138_v16  ;;  %v4139_v39 = vadd.f32 %v3509_v36, %v2420_v3  ;;  %v4141_v29 = vadd.f32 %v3862_v17, %v2773_v18  ;;  %v2436_v18 = vadd.f32 %v8757_v4, %v8756_v22  ;;  %v8758_v6 = vld [vmem:[#allocation216_spill] sm:$0xff]  ;;  %v8759_v16 = vld [vmem:[#allocation433_spill] sm:$0xff] }
 0x413   :  { %v3511_v46 = vpop.f32.mrf.mxu0  ;;  %v3864_v63 = vpop.f32.mrf.mxu1  ;;  %v2789_v36 = vadd.f32 %v8759_v16, %v8758_v6  ;;  %v8775_v51 = vld [vmem:[#allocation226_spill] sm:$0xff]  ;;  %v8777_v22 = vld [vmem:[#allocation440_spill] sm:$0xff]  ;;  %v8779_v6 = vld [vmem:[#allocation441_spill] sm:$0xff] }
 0x414   :  { %4395 = vst [vmem:[#allocation10 + $0x560] sm:$0xff] %v4139_v39  ;;  %4397 = vst [vmem:[#allocation10 + $0x570] sm:$0xff] %v4141_v29  ;;  %v4140_v26 = vadd.f32 %v3511_v46, %v2422_v1  ;;  %v4142_v38 = vadd.f32 %v3864_v63, %v2775_v20  ;;  %v8761_v20 = vld [vmem:[#allocation218_spill] sm:$0xff]  ;;  %v2801_v24 = vadd.f32 %v7169_v56, %v8775_v51 }
 0x415   :  { %v3515_v57 = vpop.f32.mrf.mxu0  ;;  %v3868_v19 = vpop.f32.mrf.mxu1  ;;  %v2791_v39 = vadd.f32 %v7149_v48, %v8761_v20  ;;  %v8767_v48 = vld [vmem:[#allocation436_spill] sm:$0xff]  ;;  %v8781_v56 = vld [vmem:[#allocation442_spill] sm:$0xff] }
 0x416   :  { %4396 = vst [vmem:[#allocation10 + $0x568] sm:$0xff] %v4140_v26  ;;  %4398 = vst [vmem:[#allocation10 + $0x578] sm:$0xff] %v4142_v38  ;;  %v4143_v33 = vadd.f32 %v3515_v57, %v2426_v9  ;;  %v4145_v53 = vadd.f32 %v3868_v19, %v2779_v49  ;;  %v8763_v9 = vld [vmem:[#allocation434_spill] sm:$0xff]  ;;  %v8765_v49 = vld [vmem:[#allocation435_spill] sm:$0xff] }
 0x417   :  { %v3517_v8 = vpop.f32.mrf.mxu0  ;;  %v3870_v12 = vpop.f32.mrf.mxu1  ;;  %v2440_v43 = vadd.f32 %v8763_v9, %v8762_v34  ;;  %v2793_v26 = vadd.f32 %v8765_v49, %v8764_v30  ;;  %v8782_v23 = vld [vmem:[#allocation230_spill] sm:$0xff]  ;;  %v8785_v34 = vld [vmem:[#allocation444_spill] sm:$0xff]  ;;  %v8787_v30 = vld [vmem:[#allocation445_spill] sm:$0xff] }
 0x418   :  { %4399 = vst [vmem:[#allocation10 + $0x580] sm:$0xff] %v4143_v33  ;;  %4401 = vst [vmem:[#allocation10 + $0x590] sm:$0xff] %v4145_v53  ;;  %v4144_v54 = vadd.f32 %v3517_v8, %v2428_v59  ;;  %v4146_v21 = vadd.f32 %v3870_v12, %v2781_v11  ;;  %v2442_v59 = vadd.f32 %v8767_v48, %v8766_v27  ;;  %v8769_v11 = vld [vmem:[#allocation437_spill] sm:$0xff]  ;;  %v8789_v48 = vld [vmem:[#allocation234_spill] sm:$0xff] }
 0x419   :  { %v3519_v45 = vpop.f32.mrf.mxu0  ;;  %v3872_v31 = vpop.f32.mrf.mxu1  ;;  %v2795_v33 = vadd.f32 %v8769_v11, %v8768_v32 }
 0x41a   :  { %4400 = vst [vmem:[#allocation10 + $0x588] sm:$0xff] %v4144_v54  ;;  %4402 = vst [vmem:[#allocation10 + $0x598] sm:$0xff] %v4146_v21  ;;  %v4147_v50 = vadd.f32 %v3519_v45, %v2430_v42  ;;  %v4149_v60 = vadd.f32 %v3872_v31, %v2783_v5  ;;  %v8771_v42 = vld [vmem:[#allocation438_spill] sm:$0xff]  ;;  %v8773_v5 = vld [vmem:[#allocation439_spill] sm:$0xff] }
 0x41b   :  { %v3521_v37 = vpop.f32.mrf.mxu0  ;;  %v3874_v3 = vpop.f32.mrf.mxu1  ;;  %v2446_v7 = vadd.f32 %v8771_v42, %v8770_v25  ;;  %v2799_v54 = vadd.f32 %v8773_v5, %v8772_v58  ;;  %v8792_v25 = vld [vmem:[#allocation236_spill] sm:$0xff]  ;;  %v8793_v42 = vld [vmem:[#allocation447_spill] sm:$0xff] }
 0x41c   :  { %4403 = vst [vmem:[#allocation10 + $0x5a0] sm:$0xff] %v4147_v50  ;;  %4405 = vst [vmem:[#allocation10 + $0x5b0] sm:$0xff] %v4149_v60  ;;  %v4148_v17 = vadd.f32 %v3521_v37, %v2432_v47  ;;  %v4150_v44 = vadd.f32 %v3874_v3, %v2785_v28  ;;  %v2448_v47 = vadd.f32 %v7167_v61, %v8774_v13  ;;  %v8776_v3 = vld [vmem:[#allocation227_spill] sm:$0xff] }
 0x41d   :  { %v3525_v41 = vpop.f32.mrf.mxu0  ;;  %v3878_v1 = vpop.f32.mrf.mxu1  ;;  %v2450_v4 = vadd.f32 %v8777_v22, %v8776_v3  ;;  %v8800_v3 = vld [vmem:[#allocation240_spill] sm:$0xff]  ;;  %v8801_v22 = vld [vmem:[#allocation451_spill] sm:$0xff] }
 0x41e   :  { %4404 = vst [vmem:[#allocation10 + $0x5a8] sm:$0xff] %v4148_v17  ;;  %4406 = vst [vmem:[#allocation10 + $0x5b8] sm:$0xff] %v4150_v44  ;;  %v4151_v29 = vadd.f32 %v3525_v41, %v2436_v18  ;;  %v4153_v46 = vadd.f32 %v3878_v1, %v2789_v36  ;;  %v8778_v18 = vld [vmem:[#allocation228_spill] sm:$0xff]  ;;  %v8780_v41 = vld [vmem:[#allocation229_spill] sm:$0xff] }
 0x41f   :  { %v3527_v63 = vpop.f32.mrf.mxu0  ;;  %v3880_v2 = vpop.f32.mrf.mxu1  ;;  %v2803_v16 = vadd.f32 %v8779_v6, %v8778_v18  ;;  %v2452_v1 = vadd.f32 %v8781_v56, %v8780_v41 }
 0x420   :  { %4407 = vst [vmem:[#allocation10 + $0x5c0] sm:$0xff] %v4151_v29  ;;  %4409 = vst [vmem:[#allocation10 + $0x5d0] sm:$0xff] %v4153_v46  ;;  %v4152_v38 = vadd.f32 %v3527_v63, %v2438_v40  ;;  %v4154_v57 = vadd.f32 %v3880_v2, %v2791_v39  ;;  %v8783_v40 = vld [vmem:[#allocation443_spill] sm:$0xff] }
 0x421   :  { %v3529_v52 = vpop.f32.mrf.mxu0  ;;  %v3882_v19 = vpop.f32.mrf.mxu1  ;;  %v2805_v20 = vadd.f32 %v8783_v40, %v8782_v23  ;;  %v8784_v2 = vld [vmem:[#allocation231_spill] sm:$0xff] }
 0x422   :  { %4408 = vst [vmem:[#allocation10 + $0x5c8] sm:$0xff] %v4152_v38  ;;  %4410 = vst [vmem:[#allocation10 + $0x5d8] sm:$0xff] %v4154_v57  ;;  %v4155_v53 = vadd.f32 %v3529_v52, %v2440_v43  ;;  %v4157_v8 = vadd.f32 %v3882_v19, %v2793_v26  ;;  %v2456_v9 = vadd.f32 %v8785_v34, %v8784_v2  ;;  %v8786_v43 = vld [vmem:[#allocation232_spill] sm:$0xff]  ;;  %v8788_v19 = vld [vmem:[#allocation233_spill] sm:$0xff] }
 0x423   :  { %v3531_v12 = vpop.f32.mrf.mxu0  ;;  %v3884_v14 = vpop.f32.mrf.mxu1  ;;  %v2809_v49 = vadd.f32 %v8787_v30, %v8786_v43  ;;  %v2458_v27 = vadd.f32 %v7187_v55, %v8788_v19  ;;  %v8808_v30 = vld [vmem:[#allocation245_spill] sm:$0xff] }
 0x424   :  { %4411 = vst [vmem:[#allocation10 + $0x5e0] sm:$0xff] %v4155_v53  ;;  %4413 = vst [vmem:[#allocation10 + $0x5f0] sm:$0xff] %v4157_v8  ;;  %v4156_v21 = vadd.f32 %v3531_v12, %v2442_v59  ;;  %v4158_v45 = vadd.f32 %v3884_v14, %v2795_v33  ;;  %v2811_v59 = vadd.f32 %v7189_v10, %v8789_v48  ;;  %v8790_v8 = vld [vmem:[#allocation235_spill] sm:$0xff]  ;;  %v8791_v12 = vld [vmem:[#allocation446_spill] sm:$0xff] }
 0x425   :  { %v3535_v31 = vpop.f32.mrf.mxu0  ;;  %v3888_v35 = vpop.f32.mrf.mxu1  ;;  %v2460_v14 = vadd.f32 %v8791_v12, %v8790_v8  ;;  %v8795_v10 = vld [vmem:[#allocation448_spill] sm:$0xff] }
 0x426   :  { %4412 = vst [vmem:[#allocation10 + $0x5e8] sm:$0xff] %v4156_v21  ;;  %4414 = vst [vmem:[#allocation10 + $0x5f8] sm:$0xff] %v4158_v45  ;;  %v4159_v28 = vadd.f32 %v3535_v31, %v2446_v7  ;;  %v4161_v50 = vadd.f32 %v3888_v35, %v2799_v54  ;;  %v2813_v7 = vadd.f32 %v8793_v42, %v8792_v25  ;;  %v8794_v21 = vld [vmem:[#allocation237_spill] sm:$0xff]  ;;  %v8796_v31 = vld [vmem:[#allocation238_spill] sm:$0xff] }
 0x427   :  { %v3537_v60 = vpop.f32.mrf.mxu0  ;;  %v3890_v37 = vpop.f32.mrf.mxu1  ;;  %v2462_v45 = vadd.f32 %v8795_v10, %v8794_v21  ;;  %v8797_v35 = vld [vmem:[#allocation449_spill] sm:$0xff] }
 0x428   :  { %4415 = vst [vmem:[#allocation10 + $0x600] sm:$0xff] %v4159_v28  ;;  %4417 = vst [vmem:[#allocation10 + $0x610] sm:$0xff] %v4161_v50  ;;  %v4160_v36 = vadd.f32 %v3537_v60, %v2448_v47  ;;  %v4162_v17 = vadd.f32 %v3890_v37, %v2801_v24  ;;  %v2815_v13 = vadd.f32 %v8797_v35, %v8796_v31  ;;  %v8798_v50 = vld [vmem:[#allocation239_spill] sm:$0xff]  ;;  %v8799_v60 = vld [vmem:[#allocation450_spill] sm:$0xff] }
 0x429   :  { %v3539_v61 = vpop.f32.mrf.mxu0  ;;  %v3892_v44 = vpop.f32.mrf.mxu1  ;;  %v2466_v37 = vadd.f32 %v8799_v60, %v8798_v50  ;;  %v8819_v35 = vld [vmem:[#allocation251_spill] sm:$0xff] }
 0x42a   :  { %4416 = vst [vmem:[#allocation10 + $0x608] sm:$0xff] %v4160_v36  ;;  %4418 = vst [vmem:[#allocation10 + $0x618] sm:$0xff] %v4162_v17  ;;  %v4163_v39 = vadd.f32 %v3539_v61, %v2450_v4  ;;  %v4165_v29 = vadd.f32 %v3892_v44, %v2803_v16  ;;  %v2819_v4 = vadd.f32 %v8801_v22, %v8800_v3  ;;  %v8802_v17 = vld [vmem:[#allocation241_spill] sm:$0xff]  ;;  %v8803_v44 = vld [vmem:[#allocation242_spill] sm:$0xff] }
 0x42b   :  { %v3541_v46 = vpop.f32.mrf.mxu0  ;;  %v3894_v63 = vpop.f32.mrf.mxu1  ;;  %v2468_v61 = vadd.f32 %v7207_v62, %v8802_v17  ;;  %v2821_v41 = vadd.f32 %v7209_v0, %v8803_v44  ;;  %v8809_v0 = vld [vmem:[#allocation454_spill] sm:$0xff]  ;;  %v8823_v3 = vld [vmem:[#allocation253_spill] sm:$0xff] }
 0x42c   :  { %4419 = vst [vmem:[#allocation10 + $0x620] sm:$0xff] %v4163_v39  ;;  %4421 = vst [vmem:[#allocation10 + $0x630] sm:$0xff] %v4165_v29  ;;  %v4164_v26 = vadd.f32 %v3541_v46, %v2452_v1  ;;  %v4166_v38 = vadd.f32 %v3894_v63, %v2805_v20  ;;  %v8804_v20 = vld [vmem:[#allocation243_spill] sm:$0xff]  ;;  %v8805_v39 = vld [vmem:[#allocation452_spill] sm:$0xff] }
 0x42d   :  { %v3545_v57 = vpop.f32.mrf.mxu0  ;;  %v3898_v52 = vpop.f32.mrf.mxu1  ;;  %v2470_v29 = vadd.f32 %v8805_v39, %v8804_v20  ;;  %v8806_v46 = vld [vmem:[#allocation244_spill] sm:$0xff]  ;;  %v8807_v63 = vld [vmem:[#allocation453_spill] sm:$0xff] }
 0x42e   :  { %4420 = vst [vmem:[#allocation10 + $0x628] sm:$0xff] %v4164_v26  ;;  %4422 = vst [vmem:[#allocation10 + $0x638] sm:$0xff] %v4166_v38  ;;  %v4167_v32 = vadd.f32 %v3545_v57, %v2456_v9  ;;  %v4169_v11 = vadd.f32 %v3898_v52, %v2809_v49  ;;  %v2823_v2 = vadd.f32 %v8807_v63, %v8806_v46  ;;  %v8810_v26 = vld [vmem:[#allocation246_spill] sm:$0xff]  ;;  %v8811_v38 = vld [vmem:[#allocation455_spill] sm:$0xff] }
 0x42f   :  { %v3547_v33 = vpop.f32.mrf.mxu0  ;;  %v3900_v53 = vpop.f32.mrf.mxu1  ;;  %v2472_v49 = vadd.f32 %v8809_v0, %v8808_v30  ;;  %v2825_v57 = vadd.f32 %v8811_v38, %v8810_v26  ;;  %v8824_v22 = vld [vmem:[#allocation461_spill] sm:$0xff] }
 0x430   :  { %4423 = vst [vmem:[#allocation10 + $0x640] sm:$0xff] %v4167_v32  ;;  %4425 = vst [vmem:[#allocation10 + $0x650] sm:$0xff] %v4169_v11  ;;  %v4168_v58 = vadd.f32 %v3547_v33, %v2458_v27  ;;  %v4170_v5 = vadd.f32 %v3900_v53, %v2811_v59  ;;  %v8812_v59 = vld [vmem:[#allocation247_spill] sm:$0xff]  ;;  %v8813_v32 = vld [vmem:[#allocation456_spill] sm:$0xff] }
 0x431   :  { %v3549_v55 = vpop.f32.mrf.mxu0  ;;  %v3902_v54 = vpop.f32.mrf.mxu1  ;;  %v2476_v11 = vadd.f32 %v8813_v32, %v8812_v59  ;;  %v8814_v33 = vld [vmem:[#allocation248_spill] sm:$0xff]  ;;  %v8815_v53 = vld [vmem:[#allocation457_spill] sm:$0xff] }
 0x432   :  { %4424 = vst [vmem:[#allocation10 + $0x648] sm:$0xff] %v4168_v58  ;;  %4426 = vst [vmem:[#allocation10 + $0x658] sm:$0xff] %v4170_v5  ;;  %v4171_v47 = vadd.f32 %v3549_v55, %v2460_v14  ;;  %v4173_v51 = vadd.f32 %v3902_v54, %v2813_v7  ;;  %v2829_v8 = vadd.f32 %v8815_v53, %v8814_v33  ;;  %v8816_v7 = vld [vmem:[#allocation249_spill] sm:$0xff]  ;;  %v8817_v5 = vld [vmem:[#allocation250_spill] sm:$0xff] }
 0x433   :  { %v3551_v24 = vpop.f32.mrf.mxu0  ;;  %v3904_v28 = vpop.f32.mrf.mxu1  ;;  %v2478_v58 = vadd.f32 %v7227_v15, %v8816_v7  ;;  %v8818_v55 = vld [vmem:[#allocation458_spill] sm:$0xff] }
 0x434   :  { %4427 = vst [vmem:[#allocation10 + $0x660] sm:$0xff] %v4171_v47  ;;  %4429 = vst [vmem:[#allocation10 + $0x670] sm:$0xff] %v4173_v51  ;;  %v4172_v18 = vadd.f32 %v3551_v24, %v2462_v45  ;;  %v4174_v6 = vadd.f32 %v3904_v28, %v2815_v13  ;;  %v2831_v54 = vadd.f32 %v8818_v55, %v8817_v5  ;;  %v8820_v13 = vld [vmem:[#allocation459_spill] sm:$0xff]  ;;  %v8821_v51 = vld [vmem:[#allocation252_spill] sm:$0xff] }
 0x435   :  { %v3555_v16 = vpop.f32.mrf.mxu0  ;;  %v3908_v36 = vpop.f32.mrf.mxu1  ;;  %v2480_v47 = vadd.f32 %v8820_v13, %v8819_v35  ;;  %v8822_v24 = vld [vmem:[#allocation460_spill] sm:$0xff] }
 0x436   :  { %4428 = vst [vmem:[#allocation10 + $0x668] sm:$0xff] %v4172_v18  ;;  %4430 = vst [vmem:[#allocation10 + $0x678] sm:$0xff] %v4174_v6  ;;  %v4175_v56 = vadd.f32 %v3555_v16, %v2466_v37  ;;  %v4177_v1 = vadd.f32 %v3908_v36, %v2819_v4  ;;  %v2833_v28 = vadd.f32 %v8822_v24, %v8821_v51  ;;  %v8825_v18 = vld [vmem:[#allocation254_spill] sm:$0xff]  ;;  %v8846_v35 = vld [vmem:[#allocation472_spill] sm:$0xff] }
 0x437   :  { %v3557_v23 = vpop.f32.mrf.mxu0  ;;  %v3910_v40 = vpop.f32.mrf.mxu1  ;;  %v2482_v4 = vadd.f32 %v8824_v22, %v8823_v3  ;;  %v8826_v6 = vld [vmem:[#allocation462_spill] sm:$0xff] }
 0x438   :  { %4431 = vst [vmem:[#allocation10 + $0x680] sm:$0xff] %v4175_v56  ;;  %4433 = vst [vmem:[#allocation10 + $0x690] sm:$0xff] %v4177_v1  ;;  %v4176_v34 = vadd.f32 %v3557_v23, %v2468_v61  ;;  %v4178_v9 = vadd.f32 %v3910_v40, %v2821_v41  ;;  %v2835_v16 = vadd.f32 %v8826_v6, %v8825_v18  ;;  %v8827_v41 = vld [vmem:[#allocation255_spill] sm:$0xff]  ;;  %v8829_v23 = vld [vmem:[#allocation256_spill] sm:$0xff] }
 0x439   :  { %v3559_v62 = vpop.f32.mrf.mxu0  ;;  %v3912_v43 = vpop.f32.mrf.mxu1  ;;  %v8828_v56 = vld [vmem:[#allocation463_spill] sm:$0xff]  ;;  %v8830_v40 = vld [vmem:[#allocation464_spill] sm:$0xff]  ;;  %v8850_v3 = vld [vmem:[#allocation474_spill] sm:$0xff] }
 0x43a   :  { %4432 = vst [vmem:[#allocation10 + $0x688] sm:$0xff] %v4176_v34  ;;  %4434 = vst [vmem:[#allocation10 + $0x698] sm:$0xff] %v4178_v9  ;;  %v4179_v52 = vadd.f32 %v3559_v62, %v2470_v29  ;;  %v4181_v19 = vadd.f32 %v3912_v43, %v2823_v2  ;;  %v2486_v1 = vadd.f32 %v8828_v56, %v8827_v41  ;;  %v8831_v2 = vld [vmem:[#allocation257_spill] sm:$0xff]  ;;  %v8833_v62 = vld [vmem:[#allocation258_spill] sm:$0xff] }
 0x43b   :  { %v3561_v27 = vpop.f32.mrf.mxu0  ;;  %v3914_v48 = vpop.f32.mrf.mxu1  ;;  %v2839_v20 = vadd.f32 %v8830_v40, %v8829_v23  ;;  %v8832_v34 = vld [vmem:[#allocation465_spill] sm:$0xff]  ;;  %v8834_v43 = vld [vmem:[#allocation466_spill] sm:$0xff]  ;;  %v8854_v41 = vld [vmem:[#allocation476_spill] sm:$0xff] }
 0x43c   :  { %4435 = vst [vmem:[#allocation10 + $0x6a0] sm:$0xff] %v4179_v52  ;;  %4437 = vst [vmem:[#allocation10 + $0x6b0] sm:$0xff] %v4181_v19  ;;  %v4180_v12 = vadd.f32 %v3561_v27, %v2472_v49  ;;  %v4182_v14 = vadd.f32 %v3914_v48, %v2825_v57  ;;  %v2488_v9 = vadd.f32 %v8832_v34, %v8831_v2  ;;  %v8835_v57 = vld [vmem:[#allocation259_spill] sm:$0xff]  ;;  %v8837_v27 = vld [vmem:[#allocation260_spill] sm:$0xff] }
 0x43d   :  { %v3565_v25 = vpop.f32.mrf.mxu0  ;;  %v3918_v42 = vpop.f32.mrf.mxu1  ;;  %v2841_v30 = vadd.f32 %v8834_v43, %v8833_v62  ;;  %v8836_v52 = vld [vmem:[#allocation467_spill] sm:$0xff]  ;;  %v8838_v48 = vld [vmem:[#allocation468_spill] sm:$0xff]  ;;  %v8858_v2 = vld [vmem:[#allocation478_spill] sm:$0xff] }
 0x43e   :  { %4436 = vst [vmem:[#allocation10 + $0x6a8] sm:$0xff] %v4180_v12  ;;  %4438 = vst [vmem:[#allocation10 + $0x6b8] sm:$0xff] %v4182_v14  ;;  %v4183_v21 = vadd.f32 %v3565_v25, %v2476_v11  ;;  %v4185_v10 = vadd.f32 %v3918_v42, %v2829_v8  ;;  %v2490_v19 = vadd.f32 %v8836_v52, %v8835_v57  ;;  %v8839_v8 = vld [vmem:[#allocation261_spill] sm:$0xff]  ;;  %v8841_v25 = vld [vmem:[#allocation262_spill] sm:$0xff] }
 0x43f   :  { %v3567_v45 = vpop.f32.mrf.mxu0  ;;  %v3920_v31 = vpop.f32.mrf.mxu1  ;;  %v2843_v59 = vadd.f32 %v8838_v48, %v8837_v27  ;;  %v8840_v12 = vld [vmem:[#allocation469_spill] sm:$0xff]  ;;  %v8842_v42 = vld [vmem:[#allocation470_spill] sm:$0xff]  ;;  %v8862_v57 = vld [vmem:[#allocation480_spill] sm:$0xff] }
 0x440   :  { %4439 = vst [vmem:[#allocation10 + $0x6c0] sm:$0xff] %v4183_v21  ;;  %4441 = vst [vmem:[#allocation10 + $0x6d0] sm:$0xff] %v4185_v10  ;;  %v4184_v50 = vadd.f32 %v3567_v45, %v2478_v58  ;;  %v4186_v60 = vadd.f32 %v3920_v31, %v2831_v54  ;;  %v2492_v14 = vadd.f32 %v8840_v12, %v8839_v8  ;;  %v8843_v21 = vld [vmem:[#allocation263_spill] sm:$0xff]  ;;  %v8845_v31 = vld [vmem:[#allocation264_spill] sm:$0xff] }
 0x441   :  { %v3569_v15 = vpop.f32.mrf.mxu0  ;;  %v3922_v37 = vpop.f32.mrf.mxu1  ;;  %v2845_v7 = vadd.f32 %v8842_v42, %v8841_v25  ;;  %v8844_v10 = vld [vmem:[#allocation471_spill] sm:$0xff]  ;;  %v2849_v13 = vadd.f32 %v8846_v35, %v8845_v31  ;;  %v8866_v8 = vld [vmem:[#allocation482_spill] sm:$0xff] }
 0x442   :  { %4440 = vst [vmem:[#allocation10 + $0x6c8] sm:$0xff] %v4184_v50  ;;  %4442 = vst [vmem:[#allocation10 + $0x6d8] sm:$0xff] %v4186_v60  ;;  %v4187_v36 = vadd.f32 %v3569_v15, %v2480_v47  ;;  %v4189_v17 = vadd.f32 %v3922_v37, %v2833_v28  ;;  %v2496_v45 = vadd.f32 %v8844_v10, %v8843_v21  ;;  %v8847_v50 = vld [vmem:[#allocation265_spill] sm:$0xff]  ;;  %v8849_v37 = vld [vmem:[#allocation266_spill] sm:$0xff] }
 0x443   :  { %v3571_v61 = vpop.f32.mrf.mxu0  ;;  %v3924_v44 = vpop.f32.mrf.mxu1  ;;  %v8848_v60 = vld [vmem:[#allocation473_spill] sm:$0xff]  ;;  %v2851_v22 = vadd.f32 %v8850_v3, %v8849_v37  ;;  %v8870_v21 = vld [vmem:[#allocation484_spill] sm:$0xff] }
 0x444   :  { %4443 = vst [vmem:[#allocation10 + $0x6e0] sm:$0xff] %v4187_v36  ;;  %4445 = vst [vmem:[#allocation10 + $0x6f0] sm:$0xff] %v4189_v17  ;;  %v4188_v39 = vadd.f32 %v3571_v61, %v2482_v4  ;;  %v4190_v29 = vadd.f32 %v3924_v44, %v2835_v16  ;;  %v2498_v15 = vadd.f32 %v8848_v60, %v8847_v50  ;;  %v8851_v36 = vld [vmem:[#allocation267_spill] sm:$0xff]  ;;  %v8853_v44 = vld [vmem:[#allocation268_spill] sm:$0xff] }
 0x445   :  { %v3575_v46 = vpop.f32.mrf.mxu0  ;;  %v3928_v63 = vpop.f32.mrf.mxu1  ;;  %v8852_v17 = vld [vmem:[#allocation475_spill] sm:$0xff]  ;;  %v2853_v56 = vadd.f32 %v8854_v41, %v8853_v44  ;;  %v8874_v50 = vld [vmem:[#allocation486_spill] sm:$0xff] }
 0x446   :  { %4444 = vst [vmem:[#allocation10 + $0x6e8] sm:$0xff] %v4188_v39  ;;  %4446 = vst [vmem:[#allocation10 + $0x6f8] sm:$0xff] %v4190_v29  ;;  %v4191_v0 = vadd.f32 %v3575_v46, %v2486_v1  ;;  %v4193_v49 = vadd.f32 %v3928_v63, %v2839_v20  ;;  %v2500_v61 = vadd.f32 %v8852_v17, %v8851_v36  ;;  %v8855_v39 = vld [vmem:[#allocation269_spill] sm:$0xff]  ;;  %v8857_v63 = vld [vmem:[#allocation270_spill] sm:$0xff] }
 0x447   :  { %v3577_v26 = vpop.f32.mrf.mxu0  ;;  %v3930_v38 = vpop.f32.mrf.mxu1  ;;  %v8856_v29 = vld [vmem:[#allocation477_spill] sm:$0xff]  ;;  %v2855_v34 = vadd.f32 %v8858_v2, %v8857_v63  ;;  %v8878_v36 = vld [vmem:[#allocation488_spill] sm:$0xff] }
 0x448   :  { %4447 = vst [vmem:[#allocation10 + $0x700] sm:$0xff] %v4191_v0  ;;  %4449 = vst [vmem:[#allocation10 + $0x710] sm:$0xff] %v4193_v49  ;;  %v4192_v32 = vadd.f32 %v3577_v26, %v2488_v9  ;;  %v4194_v11 = vadd.f32 %v3930_v38, %v2841_v30  ;;  %v2502_v46 = vadd.f32 %v8856_v29, %v8855_v39  ;;  %v8859_v0 = vld [vmem:[#allocation271_spill] sm:$0xff]  ;;  %v8861_v38 = vld [vmem:[#allocation272_spill] sm:$0xff] }
 0x449   :  { %v3579_v33 = vpop.f32.mrf.mxu0  ;;  %v3932_v53 = vpop.f32.mrf.mxu1  ;;  %v8860_v49 = vld [vmem:[#allocation479_spill] sm:$0xff]  ;;  %v2859_v52 = vadd.f32 %v8862_v57, %v8861_v38  ;;  %v8882_v39 = vld [vmem:[#allocation490_spill] sm:$0xff] }
 0x44a   :  { %4448 = vst [vmem:[#allocation10 + $0x708] sm:$0xff] %v4192_v32  ;;  %4450 = vst [vmem:[#allocation10 + $0x718] sm:$0xff] %v4194_v11  ;;  %v4195_v58 = vadd.f32 %v3579_v33, %v2490_v19  ;;  %v4197_v5 = vadd.f32 %v3932_v53, %v2843_v59  ;;  %v2506_v26 = vadd.f32 %v8860_v49, %v8859_v0  ;;  %v8863_v32 = vld [vmem:[#allocation273_spill] sm:$0xff]  ;;  %v8865_v53 = vld [vmem:[#allocation274_spill] sm:$0xff] }
 0x44b   :  { %v3581_v55 = vpop.f32.mrf.mxu0  ;;  %v3934_v54 = vpop.f32.mrf.mxu1  ;;  %v8864_v11 = vld [vmem:[#allocation481_spill] sm:$0xff]  ;;  %v2861_v12 = vadd.f32 %v8866_v8, %v8865_v53  ;;  %v8886_v0 = vld [vmem:[#allocation492_spill] sm:$0xff] }
 0x44c   :  { %4451 = vst [vmem:[#allocation10 + $0x720] sm:$0xff] %v4195_v58  ;;  %4453 = vst [vmem:[#allocation10 + $0x730] sm:$0xff] %v4197_v5  ;;  %v4196_v47 = vadd.f32 %v3581_v55, %v2492_v14  ;;  %v4198_v51 = vadd.f32 %v3934_v54, %v2845_v7  ;;  %v2508_v33 = vadd.f32 %v8864_v11, %v8863_v32  ;;  %v8867_v58 = vld [vmem:[#allocation275_spill] sm:$0xff]  ;;  %v8869_v54 = vld [vmem:[#allocation276_spill] sm:$0xff] }
 0x44d   :  { %v3585_v24 = vpop.f32.mrf.mxu0  ;;  %v3938_v28 = vpop.f32.mrf.mxu1  ;;  %v8868_v5 = vld [vmem:[#allocation483_spill] sm:$0xff]  ;;  %v2863_v10 = vadd.f32 %v8870_v21, %v8869_v54  ;;  %v8890_v32 = vld [vmem:[#allocation494_spill] sm:$0xff] }
 0x44e   :  { %4452 = vst [vmem:[#allocation10 + $0x728] sm:$0xff] %v4196_v47  ;;  %4454 = vst [vmem:[#allocation10 + $0x738] sm:$0xff] %v4198_v51  ;;  %v4199_v4 = vadd.f32 %v3585_v24, %v2496_v45  ;;  %v4201_v18 = vadd.f32 %v3938_v28, %v2849_v13  ;;  %v2510_v55 = vadd.f32 %v8868_v5, %v8867_v58  ;;  %v8871_v47 = vld [vmem:[#allocation277_spill] sm:$0xff]  ;;  %v8873_v28 = vld [vmem:[#allocation278_spill] sm:$0xff] }
 0x44f   :  { %v3587_v6 = vpop.f32.mrf.mxu0  ;;  %v3940_v16 = vpop.f32.mrf.mxu1  ;;  %v8872_v51 = vld [vmem:[#allocation485_spill] sm:$0xff]  ;;  %v2865_v60 = vadd.f32 %v8874_v50, %v8873_v28 }
 0x450   :  { %4455 = vst [vmem:[#allocation10 + $0x740] sm:$0xff] %v4199_v4  ;;  %4457 = vst [vmem:[#allocation10 + $0x750] sm:$0xff] %v4201_v18  ;;  %v4200_v1 = vadd.f32 %v3587_v6, %v2498_v15  ;;  %v4202_v23 = vadd.f32 %v3940_v16, %v2851_v22  ;;  %v2512_v24 = vadd.f32 %v8872_v51, %v8871_v47  ;;  %v8875_v4 = vld [vmem:[#allocation279_spill] sm:$0xff]  ;;  %v8877_v16 = vld [vmem:[#allocation280_spill] sm:$0xff] }
 0x451   :  { %v3589_v40 = vpop.f32.mrf.mxu0  ;;  %v3942_v20 = vpop.f32.mrf.mxu1  ;;  %v8876_v18 = vld [vmem:[#allocation487_spill] sm:$0xff]  ;;  %v2869_v17 = vadd.f32 %v8878_v36, %v8877_v16 }
 0x452   :  { %4456 = vst [vmem:[#allocation10 + $0x748] sm:$0xff] %v4200_v1  ;;  %4458 = vst [vmem:[#allocation10 + $0x758] sm:$0xff] %v4202_v23  ;;  %v4203_v9 = vadd.f32 %v3589_v40, %v2500_v61  ;;  %v4205_v62 = vadd.f32 %v3942_v20, %v2853_v56  ;;  %v2516_v6 = vadd.f32 %v8876_v18, %v8875_v4  ;;  %v8879_v1 = vld [vmem:[#allocation281_spill] sm:$0xff]  ;;  %v8881_v20 = vld [vmem:[#allocation282_spill] sm:$0xff] }
 0x453   :  { %v3591_v43 = vpop.f32.mrf.mxu0  ;;  %v3944_v30 = vpop.f32.mrf.mxu1  ;;  %v8880_v23 = vld [vmem:[#allocation489_spill] sm:$0xff]  ;;  %v2871_v29 = vadd.f32 %v8882_v39, %v8881_v20 }
 0x454   :  { %4459 = vst [vmem:[#allocation10 + $0x760] sm:$0xff] %v4203_v9  ;;  %4461 = vst [vmem:[#allocation10 + $0x770] sm:$0xff] %v4205_v62  ;;  %v4204_v19 = vadd.f32 %v3591_v43, %v2502_v46  ;;  %v4206_v27 = vadd.f32 %v3944_v30, %v2855_v34  ;;  %v2518_v40 = vadd.f32 %v8880_v23, %v8879_v1  ;;  %v8883_v9 = vld [vmem:[#allocation283_spill] sm:$0xff]  ;;  %v8885_v30 = vld [vmem:[#allocation284_spill] sm:$0xff] }
 0x455   :  { %v3595_v48 = vpop.f32.mrf.mxu0  ;;  %v3948_v59 = vpop.f32.mrf.mxu1  ;;  %v8884_v62 = vld [vmem:[#allocation491_spill] sm:$0xff]  ;;  %v2873_v49 = vadd.f32 %v8886_v0, %v8885_v30 }
 0x456   :  { %4460 = vst [vmem:[#allocation10 + $0x768] sm:$0xff] %v4204_v19  ;;  %4462 = vst [vmem:[#allocation10 + $0x778] sm:$0xff] %v4206_v27  ;;  %v4207_v14 = vadd.f32 %v3595_v48, %v2506_v26  ;;  %v4209_v25 = vadd.f32 %v3948_v59, %v2859_v52  ;;  %v2520_v43 = vadd.f32 %v8884_v62, %v8883_v9  ;;  %v8887_v19 = vld [vmem:[#allocation285_spill] sm:$0xff]  ;;  %v8889_v59 = vld [vmem:[#allocation286_spill] sm:$0xff] }
 0x457   :  { %v3597_v42 = vpop.f32.mrf.mxu0  ;;  %v3950_v7 = vpop.f32.mrf.mxu1  ;;  %v8888_v27 = vld [vmem:[#allocation493_spill] sm:$0xff]  ;;  %v2875_v11 = vadd.f32 %v8890_v32, %v8889_v59 }
 0x458   :  { %4463 = vst [vmem:[#allocation10 + $0x780] sm:$0xff] %v4207_v14  ;;  %4465 = vst [vmem:[#allocation10 + $0x790] sm:$0xff] %v4209_v25  ;;  %v4208_v45 = vadd.f32 %v3597_v42, %v2508_v33  ;;  %v4210_v31 = vadd.f32 %v3950_v7, %v2861_v12  ;;  %v2522_v48 = vadd.f32 %v8888_v27, %v8887_v19 }
 0x459   :  { %v3599_v35 = vpop.f32.mrf.mxu0  ;;  %v3952_v13 = vpop.f32.mrf.mxu1 }
 0x45a   :  { %4464 = vst [vmem:[#allocation10 + $0x788] sm:$0xff] %v4208_v45  ;;  %4466 = vst [vmem:[#allocation10 + $0x798] sm:$0xff] %v4210_v31  ;;  %v4211_v15 = vadd.f32 %v3599_v35, %v2510_v55  ;;  %v4213_v37 = vadd.f32 %v3952_v13, %v2863_v10 }
 0x45b   :  { %v3601_v3 = vpop.f32.mrf.mxu0  ;;  %v3954_v22 = vpop.f32.mrf.mxu1 }
 0x45c   :  { %4467 = vst [vmem:[#allocation10 + $0x7a0] sm:$0xff] %v4211_v15  ;;  %4469 = vst [vmem:[#allocation10 + $0x7b0] sm:$0xff] %v4213_v37  ;;  %v4212_v61 = vadd.f32 %v3601_v3, %v2512_v24  ;;  %v4214_v44 = vadd.f32 %v3954_v22, %v2865_v60 }
 0x45d   :  { %v3605_v41 = vpop.f32.mrf.mxu0  ;;  %v3958_v56 = vpop.f32.mrf.mxu1 }
 0x45e   :  { %4468 = vst [vmem:[#allocation10 + $0x7a8] sm:$0xff] %v4212_v61  ;;  %4470 = vst [vmem:[#allocation10 + $0x7b8] sm:$0xff] %v4214_v44  ;;  %v4215_v46 = vadd.f32 %v3605_v41, %v2516_v6  ;;  %v4217_v63 = vadd.f32 %v3958_v56, %v2869_v17 }
 0x45f   :  { %v3607_v2 = vpop.f32.mrf.mxu0  ;;  %v3960_v34 = vpop.f32.mrf.mxu1 }
 0x460   :  { %4471 = vst [vmem:[#allocation10 + $0x7c0] sm:$0xff] %v4215_v46  ;;  %4473 = vst [vmem:[#allocation10 + $0x7d0] sm:$0xff] %v4217_v63  ;;  %v4216_v26 = vadd.f32 %v3607_v2, %v2518_v40  ;;  %v4218_v38 = vadd.f32 %v3960_v34, %v2871_v29 }
 0x461   :  { %v3609_v57 = vpop.f32.mrf.mxu0  ;;  %v3962_v52 = vpop.f32.mrf.mxu1 }
 0x462   :  { %4472 = vst [vmem:[#allocation10 + $0x7c8] sm:$0xff] %v4216_v26  ;;  %4474 = vst [vmem:[#allocation10 + $0x7d8] sm:$0xff] %v4218_v38  ;;  %v4219_v33 = vadd.f32 %v3609_v57, %v2520_v43  ;;  %v4221_v53 = vadd.f32 %v3962_v52, %v2873_v49 }
 0x463   :  { %v3611_v8 = vpop.f32.mrf.mxu0  ;;  %v3964_v12 = vpop.f32.mrf.mxu1 }
 0x464   :  { %4475 = vst [vmem:[#allocation10 + $0x7e0] sm:$0xff] %v4219_v33  ;;  %4477 = vst [vmem:[#allocation10 + $0x7f0] sm:$0xff] %v4221_v53  ;;  %v4220_v14 = vadd.f32 %v3611_v8, %v2522_v48  ;;  %v4222_v25 = vadd.f32 %v3964_v12, %v2875_v11 }
 0x466   :  { %4476 = vst [vmem:[#allocation10 + $0x7e8] sm:$0xff] %v4220_v14  ;;  %4478 = vst [vmem:[#allocation10 + $0x7f8] sm:$0xff] %v4222_v25 }
 0x467   :  { %5208 = shalt.err (!%p5205_p10)
}
 0x468   :  { %s5233_s10 = smov 512   ;;  %s5234_s11 = smov 32  }
 0x469   :  { %4490 = dma.vmem_to_hbm [thread:$0]  %s4485_s3, 32768, %s7868_s4, [#allocation4], %s5233_s10, %s5233_s10, %s5234_s11  }
 0x46a   :  { %5223 = dma.done.wait [#allocation4], 32768  }
 0x46b   :  { %5224 = vsyncadd [#allocation4], 4294934528 }
 0x46c   :  { %4494 = vsyncpa [#allocation3], 1 }
 0x46d   :  { %4495 = vsyncpa [#allocation6], 1 }
 0x46e   :  { %4496 = vsyncpa [#allocation9], 1 }
 0x46f   :  { %4497 = vsyncpa [#allocation4], 1 }

</bundles_post_ra>
